<compile_context>
chip_gen: v5e
topology: v5e:2x2
jax: 0.10.0
libtpu: 0.0.40
codegen_flags: <defaults>
</compile_context>

<pallas_src>
import jax
import jax.numpy as jnp
from jax.experimental import pallas as pl
from jax.experimental.pallas import tpu as pltpu


_NEG_SLOPE = 0.2


def _leaky(z):
    return jnp.where(z >= 0, z, _NEG_SLOPE * z)


# ----------------------------- fused Pallas kernel -----------------------------

def _disc_kernel(p1_ref, w1_ref, b1_ref, w2_ref, b2_ref, wf_ref, bf_ref, o_ref):
    """Whole Discriminator forward for one image (one grid step).

    p1_ref : (1, 1536, 9) bf16  conv1 im2col patches, three y1-column-phase
                                groups stacked along rows:
                                  rows [   0,  512) -> y1 col 2J-1 (group m)
                                  rows [ 512, 1024) -> y1 col 2J   (group e)
                                  rows [1024, 1536) -> y1 col 2J+1 (group o)
                                row within a group = i*16 + J  (i = y1 row).
    w1_ref : (9, 64)      bf16  conv1 weight  [kh*3+kw, cout]
    b1_ref : (1, 64)      f32
    w2_ref : (9, 64, 128) bf16  conv2 weight  [kh*3+kw, cin, cout]
    b2_ref : (1, 128)     f32
    wf_ref : (256, 128)   f32   fc weight permuted to (H*W, C) order
    bf_ref : (1, 1)       f32
    o_ref  : (1, 1, 128)  f32   fc output broadcast across the lane dim
    """
    f32, bf16 = jnp.float32, jnp.bfloat16

    # ---- conv1: one (1536,9)@(9,64) bf16 MXU matmul covers all 3 phases ----
    z = jnp.dot(p1_ref[0], w1_ref[...], preferred_element_type=f32)   # (1536, 64)
    z = _leaky(z + b1_ref[...])
    # Group-m rows with J == 0 are y1 column -1 (conv2 zero padding): zero them
    # (matmul of zero patches + bias produced leaky(b1) there).
    row = jax.lax.broadcasted_iota(jnp.int32, z.shape, 0)
    z = jnp.where(jnp.logical_and(row < 512, (row & 15) == 0), 0.0, z)
    # [g, ii, p, J, c] = y1[2*ii + p, col_g(J), c]
    y = z.astype(bf16).reshape(3, 16, 2, 16, 64)

    # ---- conv2: 9 shifted-tap (256,64)@(64,128) bf16 MXU dots, f32 acc -----
    w2 = w2_ref[...]                                    # (9, 64, 128)
    acc = jnp.zeros((256, 128), f32)
    zero_row = jnp.zeros((1, 16, 64), bf16)
    for kh in range(3):
        p = 0 if kh == 1 else 1                         # parity of y1 row 2*I2 + kh - 1
        for kw in range(3):
            tap = y[kw, :, p]                           # (16,16,64) = y1[2I2+p, 2J2+kw-1, :]
            if kh == 0:                                 # row 2*I2-1: shift down, zero at I2=0
                tap = jnp.concatenate([zero_row, tap[:-1]], axis=0)
            acc = acc + jnp.dot(tap.reshape(256, 64), w2[kh * 3 + kw],
                                preferred_element_type=f32)
    y2 = _leaky(acc + b2_ref[...])                      # (256, 128) f32; row = I2*16 + J2

    # ---- fc: PyTorch (C,H,W) flatten folded into the permuted weight -------
    total = jnp.sum(y2 * wf_ref[...], keepdims=True)    # (1, 1)
    out = total + bf_ref[...]
    o_ref[...] = jnp.broadcast_to(out.reshape(1, 1, 1), (1, 1, 128))


# ------------------------------- JAX glue ----------------------------------

def _conv1_patches(x, B):
    """conv1 im2col split into three y1-column-phase groups -> (B, 1536, 9) bf16."""
    xp = jnp.pad(x, ((0, 0), (1, 1), (1, 1)))                  # (B, 66, 66)

    def taps(col_off):
        ts = []
        for kh in range(3):
            for kw in range(3):
                c0 = kw + col_off
                ts.append(xp[:, kh:kh + 63:2, c0:c0 + 61:4])   # (B, 32, 16)
        return jnp.stack(ts, axis=-1)                          # (B, 32, 16, 9)

    pe = taps(0)                                               # y1 column 2J
    po = taps(2)                                               # y1 column 2J+1
    pm = jnp.concatenate(                                      # y1 column 2J-1
        [jnp.zeros_like(po[:, :, :1, :]), po[:, :, :-1, :]], axis=2)
    p1 = jnp.stack([pm, pe, po], axis=1)                       # (B, 3, 32, 16, 9)
    return p1.reshape(B, 3 * 512, 9).astype(jnp.bfloat16)


def discriminator_forward(x_nchw, params):
    w1, b1, w2, b2, wf, bf = params
    B, C, H, W = x_nchw.shape
    assert (C, H, W) == (1, 64, 64), x_nchw.shape

    p1 = _conv1_patches(x_nchw.reshape(B, H, W), B)            # (B, 1536, 9)

    # Weight prep: trace-time reshuffles of constants (bf16 operands for the MXU).
    w1m = jnp.transpose(w1.reshape(64, 9), (1, 0)).astype(jnp.bfloat16)          # (9, 64)
    w2t = jnp.transpose(w2, (2, 3, 1, 0)).reshape(9, 64, 128).astype(jnp.bfloat16)
    b1r = b1.reshape(1, 64).astype(jnp.float32)
    b2r = b2.reshape(1, 128).astype(jnp.float32)
    # fc weight permuted from PyTorch (C,H,W) flatten order to the kernel's (H,W,C).
    wfp = jnp.transpose(wf.reshape(128, 16, 16), (1, 2, 0)).reshape(256, 128)
    wfp = wfp.astype(jnp.float32)
    bfr = bf.reshape(1, 1).astype(jnp.float32)

    out3 = pl.pallas_call(
        _disc_kernel,
        out_shape=jax.ShapeDtypeStruct((B, 1, 128), jnp.float32),
        grid_spec=pltpu.PrefetchScalarGridSpec(
            num_scalar_prefetch=0,
            grid=(B,),
            in_specs=[
                pl.BlockSpec((1, 1536, 9), lambda b: (b, 0, 0)),
                pl.BlockSpec((9, 64), lambda b: (0, 0)),
                pl.BlockSpec((1, 64), lambda b: (0, 0)),
                pl.BlockSpec((9, 64, 128), lambda b: (0, 0, 0)),
                pl.BlockSpec((1, 128), lambda b: (0, 0)),
                pl.BlockSpec((256, 128), lambda b: (0, 0)),
                pl.BlockSpec((1, 1), lambda b: (0, 0)),
            ],
            out_specs=pl.BlockSpec((1, 1, 128), lambda b: (b, 0, 0)),
        ),
        compiler_params=pltpu.CompilerParams(
            dimension_semantics=("parallel",)),
    )(p1, w1m, b1r, w2t, b2r, wfp, bfr)
    return out3[:, :, 0]                                       # (B, 1)


def reference_forward(x_nchw, params):
    w1, b1, w2, b2, wf, bf = params
    dn = ("NCHW", "OIHW", "NCHW")
    y = jax.lax.conv_general_dilated(x_nchw, w1, (2, 2), ((1, 1), (1, 1)),
                                     dimension_numbers=dn)
    y = y + b1[None, :, None, None]
    y = jnp.where(y >= 0, y, 0.2 * y)
    y = jax.lax.conv_general_dilated(y, w2, (2, 2), ((1, 1), (1, 1)),
                                     dimension_numbers=dn)
    y = y + b2[None, :, None, None]
    y = jnp.where(y >= 0, y, 0.2 * y)
    y = y.reshape(y.shape[0], -1)
    return y @ wf + bf[None, :]


def init_params(key):
    k1, k2, k3, k4, k5, k6 = jax.random.split(key, 6)
    # Deterministic synthetic parameters (PyTorch shapes, OIHW conv weights).
    w1 = jax.random.normal(k1, (64, 1, 3, 3), jnp.float32) * (1.0 / 3.0)
    b1 = jax.random.normal(k2, (64,), jnp.float32) * 0.1
    w2 = jax.random.normal(k3, (128, 64, 3, 3), jnp.float32) * (1.0 / 24.0)
    b2 = jax.random.normal(k4, (128,), jnp.float32) * 0.1
    wf = jax.random.normal(k5, (128 * 16 * 16, 1), jnp.float32) * (1.0 / 181.0)
    bf = jax.random.normal(k6, (1,), jnp.float32) * 0.1
    return (w1, b1, w2, b2, wf, bf)


if __name__ == "__main__":
    key = jax.random.PRNGKey(0)
    kx, kp = jax.random.split(key)
    # fc expects 128*16*16 features => two stride-2 convs => 64x64 input.
    x = jax.random.normal(kx, (2, 1, 64, 64), jnp.float32)
    params = init_params(kp)

    fwd = jax.jit(discriminator_forward)
    out = jax.block_until_ready(fwd(x, params))

    ref = jax.block_until_ready(reference_forward(x, params))
    assert out.shape == (2, 1), out.shape
    # bf16 MXU operands with f32 accumulation -> looser tolerance than pure f32.
    assert jnp.allclose(out, ref, rtol=5e-2, atol=5e-2), (out, ref)

    print("KERNEL_OK")
</pallas_src>

<mosaic_0001>
module attributes {stable_mosaic.version = 11 : i64} {
  func.func @_disc_kernel(%arg0: i32, %arg1: memref<1x1536x9xbf16, #tpu.memory_space<vmem>>, %arg2: memref<9x64xbf16, #tpu.memory_space<vmem>>, %arg3: memref<1x64xf32, #tpu.memory_space<vmem>>, %arg4: memref<9x64x128xbf16, #tpu.memory_space<vmem>>, %arg5: memref<1x128xf32, #tpu.memory_space<vmem>>, %arg6: memref<256x128xf32, #tpu.memory_space<vmem>>, %arg7: memref<1x1xf32, #tpu.memory_space<vmem>>, %arg8: memref<1x1x128xf32, #tpu.memory_space<vmem>>) attributes {dimension_semantics = [#tpu.dimension_semantics<parallel>], iteration_bounds = array<i64: 2>, scalar_prefetch = 0 : i64, scratch_operands = 0 : i64, tpu.core_type = #tpu.core_type<tc>, window_params = [{transform_indices = @transform_0, window_bounds = array<i64: 1, 1536, 9>}, {pipeline_mode = #tpu.pipeline_mode<synchronous>, transform_indices = @transform_1, window_bounds = array<i64: 9, 64>}, {pipeline_mode = #tpu.pipeline_mode<synchronous>, transform_indices = @transform_2, window_bounds = array<i64: 1, 64>}, {pipeline_mode = #tpu.pipeline_mode<synchronous>, transform_indices = @transform_3, window_bounds = array<i64: 9, 64, 128>}, {pipeline_mode = #tpu.pipeline_mode<synchronous>, transform_indices = @transform_4, window_bounds = array<i64: 1, 128>}, {pipeline_mode = #tpu.pipeline_mode<synchronous>, transform_indices = @transform_5, window_bounds = array<i64: 256, 128>}, {pipeline_mode = #tpu.pipeline_mode<synchronous>, transform_indices = @transform_6, window_bounds = array<i64: 1, 1>}, {transform_indices = @transform_7, window_bounds = array<i64: 1, 1, 128>}]} {
    %c0 = arith.constant 0 : index
    %c0_0 = arith.constant 0 : index
    %c0_1 = arith.constant 0 : index
    %0 = vector.load %arg1[%c0, %c0_0, %c0_1] : memref<1x1536x9xbf16, #tpu.memory_space<vmem>>, vector<1x1536x9xbf16>
    %1 = vector.shape_cast %0 : vector<1x1536x9xbf16> to vector<1536x9xbf16>
    %c0_2 = arith.constant 0 : index
    %c0_3 = arith.constant 0 : index
    %2 = vector.load %arg2[%c0_2, %c0_3] : memref<9x64xbf16, #tpu.memory_space<vmem>>, vector<9x64xbf16>
    %cst = arith.constant dense<0.000000e+00> : vector<1536x64xf32>
    %3 = tpu.matmul %1, %2, %cst {dimension_numbers = #tpu.dot_dimension_numbers<[1], [0], [0], [1], [0, 0, 1, 1], [], []>} : vector<1536x9xbf16>, vector<9x64xbf16>, vector<1536x64xf32> -> vector<1536x64xf32>
    %c0_4 = arith.constant 0 : index
    %c0_5 = arith.constant 0 : index
    %4 = vector.load %arg3[%c0_4, %c0_5] : memref<1x64xf32, #tpu.memory_space<vmem>>, vector<1x64xf32>
    %5 = vector.broadcast %4 : vector<1x64xf32> to vector<1536x64xf32>
    %6 = arith.addf %3, %5 : vector<1536x64xf32>
    %cst_6 = arith.constant 0.000000e+00 : f32
    %7 = vector.broadcast %cst_6 : f32 to vector<1536x64xf32>
    %8 = arith.cmpf oge, %6, %7 : vector<1536x64xf32>
    %cst_7 = arith.constant 2.000000e-01 : f32
    %9 = vector.broadcast %cst_7 : f32 to vector<1536x64xf32>
    %10 = arith.mulf %9, %6 : vector<1536x64xf32>
    %11 = arith.select %8, %6, %10 : vector<1536x64xi1>, vector<1536x64xf32>
    %12 = tpu.iota {dimensions = array<i32: 0>} : vector<1536x64xi32>
    %c512_i32 = arith.constant 512 : i32
    %13 = vector.broadcast %c512_i32 : i32 to vector<1536x64xi32>
    %14 = arith.cmpi slt, %12, %13 : vector<1536x64xi32>
    %c15_i32 = arith.constant 15 : i32
    %15 = vector.broadcast %c15_i32 : i32 to vector<1536x64xi32>
    %16 = arith.andi %12, %15 : vector<1536x64xi32>
    %c0_i32 = arith.constant 0 : i32
    %17 = vector.broadcast %c0_i32 : i32 to vector<1536x64xi32>
    %18 = arith.cmpi eq, %16, %17 : vector<1536x64xi32>
    %19 = arith.andi %14, %18 : vector<1536x64xi1>
    %cst_8 = arith.constant 0.000000e+00 : f32
    %20 = vector.broadcast %cst_8 : f32 to vector<1536x64xf32>
    %21 = arith.select %19, %20, %11 : vector<1536x64xi1>, vector<1536x64xf32>
    %22 = arith.truncf %21 : vector<1536x64xf32> to vector<1536x64xbf16>
    %23 = vector.shape_cast %22 : vector<1536x64xbf16> to vector<3x16x2x16x64xbf16>
    %c0_9 = arith.constant 0 : index
    %c0_10 = arith.constant 0 : index
    %c0_11 = arith.constant 0 : index
    %24 = vector.load %arg4[%c0_9, %c0_10, %c0_11] : memref<9x64x128xbf16, #tpu.memory_space<vmem>>, vector<9x64x128xbf16>
    %cst_12 = arith.constant 0.000000e+00 : f32
    %25 = vector.broadcast %cst_12 : f32 to vector<256x128xf32>
    %cst_13 = arith.constant 0.000000e+00 : bf16
    %26 = vector.broadcast %cst_13 : bf16 to vector<1x16x64xbf16>
    %27 = vector.extract_strided_slice %23 {offsets = [0, 0, 1, 0, 0], sizes = [1, 16, 1, 16, 64], strides = [1, 1, 1, 1, 1]} : vector<3x16x2x16x64xbf16> to vector<1x16x1x16x64xbf16>
    %28 = vector.shape_cast %27 : vector<1x16x1x16x64xbf16> to vector<16x16x64xbf16>
    %29 = vector.extract_strided_slice %28 {offsets = [0, 0, 0], sizes = [15, 16, 64], strides = [1, 1, 1]} : vector<16x16x64xbf16> to vector<15x16x64xbf16>
    %30 = tpu.concatenate %26, %29 in 0 : vector<1x16x64xbf16>, vector<15x16x64xbf16> -> vector<16x16x64xbf16>
    %31 = vector.shape_cast %30 : vector<16x16x64xbf16> to vector<256x64xbf16>
    %32 = vector.extract_strided_slice %24 {offsets = [0, 0, 0], sizes = [1, 64, 128], strides = [1, 1, 1]} : vector<9x64x128xbf16> to vector<1x64x128xbf16>
    %33 = vector.shape_cast %32 : vector<1x64x128xbf16> to vector<64x128xbf16>
    %cst_14 = arith.constant dense<0.000000e+00> : vector<256x128xf32>
    %34 = tpu.matmul %31, %33, %cst_14 {dimension_numbers = #tpu.dot_dimension_numbers<[1], [0], [0], [1], [0, 0, 1, 1], [], []>} : vector<256x64xbf16>, vector<64x128xbf16>, vector<256x128xf32> -> vector<256x128xf32>
    %35 = arith.addf %25, %34 : vector<256x128xf32>
    %36 = vector.extract_strided_slice %23 {offsets = [1, 0, 1, 0, 0], sizes = [1, 16, 1, 16, 64], strides = [1, 1, 1, 1, 1]} : vector<3x16x2x16x64xbf16> to vector<1x16x1x16x64xbf16>
    %37 = vector.shape_cast %36 : vector<1x16x1x16x64xbf16> to vector<16x16x64xbf16>
    %38 = vector.extract_strided_slice %37 {offsets = [0, 0, 0], sizes = [15, 16, 64], strides = [1, 1, 1]} : vector<16x16x64xbf16> to vector<15x16x64xbf16>
    %39 = tpu.concatenate %26, %38 in 0 : vector<1x16x64xbf16>, vector<15x16x64xbf16> -> vector<16x16x64xbf16>
    %40 = vector.shape_cast %39 : vector<16x16x64xbf16> to vector<256x64xbf16>
    %41 = vector.extract_strided_slice %24 {offsets = [1, 0, 0], sizes = [1, 64, 128], strides = [1, 1, 1]} : vector<9x64x128xbf16> to vector<1x64x128xbf16>
    %42 = vector.shape_cast %41 : vector<1x64x128xbf16> to vector<64x128xbf16>
    %cst_15 = arith.constant dense<0.000000e+00> : vector<256x128xf32>
    %43 = tpu.matmul %40, %42, %cst_15 {dimension_numbers = #tpu.dot_dimension_numbers<[1], [0], [0], [1], [0, 0, 1, 1], [], []>} : vector<256x64xbf16>, vector<64x128xbf16>, vector<256x128xf32> -> vector<256x128xf32>
    %44 = arith.addf %35, %43 : vector<256x128xf32>
    %45 = vector.extract_strided_slice %23 {offsets = [2, 0, 1, 0, 0], sizes = [1, 16, 1, 16, 64], strides = [1, 1, 1, 1, 1]} : vector<3x16x2x16x64xbf16> to vector<1x16x1x16x64xbf16>
    %46 = vector.shape_cast %45 : vector<1x16x1x16x64xbf16> to vector<16x16x64xbf16>
    %47 = vector.extract_strided_slice %46 {offsets = [0, 0, 0], sizes = [15, 16, 64], strides = [1, 1, 1]} : vector<16x16x64xbf16> to vector<15x16x64xbf16>
    %48 = tpu.concatenate %26, %47 in 0 : vector<1x16x64xbf16>, vector<15x16x64xbf16> -> vector<16x16x64xbf16>
    %49 = vector.shape_cast %48 : vector<16x16x64xbf16> to vector<256x64xbf16>
    %50 = vector.extract_strided_slice %24 {offsets = [2, 0, 0], sizes = [1, 64, 128], strides = [1, 1, 1]} : vector<9x64x128xbf16> to vector<1x64x128xbf16>
    %51 = vector.shape_cast %50 : vector<1x64x128xbf16> to vector<64x128xbf16>
    %cst_16 = arith.constant dense<0.000000e+00> : vector<256x128xf32>
    %52 = tpu.matmul %49, %51, %cst_16 {dimension_numbers = #tpu.dot_dimension_numbers<[1], [0], [0], [1], [0, 0, 1, 1], [], []>} : vector<256x64xbf16>, vector<64x128xbf16>, vector<256x128xf32> -> vector<256x128xf32>
    %53 = arith.addf %44, %52 : vector<256x128xf32>
    %54 = vector.extract_strided_slice %23 {offsets = [0, 0, 0, 0, 0], sizes = [1, 16, 1, 16, 64], strides = [1, 1, 1, 1, 1]} : vector<3x16x2x16x64xbf16> to vector<1x16x1x16x64xbf16>
    %55 = vector.shape_cast %54 : vector<1x16x1x16x64xbf16> to vector<16x16x64xbf16>
    %56 = vector.shape_cast %55 : vector<16x16x64xbf16> to vector<256x64xbf16>
    %57 = vector.extract_strided_slice %24 {offsets = [3, 0, 0], sizes = [1, 64, 128], strides = [1, 1, 1]} : vector<9x64x128xbf16> to vector<1x64x128xbf16>
    %58 = vector.shape_cast %57 : vector<1x64x128xbf16> to vector<64x128xbf16>
    %cst_17 = arith.constant dense<0.000000e+00> : vector<256x128xf32>
    %59 = tpu.matmul %56, %58, %cst_17 {dimension_numbers = #tpu.dot_dimension_numbers<[1], [0], [0], [1], [0, 0, 1, 1], [], []>} : vector<256x64xbf16>, vector<64x128xbf16>, vector<256x128xf32> -> vector<256x128xf32>
    %60 = arith.addf %53, %59 : vector<256x128xf32>
    %61 = vector.extract_strided_slice %23 {offsets = [1, 0, 0, 0, 0], sizes = [1, 16, 1, 16, 64], strides = [1, 1, 1, 1, 1]} : vector<3x16x2x16x64xbf16> to vector<1x16x1x16x64xbf16>
    %62 = vector.shape_cast %61 : vector<1x16x1x16x64xbf16> to vector<16x16x64xbf16>
    %63 = vector.shape_cast %62 : vector<16x16x64xbf16> to vector<256x64xbf16>
    %64 = vector.extract_strided_slice %24 {offsets = [4, 0, 0], sizes = [1, 64, 128], strides = [1, 1, 1]} : vector<9x64x128xbf16> to vector<1x64x128xbf16>
    %65 = vector.shape_cast %64 : vector<1x64x128xbf16> to vector<64x128xbf16>
    %cst_18 = arith.constant dense<0.000000e+00> : vector<256x128xf32>
    %66 = tpu.matmul %63, %65, %cst_18 {dimension_numbers = #tpu.dot_dimension_numbers<[1], [0], [0], [1], [0, 0, 1, 1], [], []>} : vector<256x64xbf16>, vector<64x128xbf16>, vector<256x128xf32> -> vector<256x128xf32>
    %67 = arith.addf %60, %66 : vector<256x128xf32>
    %68 = vector.extract_strided_slice %23 {offsets = [2, 0, 0, 0, 0], sizes = [1, 16, 1, 16, 64], strides = [1, 1, 1, 1, 1]} : vector<3x16x2x16x64xbf16> to vector<1x16x1x16x64xbf16>
    %69 = vector.shape_cast %68 : vector<1x16x1x16x64xbf16> to vector<16x16x64xbf16>
    %70 = vector.shape_cast %69 : vector<16x16x64xbf16> to vector<256x64xbf16>
    %71 = vector.extract_strided_slice %24 {offsets = [5, 0, 0], sizes = [1, 64, 128], strides = [1, 1, 1]} : vector<9x64x128xbf16> to vector<1x64x128xbf16>
    %72 = vector.shape_cast %71 : vector<1x64x128xbf16> to vector<64x128xbf16>
    %cst_19 = arith.constant dense<0.000000e+00> : vector<256x128xf32>
    %73 = tpu.matmul %70, %72, %cst_19 {dimension_numbers = #tpu.dot_dimension_numbers<[1], [0], [0], [1], [0, 0, 1, 1], [], []>} : vector<256x64xbf16>, vector<64x128xbf16>, vector<256x128xf32> -> vector<256x128xf32>
    %74 = arith.addf %67, %73 : vector<256x128xf32>
    %75 = vector.extract_strided_slice %23 {offsets = [0, 0, 1, 0, 0], sizes = [1, 16, 1, 16, 64], strides = [1, 1, 1, 1, 1]} : vector<3x16x2x16x64xbf16> to vector<1x16x1x16x64xbf16>
    %76 = vector.shape_cast %75 : vector<1x16x1x16x64xbf16> to vector<16x16x64xbf16>
    %77 = vector.shape_cast %76 : vector<16x16x64xbf16> to vector<256x64xbf16>
    %78 = vector.extract_strided_slice %24 {offsets = [6, 0, 0], sizes = [1, 64, 128], strides = [1, 1, 1]} : vector<9x64x128xbf16> to vector<1x64x128xbf16>
    %79 = vector.shape_cast %78 : vector<1x64x128xbf16> to vector<64x128xbf16>
    %cst_20 = arith.constant dense<0.000000e+00> : vector<256x128xf32>
    %80 = tpu.matmul %77, %79, %cst_20 {dimension_numbers = #tpu.dot_dimension_numbers<[1], [0], [0], [1], [0, 0, 1, 1], [], []>} : vector<256x64xbf16>, vector<64x128xbf16>, vector<256x128xf32> -> vector<256x128xf32>
    %81 = arith.addf %74, %80 : vector<256x128xf32>
    %82 = vector.extract_strided_slice %23 {offsets = [1, 0, 1, 0, 0], sizes = [1, 16, 1, 16, 64], strides = [1, 1, 1, 1, 1]} : vector<3x16x2x16x64xbf16> to vector<1x16x1x16x64xbf16>
    %83 = vector.shape_cast %82 : vector<1x16x1x16x64xbf16> to vector<16x16x64xbf16>
    %84 = vector.shape_cast %83 : vector<16x16x64xbf16> to vector<256x64xbf16>
    %85 = vector.extract_strided_slice %24 {offsets = [7, 0, 0], sizes = [1, 64, 128], strides = [1, 1, 1]} : vector<9x64x128xbf16> to vector<1x64x128xbf16>
    %86 = vector.shape_cast %85 : vector<1x64x128xbf16> to vector<64x128xbf16>
    %cst_21 = arith.constant dense<0.000000e+00> : vector<256x128xf32>
    %87 = tpu.matmul %84, %86, %cst_21 {dimension_numbers = #tpu.dot_dimension_numbers<[1], [0], [0], [1], [0, 0, 1, 1], [], []>} : vector<256x64xbf16>, vector<64x128xbf16>, vector<256x128xf32> -> vector<256x128xf32>
    %88 = arith.addf %81, %87 : vector<256x128xf32>
    %89 = vector.extract_strided_slice %23 {offsets = [2, 0, 1, 0, 0], sizes = [1, 16, 1, 16, 64], strides = [1, 1, 1, 1, 1]} : vector<3x16x2x16x64xbf16> to vector<1x16x1x16x64xbf16>
    %90 = vector.shape_cast %89 : vector<1x16x1x16x64xbf16> to vector<16x16x64xbf16>
    %91 = vector.shape_cast %90 : vector<16x16x64xbf16> to vector<256x64xbf16>
    %92 = vector.extract_strided_slice %24 {offsets = [8, 0, 0], sizes = [1, 64, 128], strides = [1, 1, 1]} : vector<9x64x128xbf16> to vector<1x64x128xbf16>
    %93 = vector.shape_cast %92 : vector<1x64x128xbf16> to vector<64x128xbf16>
    %cst_22 = arith.constant dense<0.000000e+00> : vector<256x128xf32>
    %94 = tpu.matmul %91, %93, %cst_22 {dimension_numbers = #tpu.dot_dimension_numbers<[1], [0], [0], [1], [0, 0, 1, 1], [], []>} : vector<256x64xbf16>, vector<64x128xbf16>, vector<256x128xf32> -> vector<256x128xf32>
    %95 = arith.addf %88, %94 : vector<256x128xf32>
    %c0_23 = arith.constant 0 : index
    %c0_24 = arith.constant 0 : index
    %96 = vector.load %arg5[%c0_23, %c0_24] : memref<1x128xf32, #tpu.memory_space<vmem>>, vector<1x128xf32>
    %97 = vector.broadcast %96 : vector<1x128xf32> to vector<256x128xf32>
    %98 = arith.addf %95, %97 : vector<256x128xf32>
    %cst_25 = arith.constant 0.000000e+00 : f32
    %99 = vector.broadcast %cst_25 : f32 to vector<256x128xf32>
    %100 = arith.cmpf oge, %98, %99 : vector<256x128xf32>
    %cst_26 = arith.constant 2.000000e-01 : f32
    %101 = vector.broadcast %cst_26 : f32 to vector<256x128xf32>
    %102 = arith.mulf %101, %98 : vector<256x128xf32>
    %103 = arith.select %100, %98, %102 : vector<256x128xi1>, vector<256x128xf32>
    %c0_27 = arith.constant 0 : index
    %c0_28 = arith.constant 0 : index
    %104 = vector.load %arg6[%c0_27, %c0_28] : memref<256x128xf32, #tpu.memory_space<vmem>>, vector<256x128xf32>
    %105 = arith.mulf %103, %104 : vector<256x128xf32>
    %106 = vector.shape_cast %105 : vector<256x128xf32> to vector<1x256x128xf32>
    %cst_29 = arith.constant dense<0.000000e+00> : vector<1xf32>
    %107 = vector.multi_reduction <add>, %106, %cst_29 [1, 2] : vector<1x256x128xf32> to vector<1xf32>
    %108 = vector.shape_cast %107 : vector<1xf32> to vector<1x1x1xf32>
    %109 = vector.extract %108[0, 0, 0] : f32 from vector<1x1x1xf32>
    %110 = vector.broadcast %109 : f32 to vector<1x1xf32>
    %c0_30 = arith.constant 0 : index
    %c0_31 = arith.constant 0 : index
    %111 = vector.load %arg7[%c0_30, %c0_31] : memref<1x1xf32, #tpu.memory_space<vmem>>, vector<1x1xf32>
    %112 = arith.addf %110, %111 : vector<1x1xf32>
    %113 = vector.shape_cast %112 : vector<1x1xf32> to vector<1x1x1xf32>
    %114 = vector.shape_cast %113 : vector<1x1x1xf32> to vector<1x1x1xf32>
    %115 = vector.broadcast %114 : vector<1x1x1xf32> to vector<1x1x128xf32>
    %c0_32 = arith.constant 0 : index
    %c0_33 = arith.constant 0 : index
    %c0_34 = arith.constant 0 : index
    %116 = vector.load %arg8[%c0_32, %c0_33, %c0_34] : memref<1x1x128xf32, #tpu.memory_space<vmem>>, vector<1x1x128xf32>
    tpu.vector_store %arg8[%c0_32, %c0_33, %c0_34], %115 {strides = array<i32>} : memref<1x1x128xf32, #tpu.memory_space<vmem>>, vector<1x1x128xf32>,
    return
  }
  func.func @transform_0(%arg0: i32) -> (i32, i32, i32) {
    %c0_i32 = arith.constant 0 : i32
    %c0_i32_0 = arith.constant 0 : i32
    %c0_i32_1 = arith.constant 0 : i32
    return %arg0, %c0_i32, %c0_i32_0 : i32, i32, i32
  }
  func.func @transform_1(%arg0: i32) -> (i32, i32) {
    %c0_i32 = arith.constant 0 : i32
    %c0_i32_0 = arith.constant 0 : i32
    %c0_i32_1 = arith.constant 0 : i32
    return %c0_i32, %c0_i32_0 : i32, i32
  }
  func.func @transform_2(%arg0: i32) -> (i32, i32) {
    %c0_i32 = arith.constant 0 : i32
    %c0_i32_0 = arith.constant 0 : i32
    %c0_i32_1 = arith.constant 0 : i32
    return %c0_i32, %c0_i32_0 : i32, i32
  }
  func.func @transform_3(%arg0: i32) -> (i32, i32, i32) {
    %c0_i32 = arith.constant 0 : i32
    %c0_i32_0 = arith.constant 0 : i32
    %c0_i32_1 = arith.constant 0 : i32
    %c0_i32_2 = arith.constant 0 : i32
    return %c0_i32, %c0_i32_0, %c0_i32_1 : i32, i32, i32
  }
  func.func @transform_4(%arg0: i32) -> (i32, i32) {
    %c0_i32 = arith.constant 0 : i32
    %c0_i32_0 = arith.constant 0 : i32
    %c0_i32_1 = arith.constant 0 : i32
    return %c0_i32, %c0_i32_0 : i32, i32
  }
  func.func @transform_5(%arg0: i32) -> (i32, i32) {
    %c0_i32 = arith.constant 0 : i32
    %c0_i32_0 = arith.constant 0 : i32
    %c0_i32_1 = arith.constant 0 : i32
    return %c0_i32, %c0_i32_0 : i32, i32
  }
  func.func @transform_6(%arg0: i32) -> (i32, i32) {
    %c0_i32 = arith.constant 0 : i32
    %c0_i32_0 = arith.constant 0 : i32
    %c0_i32_1 = arith.constant 0 : i32
    return %c0_i32, %c0_i32_0 : i32, i32
  }
  func.func @transform_7(%arg0: i32) -> (i32, i32, i32) {
    %c0_i32 = arith.constant 0 : i32
    %c0_i32_0 = arith.constant 0 : i32
    %c0_i32_1 = arith.constant 0 : i32
    return %arg0, %c0_i32, %c0_i32_0 : i32, i32, i32
  }
}

</mosaic_0001>

<bundles_post_ra>
// kernel: discriminator_forward.1
= control target key start
LH: loop header
LB: loop body
LE: loop exit
PB: predicated region body
PF: predicated region fallthrough
CT: control target
= control target key end

     0   :  { %s7034_s26 = smov 0   ;;  %s9386_s0 = inlined_call_operand.vmem [shape: bf16[2,1536,9], index: 0, kind: input, shape index: {}]   ;;  %s9387_s1 = inlined_call_operand.vmem [shape: bf16[9,64], index: 1, kind: input, shape index: {}]   ;;  %s9388_s2 = inlined_call_operand.vmem [shape: f32[1,64], index: 2, kind: input, shape index: {}]   ;;  %s9389_s3 = inlined_call_operand.vmem [shape: bf16[9,64,128], index: 3, kind: input, shape index: {}]   ;;  %s9390_s4 = inlined_call_operand.vmem [shape: f32[1,128], index: 4, kind: input, shape index: {}]   ;;  %s9391_s5 = inlined_call_operand.vmem [shape: f32[256,128], index: 5, kind: input, shape index: {}]   ;;  %s9392_s6 = inlined_call_operand.<no memory space> [shape: f32[1,1], index: 6, kind: input, shape index: {}]   ;;  %s9393_s7 = inlined_call_operand.vmem [shape: f32[2,1,128], index: 7, kind: output, shape index: {}]  }
   0x1   :  { %v12_v0 = vstv %s9392_s6 }
   0x2   :  { %13 = vst [vmem:[#allocation2] sm:$0x1] %v12_v0 }
   0x3 LB: > { %s6045_s27 = sadd.s32 4294967295, %s6987_s26   ;;  %p6049_p0 = scmp.ge.s32.totalorder %s6987_s26, 1  ;;  %s6987_s26 = sphi %s7034_s26, %s19_s26  }
   0x4   : > { %p239_p1 = scmp.lt.s32.totalorder %s6987_s26, 3 }
   0x6   : > { %p240_p2 = pnand %p6049_p0, %p239_p1 }
   0x8   : > { %243 = sbr.rel (%p240_p2) target bundleno = 2345 (0x929), region = 48 }
   0xd   : > { %v6437_v1 = vld [vmem:[%s9387_s1] sm:$0xf]  ;;  %v6918_v2 = vld [vmem:[%s9387_s1] sm:$0x10]  ;;  %vm1250_vm0 = vcmask 1043456   ;;  %vm1251_vm1 = vcmask 1044480   ;;  %v2322_v24 = vlaneseq }
   0xe   : > { %v6438_v3 = vor.u32 %v6918_v2, %v6437_v1  ;;  %p269_p3 = scmp.lt.s32.totalorder %s6045_s27, 1  ;;  %v6989_v4 = vmov 65535   ;;  %vm961_vm2 = vcmask 72704   ;;  %v7091_v25 = vld [vmem:[%s9388_s2] ss:$0 sm:$0xff] }
   0xf   : > { %v1252_v5 = vsel %vm1250_vm0, 4294967295, %v6989_v4  ;;  %v7093_v26 = vshrl.u32 %v2322_v24, 7 }
  0x10   : > { %v1253_v6 = vsel %vm1251_vm1, %v1252_v5, 0  ;;  %s9862_s27 = smov (!%p269_p3, %s6045_s27), 1 }
  0x11   : > { %v1255_v7 = vand.u32 %v6438_v3, %v1253_v6  ;;  %s6961_s8 = smul.u32 768, %s9862_s27  ;;  %v2707_v32 = vand.u32 15, %v7093_v26  ;;  %v2325_v43 = vadd.s32 16, %v7093_v26  ;;  %v2327_v63 = vadd.s32 32, %v7093_v26  ;;  %s276_s12 = scalar_lea.vmem %s9393_s7, %s9862_s27 }
  0x12   : > { %v2351_v51 = vadd.s32 224, %v7093_v26 }
  0x13   : > { %1264 = vmatpush.bf16.msra.mxu0 %v1255_v7  ;;  %6955 = vmatpush.bf16.msra.mxu1 %v1255_v7  ;;  %s7054_s11 = scalar_lea.vmem %s9386_s0, %s6961_s8  ;;  %vm2899_vm4 = vcmp.eq.s32.totalorder %v2707_v32, 0  ;;  %v2709_v52 = vand.u32 15, %v2325_v43 }
  0x14   : > { %6956 = vmatpush.bf16.msra.mxu3 %v1255_v7  ;;  %v6822_v8 = vld [vmem:[%s7054_s11] sm:$0xff]  ;;  %v6883_v9 = vld [vmem:[%s7054_s11 + $0x1e8] sm:$0xff]  ;;  %v6884_v11 = vld [vmem:[%s7054_s11 + $0x1f0] sm:$0xff] }
  0x15   : > { %v6823_v10 = vld [vmem:[%s7054_s11 + $0x8] sm:$0xff]  ;;  %v6824_v12 = vld [vmem:[%s7054_s11 + $0x10] sm:$0xff]  ;;  %v6885_v13 = vld [vmem:[%s7054_s11 + $0x1f8] sm:$0xff]  ;;  %vm2901_vm7 = vcmp.eq.s32.totalorder %v2709_v52, 0 }
  0x16   : > { %6439 = vmatmul.msk.bf16.vlgmr.msra.gmra.mxu0 %vm961_vm2, %v6822_v8  ;;  %6500 = vmatmul.msk.bf16.vlgmr.msra.gmra.mxu1 %vm961_vm2, %v6883_v9  ;;  %v6825_v14 = vld [vmem:[%s7054_s11 + $0x18] sm:$0xff]  ;;  %v6886_v15 = vld [vmem:[%s7054_s11 + $0x200] sm:$0xff]  ;;  %v6887_v17 = vld [vmem:[%s7054_s11 + $0x208] sm:$0xff]  ;;  %v2711_v8 = vand.u32 15, %v2327_v63 }
  0x17   : > { %v6826_v16 = vld [vmem:[%s7054_s11 + $0x20] sm:$0xff]  ;;  %v6827_v18 = vld [vmem:[%s7054_s11 + $0x28] sm:$0xff]  ;;  %v6888_v19 = vld [vmem:[%s7054_s11 + $0x210] sm:$0xff] }
  0x18   : > { %v6828_v20 = vld [vmem:[%s7054_s11 + $0x30] sm:$0xff]  ;;  %v6889_v21 = vld [vmem:[%s7054_s11 + $0x218] sm:$0xff]  ;;  %v6890_v23 = vld [vmem:[%s7054_s11 + $0x220] sm:$0xff]  ;;  %vm2903_vm10 = vcmp.eq.s32.totalorder %v2711_v8, 0 }
  0x19   : > { %v6829_v22 = vld [vmem:[%s7054_s11 + $0x38] sm:$0xff]  ;;  %v6830_v27 = vld [vmem:[%s7054_s11 + $0x40] sm:$0xff]  ;;  %v6891_v28 = vld [vmem:[%s7054_s11 + $0x228] sm:$0xff] }
  0x1a   : > { %v6831_v44 = vld [vmem:[%s7054_s11 + $0x48] sm:$0xff]  ;;  %v6892_v45 = vld [vmem:[%s7054_s11 + $0x230] sm:$0xff]  ;;  %v6893_v1 = vld [vmem:[%s7054_s11 + $0x238] sm:$0xff] }
  0x1b   : > { %v6832_v0 = vld [vmem:[%s7054_s11 + $0x50] sm:$0xff] }
  0x26   : > { %6440 = vmatmul.msk.bf16.gmra.mxu0 %vm961_vm2, %v6823_v10  ;;  %6501 = vmatmul.msk.bf16.gmra.mxu1 %vm961_vm2, %v6884_v11 }
  0x36   : > { %6441 = vmatmul.msk.bf16.gmra.mxu0 %vm961_vm2, %v6824_v12  ;;  %6502 = vmatmul.msk.bf16.gmra.mxu1 %vm961_vm2, %v6885_v13 }
  0x46   : > { %6442 = vmatmul.msk.bf16.gmra.mxu0 %vm961_vm2, %v6825_v14  ;;  %6503 = vmatmul.msk.bf16.gmra.mxu1 %vm961_vm2, %v6886_v15 }
  0x56   : > { %6443 = vmatmul.msk.bf16.gmra.mxu0 %vm961_vm2, %v6826_v16  ;;  %6504 = vmatmul.msk.bf16.gmra.mxu1 %vm961_vm2, %v6887_v17 }
  0x66   : > { %6444 = vmatmul.msk.bf16.gmra.mxu0 %vm961_vm2, %v6827_v18  ;;  %6505 = vmatmul.msk.bf16.gmra.mxu1 %vm961_vm2, %v6888_v19  ;;  %v2329_v19 = vadd.s32 48, %v7093_v26 }
  0x76   : > { %6445 = vmatmul.msk.bf16.gmra.mxu0 %vm961_vm2, %v6828_v20  ;;  %6506 = vmatmul.msk.bf16.gmra.mxu1 %vm961_vm2, %v6889_v21  ;;  %v6833_v20 = vld [vmem:[%s7054_s11 + $0x58] sm:$0xff]  ;;  %v6894_v21 = vld [vmem:[%s7054_s11 + $0x240] sm:$0xff] }
  0x86   : > { %6446 = vmatmul.msk.bf16.gmra.mxu0 %vm961_vm2, %v6829_v22  ;;  %6507 = vmatmul.msk.bf16.gmra.mxu1 %vm961_vm2, %v6890_v23 }
  0x93   : > { %v1266_v29 = vpop.f32.mrf.mxu0  ;;  %v7097_v30 = vpop.f32.mrf.mxu1 }
  0x94   : > { %v1267_v31 = vadd.f32 %v7091_v25, %v1266_v29 }
  0x96   : > { %vm1746_vm3 = vcmp.ge.f32.partialorder %v1267_v31, 0.0  ;;  %v1938_v33 = vmul.f32 0.2, %v1267_v31  ;;  %6447 = vmatmul.msk.bf16.gmra.mxu0 %vm961_vm2, %v6830_v27  ;;  %6508 = vmatmul.msk.bf16.gmra.mxu1 %vm961_vm2, %v6891_v28 }
  0x98   : > { %v2130_v34 = vsel %vm1746_vm3, %v1267_v31, %v1938_v33  ;;  %v2713_v31 = vand.u32 15, %v2329_v19  ;;  %v6835_v19 = vld [vmem:[%s7054_s11 + $0x68] sm:$0xff] }
  0x99   : > { %v3283_v37 = vsel %vm2899_vm4, 0.0, %v2130_v34 }
  0x9a   : > { %v3475_v40 = vpack.c.bf16 %v3283_v37, %v3283_v37  ;;  %vm2905_vm14 = vcmp.eq.s32.totalorder %v2713_v31, 0 }
  0x9b   : > { %v1268_v35 = vpop.f32.mrf.mxu0  ;;  %v7103_v36 = vpop.f32.mrf.mxu1 }
  0x9c   : > { %v1269_v38 = vadd.f32 %v7091_v25, %v1268_v35  ;;  %v7109_v46 = vunpack.c.l.b16 %v3475_v40 }
  0x9e   : > { %vm1747_vm5 = vcmp.ge.f32.partialorder %v1269_v38, 0.0  ;;  %v1939_v39 = vmul.f32 0.2, %v1269_v38 }
  0xa0   : > { %v2131_v41 = vsel %vm1747_vm5, %v1269_v38, %v1939_v39 }
  0xa1   : > { %v3476_v42 = vpack.c.bf16 %v2131_v41, %v2131_v41 }
  0xa3   : > { %v7111_v47 = vunpack.c.l.b16 %v3476_v42  ;;  %v1271_v48 = vpop.f32.mrf.mxu0  ;;  %v7113_v49 = vpop.f32.mrf.mxu1 }
  0xa4   : > { %v1272_v50 = vadd.f32 %v7091_v25, %v1271_v48 }
  0xa6   : > { %vm1748_vm6 = vcmp.ge.f32.partialorder %v1272_v50, 0.0  ;;  %v1940_v53 = vmul.f32 0.2, %v1272_v50  ;;  %6448 = vmatmul.msk.bf16.gmra.mxu0 %vm961_vm2, %v6831_v44  ;;  %6509 = vmatmul.msk.bf16.gmra.mxu1 %vm961_vm2, %v6892_v45 }
  0xa8   : > { %v2132_v54 = vsel %vm1748_vm6, %v1272_v50, %v1940_v53 }
  0xa9   : > { %v3285_v57 = vsel %vm2901_vm7, 0.0, %v2132_v54 }
  0xaa   : > { %v3477_v60 = vpack.c.bf16 %v3285_v57, %v3285_v57  ;;  %v2331_v57 = vadd.s32 64, %v7093_v26 }
  0xab   : > { %v1273_v55 = vpop.f32.mrf.mxu0  ;;  %v7120_v56 = vpop.f32.mrf.mxu1 }
  0xac   : > { %v1274_v58 = vadd.f32 %v7091_v25, %v1273_v55  ;;  %v3769_v2 = vunpack.c.l.b16 %v3477_v60 }
  0xae   : > { %vm1749_vm8 = vcmp.ge.f32.partialorder %v1274_v58, 0.0  ;;  %v1941_v59 = vmul.f32 0.2, %v1274_v58 }
  0xb0   : > { %v2133_v61 = vsel %vm1749_vm8, %v1274_v58, %v1941_v59  ;;  %v6834_v58 = vld [vmem:[%s7054_s11 + $0x60] sm:$0xff]  ;;  %v6895_v59 = vld [vmem:[%s7054_s11 + $0x248] sm:$0xff] }
  0xb1   : > { %v3478_v62 = vpack.c.bf16 %v2133_v61, %v2133_v61 }
  0xb3   : > { %v3770_v3 = vunpack.c.l.b16 %v3478_v62  ;;  %v1276_v4 = vpop.f32.mrf.mxu0  ;;  %v7126_v5 = vpop.f32.mrf.mxu1 }
  0xb4   : > { %v1277_v6 = vadd.f32 %v7091_v25, %v1276_v4 }
  0xb5   : > { %v7129_v7 = vpack.c.b16 %v3770_v3, %v3769_v2  ;;  %v2715_v3 = vand.u32 15, %v2331_v57  ;;  %v6842_v2 = vld [vmem:[%s7054_s11 + $0xa0] sm:$0xff] }
  0xb6   : > { %vm1750_vm9 = vcmp.ge.f32.partialorder %v1277_v6, 0.0  ;;  %v1942_v9 = vmul.f32 0.2, %v1277_v6  ;;  %6449 = vmatmul.msk.bf16.gmra.mxu0 %vm961_vm2, %v6832_v0  ;;  %6510 = vmatmul.msk.bf16.gmra.mxu1 %vm961_vm2, %v6893_v1 }
  0xb7   : > { %vm2907_vm3 = vcmp.eq.s32.totalorder %v2715_v3, 0 }
  0xb8   : > { %v2134_v10 = vsel %vm1750_vm9, %v1277_v6, %v1942_v9 }
  0xb9   : > { %v3287_v13 = vsel %vm2903_vm10, 0.0, %v2134_v10 }
  0xba   : > { %v3479_v16 = vpack.c.bf16 %v3287_v13, %v3287_v13 }
  0xbb   : > { %v1278_v11 = vpop.f32.mrf.mxu0  ;;  %v7133_v12 = vpop.f32.mrf.mxu1 }
  0xbc   : > { %v1279_v14 = vadd.f32 %v7091_v25, %v1278_v11  ;;  %v7139_v22 = vunpack.c.l.b16 %v3479_v16 }
  0xbe   : > { %vm1751_vm11 = vcmp.ge.f32.partialorder %v1279_v14, 0.0  ;;  %v1943_v15 = vmul.f32 0.2, %v1279_v14 }
  0xc0   : > { %v2135_v17 = vsel %vm1751_vm11, %v1279_v14, %v1943_v15 }
  0xc1   : > { %v3480_v18 = vpack.c.bf16 %v2135_v17, %v2135_v17 }
  0xc3   : > { %v7141_v23 = vunpack.c.l.b16 %v3480_v18  ;;  %v1281_v24 = vpop.f32.mrf.mxu0  ;;  %v1586_v27 = vpop.f32.mrf.mxu1  ;;  %v2333_v18 = vadd.s32 80, %v7093_v26 }
  0xc4   : > { %v1282_v28 = vadd.f32 %v7091_v25, %v1281_v24  ;;  %v1587_v29 = vadd.f32 %v7091_v25, %v1586_v27 }
  0xc5   : > { %v2717_v31 = vand.u32 15, %v2333_v18 }
  0xc6   : > { %vm1752_vm12 = vcmp.ge.f32.partialorder %v1282_v28, 0.0  ;;  %v1944_v33 = vmul.f32 0.2, %v1282_v28  ;;  %v2066_v34 = vmul.f32 0.2, %v1587_v29  ;;  %6450 = vmatmul.msk.bf16.gmra.mxu0 %vm961_vm2, %v6833_v20  ;;  %6511 = vmatmul.msk.bf16.gmra.mxu1 %vm961_vm2, %v6894_v21  ;;  %vm1874_vm13 = vcmp.ge.f32.partialorder %v1587_v29, 0.0 }
  0xc7   : > { %v6896_v20 = vld [vmem:[%s7054_s11 + $0x250] sm:$0xff]  ;;  %vm2909_vm6 = vcmp.eq.s32.totalorder %v2717_v31, 0 }
  0xc8   : > { %v2136_v35 = vsel %vm1752_vm12, %v1282_v28, %v1944_v33  ;;  %v2258_v37 = vsel %vm1874_vm13, %v1587_v29, %v2066_v34  ;;  %v6904_v33 = vld [vmem:[%s7054_s11 + $0x290] sm:$0xff] }
  0xc9   : > { %v3289_v40 = vsel %vm2905_vm14, 0.0, %v2136_v35  ;;  %v3603_v43 = vpack.c.bf16 %v2258_v37, %v2258_v37 }
  0xca   : > { %v3481_v48 = vpack.c.bf16 %v3289_v40, %v3289_v40 }
  0xcb   : > { %v1283_v38 = vpop.f32.mrf.mxu0  ;;  %v1588_v39 = vpop.f32.mrf.mxu1  ;;  %v7151_v53 = vunpack.c.l.b16 %v3603_v43 }
  0xcc   : > { %v1284_v41 = vadd.f32 %v7091_v25, %v1283_v38  ;;  %v1589_v42 = vadd.f32 %v7091_v25, %v1588_v39  ;;  %v3771_v60 = vunpack.c.l.b16 %v3481_v48  ;;  %v6836_v48 = vld [vmem:[%s7054_s11 + $0x70] sm:$0xff] }
  0xcd   : > { %9467 = vst [vmem:[#allocation3_spill] sm:$0xff] %v7151_v53  ;;  %v6844_v53 = vld [vmem:[%s7054_s11 + $0xb0] sm:$0xff] }
  0xce   : > { %vm1753_vm15 = vcmp.ge.f32.partialorder %v1284_v41, 0.0  ;;  %v1945_v44 = vmul.f32 0.2, %v1284_v41  ;;  %vm1875_vm0 = vcmp.ge.f32.partialorder %v1589_v42, 0.0  ;;  %v2067_v45 = vmul.f32 0.2, %v1589_v42 }
  0xd0   : > { %v2137_v50 = vsel %vm1753_vm15, %v1284_v41, %v1945_v44  ;;  %v2259_v52 = vsel %vm1875_vm0, %v1589_v42, %v2067_v45  ;;  %v2335_v45 = vadd.s32 96, %v7093_v26 }
  0xd1   : > { %v3482_v54 = vpack.c.bf16 %v2137_v50, %v2137_v50  ;;  %v3604_v55 = vpack.c.bf16 %v2259_v52, %v2259_v52  ;;  %v6897_v50 = vld [vmem:[%s7054_s11 + $0x258] sm:$0xff] }
  0xd3   : > { %v3772_v61 = vunpack.c.l.b16 %v3482_v54  ;;  %v7156_v62 = vunpack.c.l.b16 %v3604_v55  ;;  %v1286_v63 = vpop.f32.mrf.mxu0  ;;  %v7158_v0 = vpop.f32.mrf.mxu1 }
  0xd4   : > { %v1287_v1 = vadd.f32 %v7091_v25, %v1286_v63 }
  0xd5   : > { %9468 = vst [vmem:[#allocation4_spill] sm:$0xff] %v7156_v62  ;;  %v7163_v4 = vpack.c.b16 %v3772_v61, %v3771_v60  ;;  %v6905_v62 = vld [vmem:[%s7054_s11 + $0x298] sm:$0xff] }
  0xd6   : > { %vm1754_vm1 = vcmp.ge.f32.partialorder %v1287_v1, 0.0  ;;  %v1946_v6 = vmul.f32 0.2, %v1287_v1  ;;  %6451 = vmatmul.msk.bf16.gmra.mxu0 %vm961_vm2, %v6834_v58  ;;  %6512 = vmatmul.msk.bf16.gmra.mxu1 %vm961_vm2, %v6895_v59  ;;  %v2719_v59 = vand.u32 15, %v2335_v45 }
  0xd8   : > { %v2138_v8 = vsel %vm1754_vm1, %v1287_v1, %v1946_v6  ;;  %vm2911_vm9 = vcmp.eq.s32.totalorder %v2719_v59, 0 }
  0xd9   : > { %v3291_v11 = vsel %vm2907_vm3, 0.0, %v2138_v8 }
  0xda   : > { %v3483_v15 = vpack.c.bf16 %v3291_v11, %v3291_v11 }
  0xdb   : > { %v1288_v9 = vpop.f32.mrf.mxu0  ;;  %v7167_v10 = vpop.f32.mrf.mxu1 }
  0xdc   : > { %v1289_v13 = vadd.f32 %v7091_v25, %v1288_v9  ;;  %v7173_v21 = vunpack.c.l.b16 %v3483_v15  ;;  %v2337_v15 = vadd.s32 112, %v7093_v26 }
  0xde   : > { %vm1755_vm4 = vcmp.ge.f32.partialorder %v1289_v13, 0.0  ;;  %v1947_v14 = vmul.f32 0.2, %v1289_v13  ;;  %v2721_v31 = vand.u32 15, %v2337_v15 }
  0xe0   : > { %v2139_v16 = vsel %vm1755_vm4, %v1289_v13, %v1947_v14  ;;  %vm2913_vm12 = vcmp.eq.s32.totalorder %v2721_v31, 0  ;;  %v2341_v31 = vadd.s32 144, %v7093_v26 }
  0xe1   : > { %v3484_v17 = vpack.c.bf16 %v2139_v16, %v2139_v16  ;;  %v6837_v16 = vld [vmem:[%s7054_s11 + $0x78] sm:$0xff] }
  0xe3   : > { %v7175_v24 = vunpack.c.l.b16 %v3484_v17  ;;  %v1291_v27 = vpop.f32.mrf.mxu0  ;;  %v7177_v28 = vpop.f32.mrf.mxu1  ;;  %v6898_v17 = vld [vmem:[%s7054_s11 + $0x260] sm:$0xff] }
  0xe4   : > { %v1292_v29 = vadd.f32 %v7091_v25, %v1291_v27 }
  0xe6   : > { %vm1756_vm5 = vcmp.ge.f32.partialorder %v1292_v29, 0.0  ;;  %v1948_v34 = vmul.f32 0.2, %v1292_v29  ;;  %6452 = vmatmul.msk.bf16.gmra.mxu0 %vm961_vm2, %v6835_v19  ;;  %6513 = vmatmul.msk.bf16.gmra.mxu1 %vm961_vm2, %v6896_v20 }
  0xe8   : > { %v2140_v35 = vsel %vm1756_vm5, %v1292_v29, %v1948_v34  ;;  %v6843_v34 = vld [vmem:[%s7054_s11 + $0xa8] sm:$0xff] }
  0xe9   : > { %v3293_v39 = vsel %vm2909_vm6, 0.0, %v2140_v35 }
  0xea   : > { %v3485_v42 = vpack.c.bf16 %v3293_v39, %v3293_v39 }
  0xeb   : > { %v1293_v37 = vpop.f32.mrf.mxu0  ;;  %v7184_v38 = vpop.f32.mrf.mxu1 }
  0xec   : > { %v1294_v40 = vadd.f32 %v7091_v25, %v1293_v37  ;;  %v3773_v52 = vunpack.c.l.b16 %v3485_v42 }
  0xee   : > { %vm1757_vm7 = vcmp.ge.f32.partialorder %v1294_v40, 0.0  ;;  %v1949_v41 = vmul.f32 0.2, %v1294_v40 }
  0xf0   : > { %v2141_v43 = vsel %vm1757_vm7, %v1294_v40, %v1949_v41 }
  0xf1   : > { %v3486_v44 = vpack.c.bf16 %v2141_v43, %v2141_v43 }
  0xf3   : > { %v3774_v54 = vunpack.c.l.b16 %v3486_v44  ;;  %v1296_v55 = vpop.f32.mrf.mxu0  ;;  %v7190_v57 = vpop.f32.mrf.mxu1 }
  0xf4   : > { %v1297_v58 = vadd.f32 %v7091_v25, %v1296_v55 }
  0xf5   : > { %v7193_v60 = vpack.c.b16 %v3774_v54, %v3773_v52  ;;  %v6838_v52 = vld [vmem:[%s7054_s11 + $0x80] sm:$0xff]  ;;  %v6899_v54 = vld [vmem:[%s7054_s11 + $0x268] sm:$0xff] }
  0xf6   : > { %vm1758_vm8 = vcmp.ge.f32.partialorder %v1297_v58, 0.0  ;;  %v1950_v61 = vmul.f32 0.2, %v1297_v58  ;;  %6453 = vmatmul.msk.bf16.gmra.mxu0 %vm961_vm2, %v6836_v48  ;;  %6514 = vmatmul.msk.bf16.gmra.mxu1 %vm961_vm2, %v6897_v50  ;;  %v2339_v50 = vadd.s32 128, %v7093_v26 }
  0xf8   : > { %v2142_v63 = vsel %vm1758_vm8, %v1297_v58, %v1950_v61 }
  0xf9   : > { %v3295_v6 = vsel %vm2911_vm9, 0.0, %v2142_v63 }
  0xfa   : > { %v3487_v11 = vpack.c.bf16 %v3295_v6, %v3295_v6 }
  0xfb   : > { %v1298_v1 = vpop.f32.mrf.mxu0  ;;  %v7197_v3 = vpop.f32.mrf.mxu1 }
  0xfc   : > { %v1299_v8 = vadd.f32 %v7091_v25, %v1298_v1  ;;  %v7203_v18 = vunpack.c.l.b16 %v3487_v11  ;;  %v2723_v1 = vand.u32 15, %v2339_v50 }
  0xfe   : > { %vm1759_vm10 = vcmp.ge.f32.partialorder %v1299_v8, 0.0  ;;  %v1951_v9 = vmul.f32 0.2, %v1299_v8  ;;  %vm2915_vm15 = vcmp.eq.s32.totalorder %v2723_v1, 0 }
 0x100   : > { %v2143_v13 = vsel %vm1759_vm10, %v1299_v8, %v1951_v9 }
 0x101   : > { %v3488_v14 = vpack.c.bf16 %v2143_v13, %v2143_v13 }
 0x103   : > { %v7205_v19 = vunpack.c.l.b16 %v3488_v14  ;;  %v1301_v20 = vpop.f32.mrf.mxu0  ;;  %v7207_v27 = vpop.f32.mrf.mxu1 }
 0x104   : > { %v1302_v29 = vadd.f32 %v7091_v25, %v1301_v20 }
 0x106   : > { %vm1760_vm11 = vcmp.ge.f32.partialorder %v1302_v29, 0.0  ;;  %v1952_v35 = vmul.f32 0.2, %v1302_v29  ;;  %6454 = vmatmul.msk.bf16.gmra.mxu0 %vm961_vm2, %v6837_v16  ;;  %6515 = vmatmul.msk.bf16.gmra.mxu1 %vm961_vm2, %v6898_v17 }
 0x108   : > { %v2144_v37 = vsel %vm1760_vm11, %v1302_v29, %v1952_v35  ;;  %v6839_v35 = vld [vmem:[%s7054_s11 + $0x88] sm:$0xff] }
 0x109   : > { %v3297_v41 = vsel %vm2913_vm12, 0.0, %v2144_v37  ;;  %v6900_v37 = vld [vmem:[%s7054_s11 + $0x270] sm:$0xff] }
 0x10a   : > { %v3489_v44 = vpack.c.bf16 %v3297_v41, %v3297_v41 }
 0x10b   : > { %v1303_v39 = vpop.f32.mrf.mxu0  ;;  %v7214_v40 = vpop.f32.mrf.mxu1 }
 0x10c   : > { %v1304_v42 = vadd.f32 %v7091_v25, %v1303_v39  ;;  %v3775_v55 = vunpack.c.l.b16 %v3489_v44 }
 0x10e   : > { %vm1761_vm13 = vcmp.ge.f32.partialorder %v1304_v42, 0.0  ;;  %v1953_v43 = vmul.f32 0.2, %v1304_v42 }
 0x110   : > { %v2145_v45 = vsel %vm1761_vm13, %v1304_v42, %v1953_v43 }
 0x111   : > { %v3490_v48 = vpack.c.bf16 %v2145_v45, %v2145_v45  ;;  %v2725_v45 = vand.u32 15, %v2341_v31 }
 0x113   : > { %v3776_v58 = vunpack.c.l.b16 %v3490_v48  ;;  %v1306_v59 = vpop.f32.mrf.mxu0  ;;  %v7220_v61 = vpop.f32.mrf.mxu1  ;;  %vm2917_vm3 = vcmp.eq.s32.totalorder %v2725_v45, 0 }
 0x114   : > { %9469 = vst [vmem:[#allocation5_spill] sm:$0xff] %v7220_v61  ;;  %v1307_v63 = vadd.f32 %v7091_v25, %v1306_v59 }
 0x115   : > { %v7223_v6 = vpack.c.b16 %v3776_v58, %v3775_v55 }
 0x116   : > { %vm1762_vm14 = vcmp.ge.f32.partialorder %v1307_v63, 0.0  ;;  %v1954_v8 = vmul.f32 0.2, %v1307_v63  ;;  %6455 = vmatmul.msk.bf16.gmra.mxu0 %vm961_vm2, %v6838_v52  ;;  %6516 = vmatmul.msk.bf16.gmra.mxu1 %vm961_vm2, %v6899_v54 }
 0x118   : > { %v2146_v9 = vsel %vm1762_vm14, %v1307_v63, %v1954_v8 }
 0x119   : > { %v3299_v14 = vsel %vm2915_vm15, 0.0, %v2146_v9 }
 0x11a   : > { %v3491_v17 = vpack.c.bf16 %v3299_v14, %v3299_v14  ;;  %v6840_v14 = vld [vmem:[%s7054_s11 + $0x90] sm:$0xff] }
 0x11b   : > { %v1308_v11 = vpop.f32.mrf.mxu0  ;;  %v7227_v13 = vpop.f32.mrf.mxu1 }
 0x11c   : > { %9470 = vst [vmem:[#allocation6_spill] sm:$0xff] %v7227_v13  ;;  %v1309_v15 = vadd.f32 %v7091_v25, %v1308_v11  ;;  %v7233_v39 = vunpack.c.l.b16 %v3491_v17  ;;  %v2343_v11 = vadd.s32 160, %v7093_v26 }
 0x11e   : > { %vm1763_vm0 = vcmp.ge.f32.partialorder %v1309_v15, 0.0  ;;  %v1955_v16 = vmul.f32 0.2, %v1309_v15 }
 0x120   : > { %v2147_v20 = vsel %vm1763_vm0, %v1309_v15, %v1955_v16  ;;  %v6901_v15 = vld [vmem:[%s7054_s11 + $0x278] sm:$0xff] }
 0x121   : > { %v3492_v29 = vpack.c.bf16 %v2147_v20, %v2147_v20 }
 0x123   : > { %v7235_v41 = vunpack.c.l.b16 %v3492_v29  ;;  %v1311_v42 = vpop.f32.mrf.mxu0  ;;  %v7237_v43 = vpop.f32.mrf.mxu1 }
 0x124   : > { %9471 = vst [vmem:[#allocation7_spill] sm:$0xff] %v7237_v43  ;;  %v1312_v44 = vadd.f32 %v7091_v25, %v1311_v42 }
 0x126   : > { %vm1764_vm1 = vcmp.ge.f32.partialorder %v1312_v44, 0.0  ;;  %v1956_v50 = vmul.f32 0.2, %v1312_v44  ;;  %6456 = vmatmul.msk.bf16.gmra.mxu0 %vm961_vm2, %v6839_v35  ;;  %6517 = vmatmul.msk.bf16.gmra.mxu1 %vm961_vm2, %v6900_v37  ;;  %v2727_v35 = vand.u32 15, %v2343_v11  ;;  %v6902_v11 = vld [vmem:[%s7054_s11 + $0x280] sm:$0xff] }
 0x128   : > { %v2148_v52 = vsel %vm1764_vm1, %v1312_v44, %v1956_v50  ;;  %vm2919_vm6 = vcmp.eq.s32.totalorder %v2727_v35, 0  ;;  %v6903_v35 = vld [vmem:[%s7054_s11 + $0x288] sm:$0xff] }
 0x129   : > { %v3301_v58 = vsel %vm2917_vm3, 0.0, %v2148_v52 }
 0x12a   : > { %v3493_v1 = vpack.c.bf16 %v3301_v58, %v3301_v58 }
 0x12b   : > { %v1313_v54 = vpop.f32.mrf.mxu0  ;;  %v7244_v55 = vpop.f32.mrf.mxu1 }
 0x12c   : > { %9472 = vst [vmem:[#allocation8_spill] sm:$0xff] %v7244_v55  ;;  %v1314_v59 = vadd.f32 %v7091_v25, %v1313_v54  ;;  %v3777_v16 = vunpack.c.l.b16 %v3493_v1 }
 0x12e   : > { %vm1765_vm4 = vcmp.ge.f32.partialorder %v1314_v59, 0.0  ;;  %v1957_v63 = vmul.f32 0.2, %v1314_v59 }
 0x130   : > { %v2149_v8 = vsel %vm1765_vm4, %v1314_v59, %v1957_v63 }
 0x131   : > { %v3494_v9 = vpack.c.bf16 %v2149_v8, %v2149_v8  ;;  %v2345_v8 = vadd.s32 176, %v7093_v26 }
 0x133   : > { %v3778_v17 = vunpack.c.l.b16 %v3494_v9  ;;  %v1316_v20 = vpop.f32.mrf.mxu0  ;;  %v7250_v29 = vpop.f32.mrf.mxu1  ;;  %v6841_v9 = vld [vmem:[%s7054_s11 + $0x98] sm:$0xff] }
 0x134   : > { %9473 = vst [vmem:[#allocation9_spill] sm:$0xff] %v7250_v29  ;;  %v1317_v31 = vadd.f32 %v7091_v25, %v1316_v20 }
 0x135   : > { %v7253_v37 = vpack.c.b16 %v3778_v17, %v3777_v16 }
 0x136   : > { %vm1766_vm5 = vcmp.ge.f32.partialorder %v1317_v31, 0.0  ;;  %v1958_v42 = vmul.f32 0.2, %v1317_v31  ;;  %6457 = vmatmul.msk.bf16.gmra.mxu0 %vm961_vm2, %v6840_v14  ;;  %6518 = vmatmul.msk.bf16.gmra.mxu1 %vm961_vm2, %v6901_v15 }
 0x138   : > { %v2150_v44 = vsel %vm1766_vm5, %v1317_v31, %v1958_v42  ;;  %v2729_v31 = vand.u32 15, %v2345_v8 }
 0x139   : > { %v3303_v52 = vsel %vm2919_vm6, 0.0, %v2150_v44 }
 0x13a   : > { %v3495_v59 = vpack.c.bf16 %v3303_v52, %v3303_v52  ;;  %vm2921_vm9 = vcmp.eq.s32.totalorder %v2729_v31, 0 }
 0x13b   : > { %v1318_v45 = vpop.f32.mrf.mxu0  ;;  %v7257_v50 = vpop.f32.mrf.mxu1 }
 0x13c   : > { %9474 = vst [vmem:[#allocation10_spill] sm:$0xff] %v7257_v50  ;;  %v1319_v54 = vadd.f32 %v7091_v25, %v1318_v45  ;;  %v7263_v14 = vunpack.c.l.b16 %v3495_v59  ;;  %v6909_v50 = vld [vmem:[%s7054_s11 + $0x2b8] sm:$0xff] }
 0x13e   : > { %vm1767_vm7 = vcmp.ge.f32.partialorder %v1319_v54, 0.0  ;;  %v1959_v58 = vmul.f32 0.2, %v1319_v54 }
 0x140   : > { %v2151_v63 = vsel %vm1767_vm7, %v1319_v54, %v1959_v58 }
 0x141   : > { %v3496_v1 = vpack.c.bf16 %v2151_v63, %v2151_v63 }
 0x143   : > { %v7265_v15 = vunpack.c.l.b16 %v3496_v1  ;;  %v1321_v16 = vpop.f32.mrf.mxu0  ;;  %v7267_v17 = vpop.f32.mrf.mxu1 }
 0x144   : > { %9475 = vst [vmem:[#allocation11_spill] sm:$0xff] %v7267_v17  ;;  %v1322_v20 = vadd.f32 %v7091_v25, %v1321_v16  ;;  %v2347_v16 = vadd.s32 192, %v7093_v26  ;;  %v6848_v17 = vld [vmem:[%s7054_s11 + $0xd0] sm:$0xff] }
 0x146   : > { %vm1768_vm8 = vcmp.ge.f32.partialorder %v1322_v20, 0.0  ;;  %v1960_v42 = vmul.f32 0.2, %v1322_v20  ;;  %6458 = vmatmul.msk.bf16.gmra.mxu0 %vm961_vm2, %v6841_v9  ;;  %6519 = vmatmul.msk.bf16.gmra.mxu1 %vm961_vm2, %v6902_v11 }
 0x148   : > { %v2152_v44 = vsel %vm1768_vm8, %v1322_v20, %v1960_v42  ;;  %v2731_v42 = vand.u32 15, %v2347_v16 }
 0x149   : > { %v3305_v54 = vsel %vm2921_vm9, 0.0, %v2152_v44 }
 0x14a   : > { %v3497_v63 = vpack.c.bf16 %v3305_v54, %v3305_v54  ;;  %vm2923_vm12 = vcmp.eq.s32.totalorder %v2731_v42, 0 }
 0x14b   : > { %v1323_v45 = vpop.f32.mrf.mxu0  ;;  %v7274_v52 = vpop.f32.mrf.mxu1 }
 0x14c   : > { %9476 = vst [vmem:[#allocation12_spill] sm:$0xff] %v7274_v52  ;;  %v1324_v58 = vadd.f32 %v7091_v25, %v1323_v45  ;;  %v3779_v9 = vunpack.c.l.b16 %v3497_v63 }
 0x14e   : > { %vm1769_vm10 = vcmp.ge.f32.partialorder %v1324_v58, 0.0  ;;  %v1961_v59 = vmul.f32 0.2, %v1324_v58 }
 0x150   : > { %v2153_v1 = vsel %vm1769_vm10, %v1324_v58, %v1961_v59 }
 0x151   : > { %v3498_v8 = vpack.c.bf16 %v2153_v1, %v2153_v1 }
 0x153   : > { %v3780_v48 = vunpack.c.l.b16 %v3498_v8  ;;  %v1326_v11 = vpop.f32.mrf.mxu0  ;;  %v7280_v20 = vpop.f32.mrf.mxu1 }
 0x154   : > { %9477 = vst [vmem:[#allocation13_spill] sm:$0xff] %v7280_v20  ;;  %v1327_v31 = vadd.f32 %v7091_v25, %v1326_v11  ;;  %v2349_v11 = vadd.s32 208, %v7093_v26  ;;  %v6907_v20 = vld [vmem:[%s7054_s11 + $0x2a8] sm:$0xff] }
 0x155   : > { %v7283_v44 = vpack.c.b16 %v3780_v48, %v3779_v9 }
 0x156   : > { %vm1770_vm11 = vcmp.ge.f32.partialorder %v1327_v31, 0.0  ;;  %v1962_v45 = vmul.f32 0.2, %v1327_v31  ;;  %6459 = vmatmul.msk.bf16.gmra.mxu0 %vm961_vm2, %v6842_v2  ;;  %6520 = vmatmul.msk.bf16.gmra.mxu1 %vm961_vm2, %v6903_v35 }
 0x158   : > { %v2154_v54 = vsel %vm1770_vm11, %v1327_v31, %v1962_v45 }
 0x159   : > { %v3307_v63 = vsel %vm2923_vm12, 0.0, %v2154_v54  ;;  %v2733_v54 = vand.u32 15, %v2349_v11 }
 0x15a   : > { %v3499_v48 = vpack.c.bf16 %v3307_v63, %v3307_v63 }
 0x15b   : > { %v1328_v58 = vpop.f32.mrf.mxu0  ;;  %v7287_v59 = vpop.f32.mrf.mxu1  ;;  %vm2925_vm15 = vcmp.eq.s32.totalorder %v2733_v54, 0 }
 0x15c   : > { %9478 = vst [vmem:[#allocation14_spill] sm:$0xff] %v7287_v59  ;;  %v1329_v1 = vadd.f32 %v7091_v25, %v1328_v58  ;;  %v7293_v2 = vunpack.c.l.b16 %v3499_v48  ;;  %v6846_v59 = vld [vmem:[%s7054_s11 + $0xc0] sm:$0xff] }
 0x15e   : > { %vm1771_vm13 = vcmp.ge.f32.partialorder %v1329_v1, 0.0  ;;  %v1963_v8 = vmul.f32 0.2, %v1329_v1 }
 0x160   : > { %v2155_v16 = vsel %vm1771_vm13, %v1329_v1, %v1963_v8 }
 0x161   : > { %v3500_v9 = vpack.c.bf16 %v2155_v16, %v2155_v16 }
 0x163   : > { %v7295_v35 = vunpack.c.l.b16 %v3500_v9  ;;  %v1331_v31 = vpop.f32.mrf.mxu0  ;;  %v7297_v42 = vpop.f32.mrf.mxu1 }
 0x164   : > { %9479 = vst [vmem:[#allocation15_spill] sm:$0xff] %v7297_v42  ;;  %v1332_v45 = vadd.f32 %v7091_v25, %v1331_v31 }
 0x166   : > { %vm1772_vm14 = vcmp.ge.f32.partialorder %v1332_v45, 0.0  ;;  %v1964_v63 = vmul.f32 0.2, %v1332_v45  ;;  %6460 = vmatmul.msk.bf16.gmra.mxu0 %vm961_vm2, %v6843_v34  ;;  %6521 = vmatmul.msk.bf16.gmra.mxu1 %vm961_vm2, %v6904_v33 }
 0x168   : > { %v2156_v1 = vsel %vm1772_vm14, %v1332_v45, %v1964_v63  ;;  %v2735_v63 = vand.u32 15, %v2351_v51 }
 0x169   : > { %v3309_v16 = vsel %vm2925_vm15, 0.0, %v2156_v1 }
 0x16a   : > { %v3501_v31 = vpack.c.bf16 %v3309_v16, %v3309_v16  ;;  %vm2927_vm3 = vcmp.eq.s32.totalorder %v2735_v63, 0 }
 0x16b   : > { %v1333_v8 = vpop.f32.mrf.mxu0  ;;  %v7304_v48 = vpop.f32.mrf.mxu1 }
 0x16c   : > { %9480 = vst [vmem:[#allocation16_spill] sm:$0xff] %v7304_v48  ;;  %v1334_v9 = vadd.f32 %v7091_v25, %v1333_v8  ;;  %v3781_v34 = vunpack.c.l.b16 %v3501_v31  ;;  %v6906_v48 = vld [vmem:[%s7054_s11 + $0x2a0] sm:$0xff] }
 0x16e   : > { %vm1773_vm0 = vcmp.ge.f32.partialorder %v1334_v9, 0.0  ;;  %v1965_v11 = vmul.f32 0.2, %v1334_v9 }
 0x170   : > { %v2157_v58 = vsel %vm1773_vm0, %v1334_v9, %v1965_v11 }
 0x171   : > { %v3502_v32 = vpack.c.bf16 %v2157_v58, %v2157_v58 }
 0x173   : > { %v3782_v42 = vunpack.c.l.b16 %v3502_v32  ;;  %v1336_v33 = vpop.f32.mrf.mxu0  ;;  %v7310_v45 = vpop.f32.mrf.mxu1 }
 0x174   : > { %9481 = vst [vmem:[#allocation17_spill] sm:$0xff] %v7310_v45  ;;  %v1337_v54 = vadd.f32 %v7091_v25, %v1336_v33  ;;  %v2353_v33 = vadd.s32 240, %v7093_v26  ;;  %v6845_v45 = vld [vmem:[%s7054_s11 + $0xb8] sm:$0xff] }
 0x175   : > { %v7313_v1 = vpack.c.b16 %v3782_v42, %v3781_v34 }
 0x176   : > { %vm1774_vm1 = vcmp.ge.f32.partialorder %v1337_v54, 0.0  ;;  %v1966_v8 = vmul.f32 0.2, %v1337_v54  ;;  %6461 = vmatmul.msk.bf16.gmra.mxu0 %vm961_vm2, %v6844_v53  ;;  %6522 = vmatmul.msk.bf16.gmra.mxu1 %vm961_vm2, %v6905_v62 }
 0x178   : > { %v2158_v58 = vsel %vm1774_vm1, %v1337_v54, %v1966_v8 }
 0x179   : > { %v3311_v9 = vsel %vm2927_vm3, 0.0, %v2158_v58  ;;  %v2737_v58 = vand.u32 15, %v2353_v33 }
 0x17a   : > { %v3503_v42 = vpack.c.bf16 %v3311_v9, %v3311_v9 }
 0x17b   : > { %v1338_v16 = vpop.f32.mrf.mxu0  ;;  %v7317_v32 = vpop.f32.mrf.mxu1  ;;  %vm2929_vm6 = vcmp.eq.s32.totalorder %v2737_v58, 0 }
 0x17c   : > { %9482 = vst [vmem:[#allocation18_spill] sm:$0xff] %v7317_v32  ;;  %v1339_v11 = vadd.f32 %v7091_v25, %v1338_v16  ;;  %v7323_v53 = vunpack.c.l.b16 %v3503_v42  ;;  %v2355_v32 = vadd.s32 256, %v7093_v26 }
 0x17e   : > { %vm1775_vm4 = vcmp.ge.f32.partialorder %v1339_v11, 0.0  ;;  %v1967_v51 = vmul.f32 0.2, %v1339_v11 }
 0x180   : > { %v2159_v31 = vsel %vm1775_vm4, %v1339_v11, %v1967_v51 }
 0x181   : > { %v3504_v34 = vpack.c.bf16 %v2159_v31, %v2159_v31 }
 0x183   : > { %v7325_v62 = vunpack.c.l.b16 %v3504_v34  ;;  %v1341_v54 = vpop.f32.mrf.mxu0  ;;  %v7327_v63 = vpop.f32.mrf.mxu1 }
 0x184   : > { %9483 = vst [vmem:[#allocation19_spill] sm:$0xff] %v7327_v63  ;;  %v1342_v8 = vadd.f32 %v7091_v25, %v1341_v54 }
 0x186   : > { %vm1776_vm5 = vcmp.ge.f32.partialorder %v1342_v8, 0.0  ;;  %v1968_v9 = vmul.f32 0.2, %v1342_v8  ;;  %6462 = vmatmul.msk.bf16.gmra.mxu0 %vm961_vm2, %v6845_v45  ;;  %6523 = vmatmul.msk.bf16.gmra.mxu1 %vm961_vm2, %v6906_v48 }
 0x188   : > { %v2160_v11 = vsel %vm1776_vm5, %v1342_v8, %v1968_v9  ;;  %v2739_v9 = vand.u32 15, %v2355_v32 }
 0x189   : > { %v3313_v31 = vsel %vm2929_vm6, 0.0, %v2160_v11 }
 0x18a   : > { %v3505_v54 = vpack.c.bf16 %v3313_v31, %v3313_v31  ;;  %vm2931_vm9 = vcmp.eq.s32.totalorder %v2739_v9, 0 }
 0x18b   : > { %v1343_v51 = vpop.f32.mrf.mxu0  ;;  %v7334_v42 = vpop.f32.mrf.mxu1 }
 0x18c   : > { %9484 = vst [vmem:[#allocation20_spill] sm:$0xff] %v7334_v42  ;;  %v1344_v34 = vadd.f32 %v7091_v25, %v1343_v51  ;;  %v3783_v45 = vunpack.c.l.b16 %v3505_v54  ;;  %v6908_v42 = vld [vmem:[%s7054_s11 + $0x2b0] sm:$0xff] }
 0x18e   : > { %vm1777_vm7 = vcmp.ge.f32.partialorder %v1344_v34, 0.0  ;;  %v1969_v33 = vmul.f32 0.2, %v1344_v34 }
 0x190   : > { %v2161_v16 = vsel %vm1777_vm7, %v1344_v34, %v1969_v33 }
 0x191   : > { %v3506_v63 = vpack.c.bf16 %v2161_v16, %v2161_v16 }
 0x193   : > { %v3784_v52 = vunpack.c.l.b16 %v3506_v63  ;;  %v1346_v48 = vpop.f32.mrf.mxu0  ;;  %v7340_v8 = vpop.f32.mrf.mxu1 }
 0x194   : > { %9485 = vst [vmem:[#allocation21_spill] sm:$0xff] %v7340_v8  ;;  %v1347_v58 = vadd.f32 %v7091_v25, %v1346_v48  ;;  %v2357_v48 = vadd.s32 272, %v7093_v26  ;;  %v6847_v8 = vld [vmem:[%s7054_s11 + $0xc8] sm:$0xff] }
 0x195   : > { %v7343_v11 = vpack.c.b16 %v3784_v52, %v3783_v45 }
 0x196   : > { %vm1778_vm8 = vcmp.ge.f32.partialorder %v1347_v58, 0.0  ;;  %v1970_v51 = vmul.f32 0.2, %v1347_v58  ;;  %6463 = vmatmul.msk.bf16.gmra.mxu0 %vm961_vm2, %v6846_v59  ;;  %6524 = vmatmul.msk.bf16.gmra.mxu1 %vm961_vm2, %v6907_v20 }
 0x198   : > { %v2162_v16 = vsel %vm1778_vm8, %v1347_v58, %v1970_v51  ;;  %vm3913_vm8 = vcmask 523264  }
 0x199   : > { %v3315_v34 = vsel %vm2931_vm9, 0.0, %v2162_v16  ;;  %v2741_v16 = vand.u32 15, %v2357_v48 }
 0x19a   : > { %v3507_v52 = vpack.c.bf16 %v3315_v34, %v3315_v34 }
 0x19b   : > { %v1348_v31 = vpop.f32.mrf.mxu0  ;;  %v7347_v63 = vpop.f32.mrf.mxu1  ;;  %vm2933_vm12 = vcmp.eq.s32.totalorder %v2741_v16, 0 }
 0x19c   : > { %9486 = vst [vmem:[#allocation22_spill] sm:$0xff] %v7347_v63  ;;  %v1349_v33 = vadd.f32 %v7091_v25, %v1348_v31  ;;  %v7353_v59 = vunpack.c.l.b16 %v3507_v52  ;;  %v2359_v63 = vadd.s32 288, %v7093_v26 }
 0x19e   : > { %vm1779_vm10 = vcmp.ge.f32.partialorder %v1349_v33, 0.0  ;;  %v1971_v32 = vmul.f32 0.2, %v1349_v33 }
 0x1a0   : > { %v2163_v54 = vsel %vm1779_vm10, %v1349_v33, %v1971_v32 }
 0x1a1   : > { %v3508_v45 = vpack.c.bf16 %v2163_v54, %v2163_v54 }
 0x1a3   : > { %v7355_v20 = vunpack.c.l.b16 %v3508_v45  ;;  %v1351_v58 = vpop.f32.mrf.mxu0  ;;  %v7357_v9 = vpop.f32.mrf.mxu1 }
 0x1a4   : > { %9487 = vst [vmem:[#allocation23_spill] sm:$0xff] %v7357_v9  ;;  %v1352_v51 = vadd.f32 %v7091_v25, %v1351_v58 }
 0x1a6   : > { %vm1780_vm11 = vcmp.ge.f32.partialorder %v1352_v51, 0.0  ;;  %v1972_v34 = vmul.f32 0.2, %v1352_v51  ;;  %6464 = vmatmul.msk.bf16.gmra.mxu0 %vm961_vm2, %v6847_v8  ;;  %6525 = vmatmul.msk.bf16.gmra.mxu1 %vm961_vm2, %v6908_v42 }
 0x1a8   : > { %v2164_v33 = vsel %vm1780_vm11, %v1352_v51, %v1972_v34  ;;  %v2743_v34 = vand.u32 15, %v2359_v63  ;;  %v6933_v63 = vld [vmem:[%s9389_s3 + $0x70] sm:$0xff] }
 0x1a9   : > { %v3317_v54 = vsel %vm2933_vm12, 0.0, %v2164_v33  ;;  %v6934_v33 = vld [vmem:[%s9389_s3 + $0x78] sm:$0xff] }
 0x1aa   : > { %v3509_v58 = vpack.c.bf16 %v3317_v54, %v3317_v54  ;;  %4630 = vmatpush.bf16.msrb.mxu1 %v6934_v33  ;;  %vm2935_vm15 = vcmp.eq.s32.totalorder %v2743_v34, 0  ;;  %v6931_v34 = vld [vmem:[%s9389_s3 + $0x60] sm:$0xff]  ;;  %v6849_v33 = vld [vmem:[%s7054_s11 + $0xd8] sm:$0xff] }
 0x1ab   : > { %v1353_v32 = vpop.f32.mrf.mxu0  ;;  %v7364_v52 = vpop.f32.mrf.mxu1 }
 0x1ac   : > { %9488 = vst [vmem:[#allocation24_spill] sm:$0xff] %v7364_v52  ;;  %v1354_v45 = vadd.f32 %v7091_v25, %v1353_v32  ;;  %v3785_v8 = vunpack.c.l.b16 %v3509_v58 }
 0x1ae   : > { %vm1781_vm13 = vcmp.ge.f32.partialorder %v1354_v45, 0.0  ;;  %v1973_v48 = vmul.f32 0.2, %v1354_v45  ;;  %4631 = vmatpush.bf16.msrb.mxu1 %v6933_v63 }
 0x1b0   : > { %v2165_v31 = vsel %vm1781_vm13, %v1354_v45, %v1973_v48 }
 0x1b1   : > { %v3510_v9 = vpack.c.bf16 %v2165_v31, %v2165_v31 }
 0x1b3   : > { %v3786_v29 = vunpack.c.l.b16 %v3510_v9  ;;  %v1356_v42 = vpop.f32.mrf.mxu0  ;;  %v7370_v51 = vpop.f32.mrf.mxu1 }
 0x1b4   : > { %9489 = vst [vmem:[#allocation25_spill] sm:$0xff] %v7370_v51  ;;  %v1357_v16 = vadd.f32 %v7091_v25, %v1356_v42 }
 0x1b5   : > { %v7376_v32 = vpack.c.b16 %v3786_v29, %v3785_v8 }
 0x1b6   : > { %vm1782_vm14 = vcmp.ge.f32.partialorder %v1357_v16, 0.0  ;;  %v1974_v31 = vmul.f32 0.2, %v1357_v16  ;;  %6465 = vmatmul.msk.bf16.gmra.mxu0 %vm961_vm2, %v6848_v17  ;;  %6526 = vmatmul.msk.bf16.gmra.mxu1 %vm961_vm2, %v6909_v50  ;;  %v6932_v50 = vld [vmem:[%s9389_s3 + $0x68] sm:$0xff] }
 0x1b7   : > { %4632 = vmatpush.bf16.msrb.mxu1 %v6932_v50 }
 0x1b8   : > { %v2166_v9 = vsel %vm1782_vm14, %v1357_v16, %v1974_v31  ;;  %v2361_v16 = vadd.s32 304, %v7093_v26  ;;  %v6910_v31 = vld [vmem:[%s7054_s11 + $0x2c0] sm:$0xff] }
 0x1b9   : > { %v3319_v29 = vsel %vm2935_vm15, 0.0, %v2166_v9 }
 0x1ba   : > { %v3511_v58 = vpack.c.bf16 %v3319_v29, %v3319_v29 }
 0x1bb   : > { %v1358_v54 = vpop.f32.mrf.mxu0  ;;  %v7383_v45 = vpop.f32.mrf.mxu1  ;;  %4633 = vmatpush.bf16.msrb.mxu1 %v6931_v34 }
 0x1bc   : > { %9490 = vst [vmem:[#allocation26_spill] sm:$0xff] %v7383_v45  ;;  %v1359_v48 = vadd.f32 %v7091_v25, %v1358_v54  ;;  %v7395_v9 = vunpack.c.l.b16 %v3511_v58 }
 0x1be   : > { %vm1783_vm0 = vcmp.ge.f32.partialorder %v1359_v48, 0.0  ;;  %v1975_v17 = vmul.f32 0.2, %v1359_v48 }
 0x1c0   : > { %v2167_v8 = vsel %vm1783_vm0, %v1359_v48, %v1975_v17  ;;  %v2745_v48 = vand.u32 15, %v2361_v16 }
 0x1c1   : > { %v3512_v42 = vpack.c.bf16 %v2167_v8, %v2167_v8 }
 0x1c2   : > { %vm2937_vm3 = vcmp.eq.s32.totalorder %v2745_v48, 0  ;;  %v6911_v48 = vld [vmem:[%s7054_s11 + $0x2c8] sm:$0xff] }
 0x1c3   : > { %v7397_v63 = vunpack.c.l.b16 %v3512_v42  ;;  %v1361_v54 = vpop.f32.mrf.mxu0  ;;  %v7399_v45 = vpop.f32.mrf.mxu1 }
 0x1c4   : > { %9491 = vst [vmem:[#allocation27_spill] sm:$0xff] %v7399_v45  ;;  %v1362_v29 = vadd.f32 %v7091_v25, %v1361_v54  ;;  %v7411_v25 = vld [vmem:[%s9388_s2] ss:$0 sm:$0xff] }
 0x1c6   : > { %vm1784_vm1 = vcmp.ge.f32.partialorder %v1362_v29, 0.0  ;;  %v1976_v17 = vmul.f32 0.2, %v1362_v29  ;;  %6466 = vmatmul.msk.bf16.gmra.mxu0 %vm961_vm2, %v6849_v33  ;;  %6527 = vmatmul.msk.bf16.gmra.mxu1 %vm961_vm2, %v6910_v31  ;;  %v2363_v31 = vadd.s32 320, %v7093_v26 }
 0x1c8   : > { %v2168_v58 = vsel %vm1784_vm1, %v1362_v29, %v1976_v17  ;;  %v6850_v29 = vld [vmem:[%s7054_s11 + $0xe0] sm:$0xff]  ;;  %v2747_v55 = vand.u32 15, %v2363_v31 }
 0x1c9   : > { %v3321_v34 = vsel %vm2937_vm3, 0.0, %v2168_v58 }
 0x1ca   : > { %v3513_v50 = vpack.c.bf16 %v3321_v34, %v3321_v34  ;;  %vm2939_vm6 = vcmp.eq.s32.totalorder %v2747_v55, 0 }
 0x1cb   : > { %v1363_v8 = vpop.f32.mrf.mxu0  ;;  %v7406_v42 = vpop.f32.mrf.mxu1 }
 0x1cc   : > { %9492 = vst [vmem:[#allocation28_spill] sm:$0xff] %v7406_v42  ;;  %v1364_v16 = vadd.f32 %v7411_v25, %v1363_v8  ;;  %v3787_v17 = vunpack.c.l.b16 %v3513_v50 }
 0x1ce   : > { %vm1785_vm4 = vcmp.ge.f32.partialorder %v1364_v16, 0.0  ;;  %v1977_v54 = vmul.f32 0.2, %v1364_v16 }
 0x1d0   : > { %v2169_v33 = vsel %vm1785_vm4, %v1364_v16, %v1977_v54 }
 0x1d1   : > { %v3514_v45 = vpack.c.bf16 %v2169_v33, %v2169_v33 }
 0x1d3   : > { %v3788_v51 = vunpack.c.l.b16 %v3514_v45  ;;  %v1366_v42 = vpop.f32.mrf.mxu0  ;;  %v7417_v58 = vpop.f32.mrf.mxu1 }
 0x1d4   : > { %9493 = vst [vmem:[#allocation29_spill] sm:$0xff] %v7417_v58  ;;  %v1367_v52 = vadd.f32 %v7411_v25, %v1366_v42  ;;  %v6851_v58 = vld [vmem:[%s7054_s11 + $0xe8] sm:$0xff] }
 0x1d5   : > { %v7420_v43 = vpack.c.b16 %v3788_v51, %v3787_v17  ;;  %v2365_v17 = vadd.s32 336, %v7093_v26 }
 0x1d6   : > { %vm1786_vm5 = vcmp.ge.f32.partialorder %v1367_v52, 0.0  ;;  %v1978_v8 = vmul.f32 0.2, %v1367_v52  ;;  %6467 = vmatmul.msk.bf16.gmra.mxu0 %vm961_vm2, %v6850_v29  ;;  %6528 = vmatmul.msk.bf16.gmra.mxu1 %vm961_vm2, %v6911_v48 }
 0x1d8   : > { %v2170_v34 = vsel %vm1786_vm5, %v1367_v52, %v1978_v8  ;;  %v2749_v8 = vand.u32 15, %v2365_v17 }
 0x1d9   : > { %v3323_v45 = vsel %vm2939_vm6, 0.0, %v2170_v34 }
 0x1da   : > { %v3515_v33 = vpack.c.bf16 %v3323_v45, %v3323_v45  ;;  %v9496_v45 = vpack.c.b16 %v7111_v47, %v7109_v46  ;;  %vm2941_vm10 = vcmp.eq.s32.totalorder %v2749_v8, 0 }
 0x1db   : > { %v1368_v16 = vpop.f32.mrf.mxu0  ;;  %v7424_v50 = vpop.f32.mrf.mxu1 }
 0x1dc   : > { %9494 = vst [vmem:[#allocation30_spill] sm:$0xff] %v7424_v50  ;;  %v1369_v54 = vadd.f32 %v7411_v25, %v1368_v16  ;;  %v7429_v13 = vunpack.c.l.b16 %v3515_v33  ;;  %v6852_v50 = vld [vmem:[%s7054_s11 + $0xf0] sm:$0xff] }
 0x1de   : > { %vm1787_vm7 = vcmp.ge.f32.partialorder %v1369_v54, 0.0  ;;  %v1979_v42 = vmul.f32 0.2, %v1369_v54 }
 0x1e0   : > { %v2171_v51 = vsel %vm1787_vm7, %v1369_v54, %v1979_v42 }
 0x1e1   : > { %v3516_v31 = vpack.c.bf16 %v2171_v51, %v2171_v51 }
 0x1e3   : > { %v7431_v29 = vunpack.c.l.b16 %v3516_v31  ;;  %v1371_v52 = vpop.f32.mrf.mxu0  ;;  %v7433_v55 = vpop.f32.mrf.mxu1 }
 0x1e4   : > { %9495 = vst [vmem:[#allocation31_spill] sm:$0xff] %v7433_v55  ;;  %v1372_v48 = vadd.f32 %v7411_v25, %v1371_v52 }
 0x1e6   : > { %vm1788_vm9 = vcmp.ge.f32.partialorder %v1372_v48, 0.0  ;;  %v1980_v16 = vmul.f32 0.2, %v1372_v48  ;;  %6468 = vmatmul.msk.bf16.gmra.mxu0 %vm961_vm2, %v6851_v58  ;;  %6644 = vmatmul.msk.bf16.vlgmr.msrb.gmra.mxu1 %vm3913_vm8, %v9496_v45  ;;  %v2367_v58 = vadd.s32 352, %v7093_v26 }
 0x1e8   : > { %v2172_v54 = vsel %vm1788_vm9, %v1372_v48, %v1980_v16  ;;  %v2751_v8 = vand.u32 15, %v2367_v58 }
 0x1e9   : > { %v3325_v51 = vsel %vm2941_vm10, 0.0, %v2172_v54 }
 0x1ea   : > { %v3517_v52 = vpack.c.bf16 %v3325_v51, %v3325_v51  ;;  %vm2943_vm13 = vcmp.eq.s32.totalorder %v2751_v8, 0 }
 0x1eb   : > { %v1373_v42 = vpop.f32.mrf.mxu0  ;;  %v7443_v33 = vpop.f32.mrf.mxu1 }
 0x1ec   : > { %v1374_v31 = vadd.f32 %v7411_v25, %v1373_v42  ;;  %v3789_v61 = vunpack.c.l.b16 %v3517_v52 }
 0x1ee   : > { %vm1789_vm11 = vcmp.ge.f32.partialorder %v1374_v31, 0.0  ;;  %v1981_v17 = vmul.f32 0.2, %v1374_v31 }
 0x1f0   : > { %v2173_v34 = vsel %vm1789_vm11, %v1374_v31, %v1981_v17 }
 0x1f1   : > { %v3518_v55 = vpack.c.bf16 %v2173_v34, %v2173_v34  ;;  %v9498_v34 = vpack.c.b16 %v7141_v23, %v7139_v22 }
 0x1f3   : > { %v3790_v46 = vunpack.c.l.b16 %v3518_v55  ;;  %v1376_v47 = vpop.f32.mrf.mxu0  ;;  %v7448_v45 = vpop.f32.mrf.mxu1 }
 0x1f4   : > { %9497 = vst [vmem:[#allocation32_spill] sm:$0xff] %v7448_v45  ;;  %v1377_v48 = vadd.f32 %v7411_v25, %v1376_v47  ;;  %v6853_v47 = vld [vmem:[%s7054_s11 + $0xf8] sm:$0xff] }
 0x1f5   : > { %v7451_v16 = vpack.c.b16 %v3790_v46, %v3789_v61 }
 0x1f6   : > { %vm1790_vm12 = vcmp.ge.f32.partialorder %v1377_v48, 0.0  ;;  %v1982_v54 = vmul.f32 0.2, %v1377_v48  ;;  %6469 = vmatmul.msk.bf16.gmra.mxu0 %vm961_vm2, %v6852_v50  ;;  %6645 = vmatmul.msk.bf16.gmra.mxu1 %vm3913_vm8, %v9498_v34  ;;  %v2369_v50 = vadd.s32 368, %v7093_v26 }
 0x1f8   : > { %v2174_v42 = vsel %vm1790_vm12, %v1377_v48, %v1982_v54  ;;  %v2753_v54 = vand.u32 15, %v2369_v50 }
 0x1f9   : > { %v3327_v31 = vsel %vm2943_vm13, 0.0, %v2174_v42 }
 0x1fa   : > { %v3519_v52 = vpack.c.bf16 %v3327_v31, %v3327_v31  ;;  %vm2945_vm0 = vcmp.eq.s32.totalorder %v2753_v54, 0 }
 0x1fb   : > { %v1378_v55 = vpop.f32.mrf.mxu0  ;;  %v7458_v51 = vpop.f32.mrf.mxu1 }
 0x1fc   : > { %9499 = vst [vmem:[#allocation33_spill] sm:$0xff] %v7458_v51  ;;  %v1379_v17 = vadd.f32 %v7411_v25, %v1378_v55  ;;  %v7463_v45 = vunpack.c.l.b16 %v3519_v52  ;;  %v9501_v55 = vpack.c.b16 %v7175_v24, %v7173_v21 }
 0x1fe   : > { %vm1791_vm14 = vcmp.ge.f32.partialorder %v1379_v17, 0.0  ;;  %v1983_v61 = vmul.f32 0.2, %v1379_v17 }
 0x200   : > { %v2175_v58 = vsel %vm1791_vm14, %v1379_v17, %v1983_v61 }
 0x201   : > { %v3520_v46 = vpack.c.bf16 %v2175_v58, %v2175_v58 }
 0x203   : > { %v7465_v22 = vunpack.c.l.b16 %v3520_v46  ;;  %v1381_v23 = vpop.f32.mrf.mxu0  ;;  %v7467_v48 = vpop.f32.mrf.mxu1 }
 0x204   : > { %9500 = vst [vmem:[#allocation34_spill] sm:$0xff] %v7467_v48  ;;  %v1382_v8 = vadd.f32 %v7411_v25, %v1381_v23  ;;  %v6854_v48 = vld [vmem:[%s7054_s11 + $0x100] sm:$0xff] }
 0x206   : > { %vm1792_vm15 = vcmp.ge.f32.partialorder %v1382_v8, 0.0  ;;  %v1984_v42 = vmul.f32 0.2, %v1382_v8  ;;  %6470 = vmatmul.msk.bf16.gmra.mxu0 %vm961_vm2, %v6853_v47  ;;  %6646 = vmatmul.msk.bf16.gmra.mxu1 %vm3913_vm8, %v9501_v55  ;;  %v2371_v47 = vadd.s32 384, %v7093_v26 }
 0x208   : > { %v2176_v31 = vsel %vm1792_vm15, %v1382_v8, %v1984_v42  ;;  %v2755_v54 = vand.u32 15, %v2371_v47 }
 0x209   : > { %v3329_v52 = vsel %vm2945_vm0, 0.0, %v2176_v31 }
 0x20a   : > { %v3521_v50 = vpack.c.bf16 %v3329_v52, %v3329_v52  ;;  %vm2947_vm4 = vcmp.eq.s32.totalorder %v2755_v54, 0 }
 0x20b   : > { %v1383_v17 = vpop.f32.mrf.mxu0  ;;  %v7477_v61 = vpop.f32.mrf.mxu1 }
 0x20c   : > { %v1384_v58 = vadd.f32 %v7411_v25, %v1383_v17  ;;  %v3791_v51 = vunpack.c.l.b16 %v3521_v50  ;;  %v9503_v17 = vpack.c.b16 %v7205_v19, %v7203_v18 }
 0x20e   : > { %vm1793_vm1 = vcmp.ge.f32.partialorder %v1384_v58, 0.0  ;;  %v1985_v46 = vmul.f32 0.2, %v1384_v58 }
 0x210   : > { %v2177_v23 = vsel %vm1793_vm1, %v1384_v58, %v1985_v46 }
 0x211   : > { %v3522_v34 = vpack.c.bf16 %v2177_v23, %v2177_v23 }
 0x213   : > { %v3792_v21 = vunpack.c.l.b16 %v3522_v34  ;;  %v1386_v24 = vpop.f32.mrf.mxu0  ;;  %v7482_v55 = vpop.f32.mrf.mxu1 }
 0x214   : > { %9502 = vst [vmem:[#allocation35_spill] sm:$0xff] %v7482_v55  ;;  %v1387_v8 = vadd.f32 %v7411_v25, %v1386_v24  ;;  %v6855_v24 = vld [vmem:[%s7054_s11 + $0x108] sm:$0xff] }
 0x215   : > { %v7485_v42 = vpack.c.b16 %v3792_v21, %v3791_v51 }
 0x216   : > { %vm1794_vm3 = vcmp.ge.f32.partialorder %v1387_v8, 0.0  ;;  %v1986_v31 = vmul.f32 0.2, %v1387_v8  ;;  %6471 = vmatmul.msk.bf16.gmra.mxu0 %vm961_vm2, %v6854_v48  ;;  %6647 = vmatmul.msk.bf16.gmra.mxu1 %vm3913_vm8, %v9503_v17  ;;  %v2373_v48 = vadd.s32 400, %v7093_v26 }
 0x218   : > { %v2178_v52 = vsel %vm1794_vm3, %v1387_v8, %v1986_v31  ;;  %v2757_v31 = vand.u32 15, %v2373_v48 }
 0x219   : > { %v3331_v46 = vsel %vm2947_vm4, 0.0, %v2178_v52 }
 0x21a   : > { %v3523_v23 = vpack.c.bf16 %v3331_v46, %v3331_v46  ;;  %vm2949_vm7 = vcmp.eq.s32.totalorder %v2757_v31, 0 }
 0x21b   : > { %v1388_v34 = vpop.f32.mrf.mxu0  ;;  %v7492_v58 = vpop.f32.mrf.mxu1 }
 0x21c   : > { %9504 = vst [vmem:[#allocation36_spill] sm:$0xff] %v7492_v58  ;;  %v1389_v50 = vadd.f32 %v7411_v25, %v1388_v34  ;;  %v7497_v55 = vunpack.c.l.b16 %v3523_v23  ;;  %v9506_v34 = vpack.c.b16 %v7235_v41, %v7233_v39 }
 0x21e   : > { %vm1795_vm5 = vcmp.ge.f32.partialorder %v1389_v50, 0.0  ;;  %v1987_v51 = vmul.f32 0.2, %v1389_v50 }
 0x220   : > { %v2179_v47 = vsel %vm1795_vm5, %v1389_v50, %v1987_v51 }
 0x221   : > { %v3524_v21 = vpack.c.bf16 %v2179_v47, %v2179_v47 }
 0x223   : > { %v7499_v18 = vunpack.c.l.b16 %v3524_v21  ;;  %v1391_v19 = vpop.f32.mrf.mxu0  ;;  %v7501_v8 = vpop.f32.mrf.mxu1 }
 0x224   : > { %9505 = vst [vmem:[#allocation37_spill] sm:$0xff] %v7501_v8  ;;  %v1392_v54 = vadd.f32 %v7411_v25, %v1391_v19  ;;  %v6856_v8 = vld [vmem:[%s7054_s11 + $0x110] sm:$0xff] }
 0x226   : > { %vm1796_vm6 = vcmp.ge.f32.partialorder %v1392_v54, 0.0  ;;  %v1988_v52 = vmul.f32 0.2, %v1392_v54  ;;  %6472 = vmatmul.msk.bf16.gmra.mxu0 %vm961_vm2, %v6855_v24  ;;  %6648 = vmatmul.msk.bf16.gmra.mxu1 %vm3913_vm8, %v9506_v34  ;;  %v2375_v24 = vadd.s32 416, %v7093_v26 }
 0x228   : > { %v2180_v46 = vsel %vm1796_vm6, %v1392_v54, %v1988_v52  ;;  %v2759_v31 = vand.u32 15, %v2375_v24 }
 0x229   : > { %v3333_v23 = vsel %vm2949_vm7, 0.0, %v2180_v46 }
 0x22a   : > { %v3525_v48 = vpack.c.bf16 %v3333_v23, %v3333_v23  ;;  %vm2951_vm11 = vcmp.eq.s32.totalorder %v2759_v31, 0 }
 0x22b   : > { %v1393_v50 = vpop.f32.mrf.mxu0  ;;  %v7511_v51 = vpop.f32.mrf.mxu1 }
 0x22c   : > { %v1394_v47 = vadd.f32 %v7411_v25, %v1393_v50  ;;  %v3793_v58 = vunpack.c.l.b16 %v3525_v48  ;;  %v9508_v50 = vpack.c.b16 %v7265_v15, %v7263_v14 }
 0x22e   : > { %vm1797_vm9 = vcmp.ge.f32.partialorder %v1394_v47, 0.0  ;;  %v1989_v21 = vmul.f32 0.2, %v1394_v47 }
 0x230   : > { %v2181_v19 = vsel %vm1797_vm9, %v1394_v47, %v1989_v21 }
 0x231   : > { %v3526_v17 = vpack.c.bf16 %v2181_v19, %v2181_v19 }
 0x233   : > { %v3794_v39 = vunpack.c.l.b16 %v3526_v17  ;;  %v1396_v41 = vpop.f32.mrf.mxu0  ;;  %v7516_v34 = vpop.f32.mrf.mxu1 }
 0x234   : > { %9507 = vst [vmem:[#allocation38_spill] sm:$0xff] %v7516_v34  ;;  %v1397_v54 = vadd.f32 %v7411_v25, %v1396_v41  ;;  %v6857_v41 = vld [vmem:[%s7054_s11 + $0x118] sm:$0xff] }
 0x235   : > { %v7519_v52 = vpack.c.b16 %v3794_v39, %v3793_v58 }
 0x236   : > { %vm1798_vm10 = vcmp.ge.f32.partialorder %v1397_v54, 0.0  ;;  %v1990_v46 = vmul.f32 0.2, %v1397_v54  ;;  %6473 = vmatmul.msk.bf16.gmra.mxu0 %vm961_vm2, %v6856_v8  ;;  %6649 = vmatmul.msk.bf16.gmra.mxu1 %vm3913_vm8, %v9508_v50  ;;  %v2377_v8 = vadd.s32 432, %v7093_v26 }
 0x238   : > { %v2182_v23 = vsel %vm1798_vm10, %v1397_v54, %v1990_v46  ;;  %v2761_v46 = vand.u32 15, %v2377_v8 }
 0x239   : > { %v3335_v21 = vsel %vm2951_vm11, 0.0, %v2182_v23 }
 0x23a   : > { %v3527_v19 = vpack.c.bf16 %v3335_v21, %v3335_v21  ;;  %vm2953_vm14 = vcmp.eq.s32.totalorder %v2761_v46, 0 }
 0x23b   : > { %v1398_v17 = vpop.f32.mrf.mxu0  ;;  %v7526_v47 = vpop.f32.mrf.mxu1 }
 0x23c   : > { %9509 = vst [vmem:[#allocation39_spill] sm:$0xff] %v7526_v47  ;;  %v1399_v48 = vadd.f32 %v7411_v25, %v1398_v17  ;;  %v7531_v34 = vunpack.c.l.b16 %v3527_v19  ;;  %v9511_v17 = vpack.c.b16 %v7295_v35, %v7293_v2 }
 0x23e   : > { %vm1799_vm12 = vcmp.ge.f32.partialorder %v1399_v48, 0.0  ;;  %v1991_v58 = vmul.f32 0.2, %v1399_v48 }
 0x240   : > { %v2183_v24 = vsel %vm1799_vm12, %v1399_v48, %v1991_v58 }
 0x241   : > { %v3528_v39 = vpack.c.bf16 %v2183_v24, %v2183_v24 }
 0x243   : > { %v7533_v14 = vunpack.c.l.b16 %v3528_v39  ;;  %v1401_v15 = vpop.f32.mrf.mxu0  ;;  %v7535_v54 = vpop.f32.mrf.mxu1 }
 0x244   : > { %9510 = vst [vmem:[#allocation40_spill] sm:$0xff] %v7535_v54  ;;  %v1402_v31 = vadd.f32 %v7411_v25, %v1401_v15  ;;  %v6858_v54 = vld [vmem:[%s7054_s11 + $0x120] sm:$0xff] }
 0x246   : > { %vm1800_vm13 = vcmp.ge.f32.partialorder %v1402_v31, 0.0  ;;  %v1992_v23 = vmul.f32 0.2, %v1402_v31  ;;  %6474 = vmatmul.msk.bf16.gmra.mxu0 %vm961_vm2, %v6857_v41  ;;  %6650 = vmatmul.msk.bf16.gmra.mxu1 %vm3913_vm8, %v9511_v17  ;;  %v2379_v41 = vadd.s32 448, %v7093_v26 }
 0x248   : > { %v2184_v21 = vsel %vm1800_vm13, %v1402_v31, %v1992_v23  ;;  %v2763_v46 = vand.u32 15, %v2379_v41 }
 0x249   : > { %v3337_v19 = vsel %vm2953_vm14, 0.0, %v2184_v21 }
 0x24a   : > { %v3529_v8 = vpack.c.bf16 %v3337_v19, %v3337_v19  ;;  %vm2955_vm1 = vcmp.eq.s32.totalorder %v2763_v46, 0 }
 0x24b   : > { %v1403_v48 = vpop.f32.mrf.mxu0  ;;  %v7545_v58 = vpop.f32.mrf.mxu1 }
 0x24c   : > { %v1404_v24 = vadd.f32 %v7411_v25, %v1403_v48  ;;  %v3795_v47 = vunpack.c.l.b16 %v3529_v8  ;;  %v9513_v48 = vpack.c.b16 %v7325_v62, %v7323_v53 }
 0x24e   : > { %vm1801_vm15 = vcmp.ge.f32.partialorder %v1404_v24, 0.0  ;;  %v1993_v39 = vmul.f32 0.2, %v1404_v24 }
 0x250   : > { %v2185_v15 = vsel %vm1801_vm15, %v1404_v24, %v1993_v39 }
 0x251   : > { %v3530_v50 = vpack.c.bf16 %v2185_v15, %v2185_v15 }
 0x253   : > { %v3796_v2 = vunpack.c.l.b16 %v3530_v50  ;;  %v1406_v35 = vpop.f32.mrf.mxu0  ;;  %v7550_v17 = vpop.f32.mrf.mxu1 }
 0x254   : > { %9512 = vst [vmem:[#allocation41_spill] sm:$0xff] %v7550_v17  ;;  %v1407_v31 = vadd.f32 %v7411_v25, %v1406_v35  ;;  %v6859_v35 = vld [vmem:[%s7054_s11 + $0x128] sm:$0xff] }
 0x255   : > { %v7553_v23 = vpack.c.b16 %v3796_v2, %v3795_v47 }
 0x256   : > { %vm1802_vm0 = vcmp.ge.f32.partialorder %v1407_v31, 0.0  ;;  %v1994_v21 = vmul.f32 0.2, %v1407_v31  ;;  %6475 = vmatmul.msk.bf16.gmra.mxu0 %vm961_vm2, %v6858_v54  ;;  %6651 = vmatmul.msk.bf16.gmra.mxu1 %vm3913_vm8, %v9513_v48  ;;  %v2381_v54 = vadd.s32 464, %v7093_v26 }
 0x258   : > { %v2186_v19 = vsel %vm1802_vm0, %v1407_v31, %v1994_v21  ;;  %v2765_v21 = vand.u32 15, %v2381_v54 }
 0x259   : > { %v3339_v39 = vsel %vm2955_vm1, 0.0, %v2186_v19 }
 0x25a   : > { %v3531_v15 = vpack.c.bf16 %v3339_v39, %v3339_v39  ;;  %vm2957_vm5 = vcmp.eq.s32.totalorder %v2765_v21, 0 }
 0x25b   : > { %v1408_v50 = vpop.f32.mrf.mxu0  ;;  %v7560_v24 = vpop.f32.mrf.mxu1 }
 0x25c   : > { %9514 = vst [vmem:[#allocation42_spill] sm:$0xff] %v7560_v24  ;;  %v1409_v8 = vadd.f32 %v7411_v25, %v1408_v50  ;;  %v7565_v17 = vunpack.c.l.b16 %v3531_v15  ;;  %v9516_v50 = vpack.c.b16 %v7355_v20, %v7353_v59 }
 0x25e   : > { %vm1803_vm3 = vcmp.ge.f32.partialorder %v1409_v8, 0.0  ;;  %v1995_v47 = vmul.f32 0.2, %v1409_v8 }
 0x260   : > { %v2187_v41 = vsel %vm1803_vm3, %v1409_v8, %v1995_v47 }
 0x261   : > { %v3532_v2 = vpack.c.bf16 %v2187_v41, %v2187_v41 }
 0x263   : > { %v7567_v53 = vunpack.c.l.b16 %v3532_v2  ;;  %v1411_v62 = vpop.f32.mrf.mxu0  ;;  %v7569_v31 = vpop.f32.mrf.mxu1 }
 0x264   : > { %9515 = vst [vmem:[#allocation43_spill] sm:$0xff] %v7569_v31  ;;  %v1412_v46 = vadd.f32 %v7411_v25, %v1411_v62  ;;  %v6860_v31 = vld [vmem:[%s7054_s11 + $0x130] sm:$0xff] }
 0x266   : > { %vm1804_vm4 = vcmp.ge.f32.partialorder %v1412_v46, 0.0  ;;  %v1996_v19 = vmul.f32 0.2, %v1412_v46  ;;  %6476 = vmatmul.msk.bf16.gmra.mxu0 %vm961_vm2, %v6859_v35  ;;  %6652 = vmatmul.msk.bf16.gmra.mxu1 %vm3913_vm8, %v9516_v50  ;;  %v2383_v35 = vadd.s32 480, %v7093_v26 }
 0x268   : > { %v2188_v39 = vsel %vm1804_vm4, %v1412_v46, %v1996_v19  ;;  %v2767_v21 = vand.u32 15, %v2383_v35 }
 0x269   : > { %v3341_v15 = vsel %vm2957_vm5, 0.0, %v2188_v39 }
 0x26a   : > { %v3533_v54 = vpack.c.bf16 %v3341_v15, %v3341_v15  ;;  %vm2959_vm9 = vcmp.eq.s32.totalorder %v2767_v21, 0  ;;  %v6923_v21 = vld [vmem:[%s9389_s3 + $0x20] sm:$0xff] }
 0x26b   : > { %v1413_v8 = vpop.f32.mrf.mxu0  ;;  %v7579_v47 = vpop.f32.mrf.mxu1 }
 0x26c   : > { %9517 = vst [vmem:[#allocation44_spill] sm:$0xff] %v7579_v47  ;;  %v1414_v41 = vadd.f32 %v7411_v25, %v1413_v8  ;;  %v3797_v24 = vunpack.c.l.b16 %v3533_v54  ;;  %v9519_v8 = vpack.c.b16 %v7397_v63, %v7395_v9  ;;  %v6924_v54 = vld [vmem:[%s9389_s3 + $0x28] sm:$0xff] }
 0x26e   : > { %vm1805_vm6 = vcmp.ge.f32.partialorder %v1414_v41, 0.0  ;;  %v1997_v2 = vmul.f32 0.2, %v1414_v41 }
 0x270   : > { %v2189_v62 = vsel %vm1805_vm6, %v1414_v41, %v1997_v2 }
 0x271   : > { %v3534_v48 = vpack.c.bf16 %v2189_v62, %v2189_v62 }
 0x273   : > { %v3798_v59 = vunpack.c.l.b16 %v3534_v48  ;;  %v1416_v20 = vpop.f32.mrf.mxu0  ;;  %v7584_v50 = vpop.f32.mrf.mxu1  ;;  %v6926_v48 = vld [vmem:[%s9389_s3 + $0x38] sm:$0xff] }
 0x274   : > { %9518 = vst [vmem:[#allocation45_spill] sm:$0xff] %v7584_v50  ;;  %v1417_v46 = vadd.f32 %v7411_v25, %v1416_v20  ;;  %3966 = vmatpush.bf16.msra.mxu2 %v6926_v48  ;;  %6957 = vmatpush.bf16.msrb.mxu3 %v6926_v48  ;;  %v2385_v20 = vadd.s32 496, %v7093_v26  ;;  %v6874_v50 = vld [vmem:[%s7054_s11 + $0x1a0] sm:$0xff] }
 0x275   : > { %v7587_v19 = vpack.c.b16 %v3798_v59, %v3797_v24  ;;  %v6925_v24 = vld [vmem:[%s9389_s3 + $0x30] sm:$0xff] }
 0x276   : > { %vm1806_vm7 = vcmp.ge.f32.partialorder %v1417_v46, 0.0  ;;  %v1998_v39 = vmul.f32 0.2, %v1417_v46  ;;  %6477 = vmatmul.msk.bf16.gmra.mxu0 %vm961_vm2, %v6860_v31  ;;  %6653 = vmatmul.msk.bf16.gmra.mxu1 %vm3913_vm8, %v9519_v8 }
 0x278   : > { %v2190_v15 = vsel %vm1806_vm7, %v1417_v46, %v1998_v39  ;;  %3967 = vmatpush.bf16.msra.mxu2 %v6925_v24  ;;  %6958 = vmatpush.bf16.msrb.mxu3 %v6925_v24  ;;  %v6861_v46 = vld [vmem:[%s7054_s11 + $0x138] sm:$0xff] }
 0x279   : > { %v3343_v2 = vsel %vm2959_vm9, 0.0, %v2190_v15 }
 0x27a   : > { %v3535_v62 = vpack.c.bf16 %v3343_v2, %v3343_v2 }
 0x27b   : > { %v1418_v41 = vpop.f32.mrf.mxu0  ;;  %v7600_v31 = vpop.f32.mrf.mxu1 }
 0x27c   : > { %9520 = vst [vmem:[#allocation46_spill] sm:$0xff] %v7600_v31  ;;  %v1419_v9 = vadd.f32 %v7411_v25, %v1418_v41  ;;  %3968 = vmatpush.bf16.msra.mxu2 %v6924_v54  ;;  %6959 = vmatpush.bf16.msrb.mxu3 %v6924_v54  ;;  %v7611_v39 = vunpack.c.l.b16 %v3535_v62  ;;  %v2769_v41 = vand.u32 15, %v2385_v20 }
 0x27e   : > { %vm1807_vm10 = vcmp.ge.f32.partialorder %v1419_v9, 0.0  ;;  %v1999_v63 = vmul.f32 0.2, %v1419_v9  ;;  %vm2961_vm12 = vcmp.eq.s32.totalorder %v2769_v41, 0  ;;  %v6863_v41 = vld [vmem:[%s7054_s11 + $0x148] sm:$0xff] }
 0x280   : > { %v2191_v35 = vsel %vm1807_vm10, %v1419_v9, %v1999_v63  ;;  %3969 = vmatpush.bf16.msra.mxu2 %v6923_v21  ;;  %6960 = vmatpush.bf16.msrb.mxu3 %v6923_v21  ;;  %v9522_v9 = vpack.c.b16 %v7431_v29, %v7429_v13  ;;  %v9396_v63 = vmov 0  }
 0x281   : > { %v3536_v59 = vpack.c.bf16 %v2191_v35, %v2191_v35  ;;  %6974 = vset.pattern.permute.xlu0 %v9396_v63 }
 0x283   : > { %v7613_v8 = vunpack.c.l.b16 %v3536_v59  ;;  %v1421_v48 = vpop.f32.mrf.mxu0  ;;  %v7615_v15 = vpop.f32.mrf.mxu1  ;;  %3970 = vmatmul.bf16.vlgmr.msra.gmra.mxu2 %v9396_v63 }
 0x284   : > { %9521 = vst [vmem:[#allocation47_spill] sm:$0xff] %v7615_v15  ;;  %v1422_v24 = vadd.f32 %v7411_v25, %v1421_v48  ;;  %v6862_v48 = vld [vmem:[%s7054_s11 + $0x140] sm:$0xff] }
 0x286   : > { %vm1808_vm11 = vcmp.ge.f32.partialorder %v1422_v24, 0.0  ;;  %v2000_v2 = vmul.f32 0.2, %v1422_v24  ;;  %6478 = vmatmul.msk.bf16.gmra.mxu0 %vm961_vm2, %v6861_v46  ;;  %6654 = vmatmul.msk.bf16.gmra.mxu1 %vm3913_vm8, %v9522_v9 }
 0x288   : > { %v2192_v54 = vsel %vm1808_vm11, %v1422_v24, %v2000_v2  ;;  %v9525_v2 = vpack.c.b16 %v7465_v22, %v7463_v45 }
 0x289   : > { %v3345_v59 = vsel %vm2961_vm12, 0.0, %v2192_v54 }
 0x28a   : > { %v3537_v21 = vpack.c.bf16 %v3345_v59, %v3345_v59 }
 0x28b   : > { %v1423_v62 = vpop.f32.mrf.mxu0  ;;  %v7627_v35 = vpop.f32.mrf.mxu1 }
 0x28c   : > { %9523 = vst [vmem:[#allocation48_spill] sm:$0xff] %v7627_v35  ;;  %v1424_v20 = vadd.f32 %v7411_v25, %v1423_v62  ;;  %v7631_v9 = vunpack.c.l.b16 %v3537_v21 }
 0x28e   : > { %vm1809_vm13 = vcmp.ge.f32.partialorder %v1424_v20, 0.0  ;;  %v2001_v46 = vmul.f32 0.2, %v1424_v20 }
 0x290   : > { %v2193_v13 = vsel %vm1809_vm13, %v1424_v20, %v2001_v46 }
 0x291   : > { %v3538_v29 = vpack.c.bf16 %v2193_v13, %v2193_v13 }
 0x293   : > { %v7633_v26 = vunpack.c.l.b16 %v3538_v29  ;;  %v1426_v15 = vpop.f32.mrf.mxu0  ;;  %v7635_v63 = vpop.f32.mrf.mxu1 }
 0x294   : > { %9524 = vst [vmem:[#allocation49_spill] sm:$0xff] %v7635_v63  ;;  %v1427_v24 = vadd.f32 %v7411_v25, %v1426_v15 }
 0x296   : > { %6479 = vmatmul.msk.bf16.gmra.mxu0 %vm961_vm2, %v6862_v48  ;;  %6655 = vmatmul.msk.bf16.gmra.mxu1 %vm3913_vm8, %v9525_v2  ;;  %v2002_v54 = vmul.f32 0.2, %v1427_v24  ;;  %vm1810_vm14 = vcmp.ge.f32.partialorder %v1427_v24, 0.0 }
 0x298   : > { %v2194_v20 = vsel %vm1810_vm14, %v1427_v24, %v2002_v54  ;;  %v9528_v54 = vpack.c.b16 %v7499_v18, %v7497_v55 }
 0x299   : > { %v3539_v21 = vpack.c.bf16 %v2194_v20, %v2194_v20 }
 0x29b   : > { %v1428_v62 = vpop.f32.mrf.mxu0  ;;  %v7645_v59 = vpop.f32.mrf.mxu1  ;;  %v7649_v48 = vunpack.c.l.b16 %v3539_v21 }
 0x29c   : > { %9526 = vst [vmem:[#allocation50_spill] sm:$0xff] %v7645_v59  ;;  %v1429_v46 = vadd.f32 %v7411_v25, %v1428_v62 }
 0x29e   : > { %vm1811_vm15 = vcmp.ge.f32.partialorder %v1429_v46, 0.0  ;;  %v2003_v15 = vmul.f32 0.2, %v1429_v46 }
 0x2a0   : > { %v2195_v13 = vsel %vm1811_vm15, %v1429_v46, %v2003_v15 }
 0x2a1   : > { %v3540_v29 = vpack.c.bf16 %v2195_v13, %v2195_v13 }
 0x2a3   : > { %v7651_v63 = vunpack.c.l.b16 %v3540_v29  ;;  %v1431_v45 = vpop.f32.mrf.mxu0  ;;  %v7653_v22 = vpop.f32.mrf.mxu1 }
 0x2a4   : > { %9527 = vst [vmem:[#allocation51_spill] sm:$0xff] %v7653_v22  ;;  %v1432_v2 = vadd.f32 %v7411_v25, %v1431_v45  ;;  %v6864_v22 = vld [vmem:[%s7054_s11 + $0x150] sm:$0xff] }
 0x2a6   : > { %6480 = vmatmul.msk.bf16.gmra.mxu0 %vm961_vm2, %v6863_v41  ;;  %6656 = vmatmul.msk.bf16.gmra.mxu1 %vm3913_vm8, %v9528_v54  ;;  %v2004_v62 = vmul.f32 0.2, %v1432_v2  ;;  %vm1812_vm0 = vcmp.ge.f32.partialorder %v1432_v2, 0.0 }
 0x2a8   : > { %v2196_v15 = vsel %vm1812_vm0, %v1432_v2, %v2004_v62  ;;  %v6946_v2 = vld [vmem:[%s9389_s3 + $0xd8] sm:$0xff]  ;;  %v9532_v62 = vpack.c.b16 %v7533_v14, %v7531_v34  ;;  %v6944_v34 = vld [vmem:[%s9389_s3 + $0xc8] sm:$0xff] }
 0x2a9   : > { %v3541_v29 = vpack.c.bf16 %v2196_v15, %v2196_v15  ;;  %5329 = vmatpush.bf16.msra.mxu1 %v6946_v2 }
 0x2ab   : > { %v1433_v20 = vpop.f32.mrf.mxu0  ;;  %v7663_v46 = vpop.f32.mrf.mxu1  ;;  %v3844_v41 = vunpack.c.l.b16 %v3541_v29 }
 0x2ac   : > { %9529 = vst [vmem:[#allocation52_spill] sm:$0xff] %v7663_v46  ;;  %v1434_v21 = vadd.f32 %v7411_v25, %v1433_v20 }
 0x2ae   : > { %vm1813_vm1 = vcmp.ge.f32.partialorder %v1434_v21, 0.0  ;;  %v2005_v13 = vmul.f32 0.2, %v1434_v21 }
 0x2b0   : > { %v2197_v45 = vsel %vm1813_vm1, %v1434_v21, %v2005_v13 }
 0x2b1   : > { %v3542_v24 = vpack.c.bf16 %v2197_v45, %v2197_v45  ;;  %v6943_v45 = vld [vmem:[%s9389_s3 + $0xc0] sm:$0xff] }
 0x2b3   : > { %v1436_v59 = vpop.f32.mrf.mxu0  ;;  %v3845_v35 = vunpack.c.l.b16 %v3542_v24  ;;  %v7668_v18 = vpop.f32.mrf.mxu1 }
 0x2b4   : > { %v1437_v55 = vadd.f32 %v7411_v25, %v1436_v59  ;;  %9530 = vst [vmem:[#allocation53_spill] sm:$0xff] %v7668_v18 }
 0x2b5   : > { %v7670_v54 = vpack.c.b16 %v3845_v35, %v3844_v41  ;;  %v6945_v35 = vld [vmem:[%s9389_s3 + $0xd0] sm:$0xff]  ;;  %v6865_v41 = vld [vmem:[%s7054_s11 + $0x158] sm:$0xff] }
 0x2b6   : > { %6481 = vmatmul.msk.bf16.gmra.mxu0 %vm961_vm2, %v6864_v22  ;;  %6657 = vmatmul.msk.bf16.gmra.mxu1 %vm3913_vm8, %v9532_v62  ;;  %v2006_v59 = vmul.f32 0.2, %v1437_v55  ;;  %vm1814_vm3 = vcmp.ge.f32.partialorder %v1437_v55, 0.0 }
 0x2b7   : > { %9531 = vst [vmem:[#allocation54_spill] sm:$0xff] %v7670_v54  ;;  %6551 = vmatmul.msk.bf16.gmra.mxu2 %vm3913_vm8, %v7670_v54  ;;  %5330 = vmatpush.bf16.msra.mxu1 %v6945_v35 }
 0x2b8   : > { %v2198_v20 = vsel %vm1814_vm3, %v1437_v55, %v2006_v59 }
 0x2b9   : > { %v3543_v21 = vpack.c.bf16 %v2198_v20, %v2198_v20 }
 0x2bb   : > { %v1438_v24 = vpop.f32.mrf.mxu0  ;;  %v7689_v15 = vpop.f32.mrf.mxu1  ;;  %5331 = vmatpush.bf16.msra.mxu1 %v6944_v34  ;;  %v7695_v55 = vunpack.c.l.b16 %v3543_v21 }
 0x2bc   : > { %v1439_v22 = vadd.f32 %v7411_v25, %v1438_v24  ;;  %9533 = vst [vmem:[#allocation55_spill] sm:$0xff] %v7689_v15  ;;  %v9534_v24 = vpack.c.b16 %v7567_v53, %v7565_v17 }
 0x2be   : > { %vm1815_vm4 = vcmp.ge.f32.partialorder %v1439_v22, 0.0  ;;  %v2007_v14 = vmul.f32 0.2, %v1439_v22 }
 0x2bf   : > { %5332 = vmatpush.bf16.msra.mxu1 %v6943_v45 }
 0x2c0   : > { %v2199_v13 = vsel %vm1815_vm4, %v1439_v22, %v2007_v14 }
 0x2c1   : > { %v3544_v29 = vpack.c.bf16 %v2199_v13, %v2199_v13 }
 0x2c3   : > { %v7697_v2 = vunpack.c.l.b16 %v3544_v29  ;;  %v1441_v62 = vpop.f32.mrf.mxu0  ;;  %v7707_v22 = vpop.f32.mrf.mxu1 }
 0x2c4   : > { %v1442_v59 = vadd.f32 %v7411_v25, %v1441_v62  ;;  %9535 = vst [vmem:[#allocation56_spill] sm:$0xff] %v7707_v22 }
 0x2c6   : > { %6482 = vmatmul.msk.bf16.gmra.mxu0 %vm961_vm2, %v6865_v41  ;;  %6658 = vmatmul.msk.bf16.gmra.mxu1 %vm3913_vm8, %v9534_v24  ;;  %v2008_v20 = vmul.f32 0.2, %v1442_v59  ;;  %vm1816_vm5 = vcmp.ge.f32.partialorder %v1442_v59, 0.0  ;;  %v6866_v41 = vld [vmem:[%s7054_s11 + $0x160] sm:$0xff] }
 0x2c8   : > { %v2200_v14 = vsel %vm1816_vm5, %v1442_v59, %v2008_v20  ;;  %v9538_v59 = vpack.c.b16 %v7613_v8, %v7611_v39 }
 0x2c9   : > { %v3545_v29 = vpack.c.bf16 %v2200_v14, %v2200_v14 }
 0x2cb   : > { %v1443_v34 = vpop.f32.mrf.mxu0  ;;  %v7710_v35 = vpop.f32.mrf.mxu1  ;;  %v3846_v54 = vunpack.c.l.b16 %v3545_v29 }
 0x2cc   : > { %v1444_v21 = vadd.f32 %v7411_v25, %v1443_v34  ;;  %9536 = vst [vmem:[#allocation57_spill] sm:$0xff] %v7710_v35 }
 0x2ce   : > { %vm1817_vm6 = vcmp.ge.f32.partialorder %v1444_v21, 0.0  ;;  %v2009_v13 = vmul.f32 0.2, %v1444_v21 }
 0x2d0   : > { %v2201_v45 = vsel %vm1817_vm6, %v1444_v21, %v2009_v13 }
 0x2d1   : > { %v3546_v62 = vpack.c.bf16 %v2201_v45, %v2201_v45 }
 0x2d3   : > { %v1446_v17 = vpop.f32.mrf.mxu0  ;;  %v3847_v53 = vunpack.c.l.b16 %v3546_v62  ;;  %v7723_v21 = vpop.f32.mrf.mxu1 }
 0x2d4   : > { %v1447_v24 = vadd.f32 %v7411_v25, %v1446_v17  ;;  %9539 = vst [vmem:[#allocation59_spill] sm:$0xff] %v7723_v21 }
 0x2d5   : > { %v7714_v22 = vpack.c.b16 %v3847_v53, %v3846_v54 }
 0x2d6   : > { %6483 = vmatmul.msk.bf16.gmra.mxu0 %vm961_vm2, %v6866_v41  ;;  %6659 = vmatmul.msk.bf16.gmra.mxu1 %vm3913_vm8, %v9538_v59  ;;  %v2010_v20 = vmul.f32 0.2, %v1447_v24  ;;  %vm1818_vm7 = vcmp.ge.f32.partialorder %v1447_v24, 0.0  ;;  %v6867_v41 = vld [vmem:[%s7054_s11 + $0x168] sm:$0xff] }
 0x2d7   : > { %9537 = vst [vmem:[#allocation58_spill] sm:$0xff] %v7714_v22  ;;  %6552 = vmatmul.msk.bf16.gmra.mxu2 %vm3913_vm8, %v7714_v22 }
 0x2d8   : > { %v2202_v14 = vsel %vm1818_vm7, %v1447_v24, %v2010_v20  ;;  %v6868_v24 = vld [vmem:[%s7054_s11 + $0x170] sm:$0xff] }
 0x2d9   : > { %v3547_v29 = vpack.c.bf16 %v2202_v14, %v2202_v14 }
 0x2db   : > { %v1448_v34 = vpop.f32.mrf.mxu0  ;;  %v7727_v39 = vunpack.c.l.b16 %v3547_v29  ;;  %v7734_v59 = vpop.f32.mrf.mxu1 }
 0x2dc   : > { %v1449_v13 = vadd.f32 %v7411_v25, %v1448_v34  ;;  %9540 = vst [vmem:[#allocation60_spill] sm:$0xff] %v7734_v59 }
 0x2de   : > { %vm1819_vm9 = vcmp.ge.f32.partialorder %v1449_v13, 0.0  ;;  %v2011_v54 = vmul.f32 0.2, %v1449_v13 }
 0x2e0   : > { %v2203_v45 = vsel %vm1819_vm9, %v1449_v13, %v2011_v54 }
 0x2e1   : > { %v3548_v62 = vpack.c.bf16 %v2203_v45, %v2203_v45 }
 0x2e3   : > { %v7729_v8 = vunpack.c.l.b16 %v3548_v62  ;;  %v1451_v17 = vpop.f32.mrf.mxu0  ;;  %v7740_v45 = vpop.f32.mrf.mxu1 }
 0x2e4   : > { %v1452_v53 = vadd.f32 %v7411_v25, %v1451_v17  ;;  %9541 = vst [vmem:[#allocation61_spill] sm:$0xff] %v7740_v45 }
 0x2e6   : > { %6484 = vmatmul.msk.bf16.gmra.mxu0 %vm961_vm2, %v6867_v41  ;;  %6740 = vmatmul.msk.bf16.vlgmr.msra.gmra.mxu1 %vm3913_vm8, %v7129_v7  ;;  %v2012_v20 = vmul.f32 0.2, %v1452_v53  ;;  %vm1820_vm10 = vcmp.ge.f32.partialorder %v1452_v53, 0.0 }
 0x2e8   : > { %v2204_v14 = vsel %vm1820_vm10, %v1452_v53, %v2012_v20 }
 0x2e9   : > { %v3549_v29 = vpack.c.bf16 %v2204_v14, %v2204_v14 }
 0x2eb   : > { %v1453_v34 = vpop.f32.mrf.mxu0  ;;  %v3848_v22 = vunpack.c.l.b16 %v3549_v29  ;;  %v7751_v20 = vpop.f32.mrf.mxu1 }
 0x2ec   : > { %v1454_v13 = vadd.f32 %v7411_v25, %v1453_v34  ;;  %9543 = vst [vmem:[#allocation63_spill] sm:$0xff] %v7751_v20 }
 0x2ee   : > { %vm1821_vm11 = vcmp.ge.f32.partialorder %v1454_v13, 0.0  ;;  %v2013_v54 = vmul.f32 0.2, %v1454_v13 }
 0x2f0   : > { %v2205_v62 = vsel %vm1821_vm11, %v1454_v13, %v2013_v54 }
 0x2f1   : > { %v3550_v17 = vpack.c.bf16 %v2205_v62, %v2205_v62 }
 0x2f3   : > { %v1456_v59 = vpop.f32.mrf.mxu0  ;;  %v3849_v41 = vunpack.c.l.b16 %v3550_v17 }
 0x2f4   : > { %v1457_v21 = vadd.f32 %v7411_v25, %v1456_v59 }
 0x2f5   : > { %v7744_v35 = vpack.c.b16 %v3849_v41, %v3848_v22 }
 0x2f6   : > { %6485 = vmatmul.msk.bf16.gmra.mxu0 %vm961_vm2, %v6868_v24  ;;  %6741 = vmatmul.msk.bf16.gmra.mxu1 %vm3913_vm8, %v7163_v4  ;;  %v2014_v53 = vmul.f32 0.2, %v1457_v21  ;;  %vm1822_vm12 = vcmp.ge.f32.partialorder %v1457_v21, 0.0  ;;  %v6869_v24 = vld [vmem:[%s7054_s11 + $0x178] sm:$0xff] }
 0x2f7   : > { %9542 = vst [vmem:[#allocation62_spill] sm:$0xff] %v7744_v35  ;;  %6553 = vmatmul.msk.bf16.gmra.mxu2 %vm3913_vm8, %v7744_v35  ;;  %v7759_v35 = vpop.f32.mrf.mxu1 }
 0x2f8   : > { %v2206_v14 = vsel %vm1822_vm12, %v1457_v21, %v2014_v53  ;;  %9544 = vst [vmem:[#allocation64_spill] sm:$0xff] %v7759_v35  ;;  %v6870_v35 = vld [vmem:[%s7054_s11 + $0x180] sm:$0xff] }
 0x2f9   : > { %v3551_v22 = vpack.c.bf16 %v2206_v14, %v2206_v14 }
 0x2fb   : > { %v1458_v34 = vpop.f32.mrf.mxu0  ;;  %v7755_v62 = vunpack.c.l.b16 %v3551_v22 }
 0x2fc   : > { %v1459_v13 = vadd.f32 %v7411_v25, %v1458_v34 }
 0x2fe   : > { %vm1823_vm13 = vcmp.ge.f32.partialorder %v1459_v13, 0.0  ;;  %v2015_v59 = vmul.f32 0.2, %v1459_v13 }
 0x300   : > { %v2207_v54 = vsel %vm1823_vm13, %v1459_v13, %v2015_v59  ;;  %v7768_v59 = vpop.f32.mrf.mxu1 }
 0x301   : > { %v3552_v29 = vpack.c.bf16 %v2207_v54, %v2207_v54  ;;  %9545 = vst [vmem:[#allocation65_spill] sm:$0xff] %v7768_v59 }
 0x303   : > { %v7757_v17 = vunpack.c.l.b16 %v3552_v29  ;;  %v1461_v41 = vpop.f32.mrf.mxu0 }
 0x304   : > { %v1462_v20 = vadd.f32 %v7411_v25, %v1461_v41 }
 0x306   : > { %6486 = vmatmul.msk.bf16.gmra.mxu0 %vm961_vm2, %v6869_v24  ;;  %6742 = vmatmul.msk.bf16.gmra.mxu1 %vm3913_vm8, %v7193_v60  ;;  %v2016_v53 = vmul.f32 0.2, %v1462_v20  ;;  %vm1824_vm14 = vcmp.ge.f32.partialorder %v1462_v20, 0.0 }
 0x308   : > { %v2208_v14 = vsel %vm1824_vm14, %v1462_v20, %v2016_v53  ;;  %v7779_v20 = vpop.f32.mrf.mxu1 }
 0x309   : > { %v3553_v54 = vpack.c.bf16 %v2208_v14, %v2208_v14  ;;  %9547 = vst [vmem:[#allocation67_spill] sm:$0xff] %v7779_v20 }
 0x30b   : > { %v1463_v34 = vpop.f32.mrf.mxu0  ;;  %v3850_v21 = vunpack.c.l.b16 %v3553_v54 }
 0x30c   : > { %v1464_v13 = vadd.f32 %v7411_v25, %v1463_v34 }
 0x30e   : > { %vm1825_vm15 = vcmp.ge.f32.partialorder %v1464_v13, 0.0  ;;  %v2017_v22 = vmul.f32 0.2, %v1464_v13 }
 0x310   : > { %v2209_v29 = vsel %vm1825_vm15, %v1464_v13, %v2017_v22 }
 0x311   : > { %v3554_v41 = vpack.c.bf16 %v2209_v29, %v2209_v29  ;;  %v6871_v29 = vld [vmem:[%s7054_s11 + $0x188] sm:$0xff] }
 0x313   : > { %v1466_v45 = vpop.f32.mrf.mxu0  ;;  %v3851_v24 = vunpack.c.l.b16 %v3554_v41 }
 0x314   : > { %v1467_v15 = vadd.f32 %v7411_v25, %v1466_v45 }
 0x315   : > { %v7772_v18 = vpack.c.b16 %v3851_v24, %v3850_v21 }
 0x316   : > { %6487 = vmatmul.msk.bf16.gmra.mxu0 %vm961_vm2, %v6870_v35  ;;  %6743 = vmatmul.msk.bf16.gmra.mxu1 %vm3913_vm8, %v7223_v6  ;;  %v2018_v53 = vmul.f32 0.2, %v1467_v15  ;;  %vm1826_vm0 = vcmp.ge.f32.partialorder %v1467_v15, 0.0  ;;  %v7782_v35 = vpop.f32.mrf.mxu1 }
 0x317   : > { %9546 = vst [vmem:[#allocation66_spill] sm:$0xff] %v7772_v18  ;;  %6554 = vmatmul.msk.bf16.gmra.mxu2 %vm3913_vm8, %v7772_v18 }
 0x318   : > { %v2210_v14 = vsel %vm1826_vm0, %v1467_v15, %v2018_v53  ;;  %9548 = vst [vmem:[#allocation68_spill] sm:$0xff] %v7782_v35 }
 0x319   : > { %v3555_v21 = vpack.c.bf16 %v2210_v14, %v2210_v14 }
 0x31b   : > { %v1468_v34 = vpop.f32.mrf.mxu0  ;;  %v7785_v41 = vunpack.c.l.b16 %v3555_v21 }
 0x31c   : > { %v1469_v13 = vadd.f32 %v7411_v25, %v1468_v34 }
 0x31d   : > { %9549 = vst [vmem:[#allocation69_spill] sm:$0xff] %v7785_v41 }
 0x31e   : > { %vm1827_vm1 = vcmp.ge.f32.partialorder %v1469_v13, 0.0  ;;  %v2019_v45 = vmul.f32 0.2, %v1469_v13  ;;  %v7795_v14 = vpop.f32.mrf.mxu1 }
 0x31f   : > { %9551 = vst [vmem:[#allocation71_spill] sm:$0xff] %v7795_v14 }
 0x320   : > { %v2211_v22 = vsel %vm1827_vm1, %v1469_v13, %v2019_v45  ;;  %v7800_v45 = vld [vmem:[%s9388_s2] ss:$0 sm:$0xff] }
 0x321   : > { %v3556_v54 = vpack.c.bf16 %v2211_v22, %v2211_v22 }
 0x323   : > { %v7787_v24 = vunpack.c.l.b16 %v3556_v54  ;;  %v1471_v18 = vpop.f32.mrf.mxu0 }
 0x324   : > { %v1472_v20 = vadd.f32 %v7411_v25, %v1471_v18 }
 0x325   : > { %9550 = vst [vmem:[#allocation70_spill] sm:$0xff] %v7787_v24 }
 0x326   : > { %6488 = vmatmul.msk.bf16.gmra.mxu0 %vm961_vm2, %v6871_v29  ;;  %6744 = vmatmul.msk.bf16.gmra.mxu1 %vm3913_vm8, %v7253_v37  ;;  %v2020_v53 = vmul.f32 0.2, %v1472_v20  ;;  %vm1828_vm3 = vcmp.ge.f32.partialorder %v1472_v20, 0.0  ;;  %v6872_v29 = vld [vmem:[%s7054_s11 + $0x190] sm:$0xff] }
 0x328   : > { %v2212_v13 = vsel %vm1828_vm3, %v1472_v20, %v2020_v53  ;;  %v7807_v20 = vpop.f32.mrf.mxu1 }
 0x329   : > { %v3557_v21 = vpack.c.bf16 %v2212_v13, %v2212_v13  ;;  %9553 = vst [vmem:[#allocation73_spill] sm:$0xff] %v7807_v20 }
 0x32b   : > { %v1473_v34 = vpop.f32.mrf.mxu0  ;;  %v3852_v15 = vunpack.c.l.b16 %v3557_v21 }
 0x32c   : > { %v1474_v25 = vadd.f32 %v7800_v45, %v1473_v34 }
 0x32e   : > { %vm1829_vm4 = vcmp.ge.f32.partialorder %v1474_v25, 0.0  ;;  %v2021_v18 = vmul.f32 0.2, %v1474_v25 }
 0x330   : > { %v2213_v22 = vsel %vm1829_vm4, %v1474_v25, %v2021_v18 }
 0x331   : > { %v3558_v54 = vpack.c.bf16 %v2213_v22, %v2213_v22  ;;  %v6873_v22 = vld [vmem:[%s7054_s11 + $0x198] sm:$0xff] }
 0x333   : > { %v1476_v35 = vpop.f32.mrf.mxu0  ;;  %v3853_v59 = vunpack.c.l.b16 %v3558_v54 }
 0x334   : > { %v1477_v46 = vadd.f32 %v7800_v45, %v1476_v35 }
 0x335   : > { %v7805_v14 = vpack.c.b16 %v3853_v59, %v3852_v15  ;;  %v7815_v15 = vpop.f32.mrf.mxu1 }
 0x336   : > { %6489 = vmatmul.msk.bf16.gmra.mxu0 %vm961_vm2, %v6872_v29  ;;  %6745 = vmatmul.msk.bf16.gmra.mxu1 %vm3913_vm8, %v7283_v44  ;;  %v2022_v53 = vmul.f32 0.2, %v1477_v46  ;;  %vm1830_vm5 = vcmp.ge.f32.partialorder %v1477_v46, 0.0  ;;  %9554 = vst [vmem:[#allocation74_spill] sm:$0xff] %v7815_v15 }
 0x337   : > { %9552 = vst [vmem:[#allocation72_spill] sm:$0xff] %v7805_v14  ;;  %6555 = vmatmul.msk.bf16.gmra.mxu2 %vm3913_vm8, %v7805_v14 }
 0x338   : > { %v2214_v13 = vsel %vm1830_vm5, %v1477_v46, %v2022_v53  ;;  %v1572_v53 = vadd.f32 %v7800_v45, %v7097_v30 }
 0x339   : > { %v3559_v35 = vpack.c.bf16 %v2214_v13, %v2214_v13 }
 0x33a   : > { %vm1868_vm9 = vcmp.ge.f32.partialorder %v1572_v53, 0.0 }
 0x33b   : > { %v1478_v34 = vpop.f32.mrf.mxu0  ;;  %v7818_v54 = vunpack.c.l.b16 %v3559_v35 }
 0x33c   : > { %v1479_v25 = vadd.f32 %v7800_v45, %v1478_v34 }
 0x33d   : > { %9555 = vst [vmem:[#allocation75_spill] sm:$0xff] %v7818_v54  ;;  %v7830_v13 = vpop.f32.mrf.mxu1 }
 0x33e   : > { %vm1831_vm6 = vcmp.ge.f32.partialorder %v1479_v25, 0.0  ;;  %v2023_v59 = vmul.f32 0.2, %v1479_v25  ;;  %9557 = vst [vmem:[#allocation77_spill] sm:$0xff] %v7830_v13 }
 0x340   : > { %v2215_v18 = vsel %vm1831_vm6, %v1479_v25, %v2023_v59  ;;  %v2060_v59 = vmul.f32 0.2, %v1572_v53 }
 0x341   : > { %v3560_v21 = vpack.c.bf16 %v2215_v18, %v2215_v18 }
 0x342   : > { %v2252_v46 = vsel %vm1868_vm9, %v1572_v53, %v2060_v59 }
 0x343   : > { %v7820_v29 = vunpack.c.l.b16 %v3560_v21  ;;  %v1481_v20 = vpop.f32.mrf.mxu0  ;;  %v3597_v47 = vpack.c.bf16 %v2252_v46, %v2252_v46 }
 0x344   : > { %v1482_v14 = vadd.f32 %v7800_v45, %v1481_v20  ;;  %v1574_v20 = vadd.f32 %v7800_v45, %v7103_v36 }
 0x345   : > { %9556 = vst [vmem:[#allocation76_spill] sm:$0xff] %v7820_v29  ;;  %v7836_v24 = vpop.f32.mrf.mxu1  ;;  %v3872_v53 = vunpack.c.l.b16 %v3597_v47 }
 0x346   : > { %6490 = vmatmul.msk.bf16.gmra.mxu0 %vm961_vm2, %v6873_v22  ;;  %6746 = vmatmul.msk.bf16.gmra.mxu1 %vm3913_vm8, %v7313_v1  ;;  %v2024_v34 = vmul.f32 0.2, %v1482_v14  ;;  %vm1832_vm7 = vcmp.ge.f32.partialorder %v1482_v14, 0.0  ;;  %v2061_v15 = vmul.f32 0.2, %v1574_v20  ;;  %vm1869_vm11 = vcmp.ge.f32.partialorder %v1574_v20, 0.0 }
 0x347   : > { %9558 = vst [vmem:[#allocation78_spill] sm:$0xff] %v7836_v24 }
 0x348   : > { %v2216_v35 = vsel %vm1832_vm7, %v1482_v14, %v2024_v34  ;;  %v2253_v41 = vsel %vm1869_vm11, %v1574_v20, %v2061_v15  ;;  %v1579_v15 = vadd.f32 %v7800_v45, %v7120_v56 }
 0x349   : > { %v3561_v22 = vpack.c.bf16 %v2216_v35, %v2216_v35  ;;  %v3598_v46 = vpack.c.bf16 %v2253_v41, %v2253_v41 }
 0x34a   : > { %vm1871_vm14 = vcmp.ge.f32.partialorder %v1579_v15, 0.0 }
 0x34b   : > { %v1483_v25 = vpop.f32.mrf.mxu0  ;;  %v3854_v13 = vunpack.c.l.b16 %v3561_v22  ;;  %v6875_v22 = vld [vmem:[%s7054_s11 + $0x1a8] sm:$0xff] }
 0x34c   : > { %v1484_v18 = vadd.f32 %v7800_v45, %v1483_v25  ;;  %v2063_v25 = vmul.f32 0.2, %v1579_v15 }
 0x34d   : > { %v7853_v41 = vpop.f32.mrf.mxu1 }
 0x34e   : > { %vm1833_vm10 = vcmp.ge.f32.partialorder %v1484_v18, 0.0  ;;  %v2025_v21 = vmul.f32 0.2, %v1484_v18  ;;  %9561 = vst [vmem:[#allocation81_spill] sm:$0xff] %v7853_v41  ;;  %v2255_v35 = vsel %vm1871_vm14, %v1579_v15, %v2063_v25  ;;  %v1584_v25 = vadd.f32 %v7800_v45, %v7133_v12 }
 0x350   : > { %v2217_v30 = vsel %vm1833_vm10, %v1484_v18, %v2025_v21  ;;  %vm1873_vm3 = vcmp.ge.f32.partialorder %v1584_v25, 0.0 }
 0x351   : > { %v3562_v31 = vpack.c.bf16 %v2217_v30, %v2217_v30 }
 0x353   : > { %v1486_v54 = vpop.f32.mrf.mxu0  ;;  %v3855_v29 = vunpack.c.l.b16 %v3562_v31  ;;  %v1577_v31 = vadd.f32 %v7800_v45, %v7113_v49 }
 0x354   : > { %v1487_v36 = vadd.f32 %v7800_v45, %v1486_v54  ;;  %v3873_v54 = vunpack.c.l.b16 %v3598_v46 }
 0x355   : > { %v7839_v14 = vpack.c.b16 %v3855_v29, %v3854_v13  ;;  %v2062_v13 = vmul.f32 0.2, %v1577_v31  ;;  %vm1870_vm13 = vcmp.ge.f32.partialorder %v1577_v31, 0.0 }
 0x356   : > { %6491 = vmatmul.msk.bf16.gmra.mxu0 %vm961_vm2, %v6874_v50  ;;  %6747 = vmatmul.msk.bf16.gmra.mxu1 %vm3913_vm8, %v7343_v11  ;;  %v2026_v34 = vmul.f32 0.2, %v1487_v36  ;;  %vm1834_vm12 = vcmp.ge.f32.partialorder %v1487_v36, 0.0  ;;  %v7850_v50 = vpack.c.b16 %v3873_v54, %v3872_v53  ;;  %v3600_v53 = vpack.c.bf16 %v2255_v35, %v2255_v35 }
 0x357   : > { %9559 = vst [vmem:[#allocation79_spill] sm:$0xff] %v7839_v14  ;;  %6556 = vmatmul.msk.bf16.gmra.mxu2 %vm3913_vm8, %v7839_v14  ;;  %v2254_v56 = vsel %vm1870_vm13, %v1577_v31, %v2062_v13  ;;  %v1582_v13 = vadd.f32 %v7800_v45, %v7126_v5  ;;  %v2065_v35 = vmul.f32 0.2, %v1584_v25 }
 0x358   : > { %9560 = vst [vmem:[#allocation80_spill] sm:$0xff] %v7850_v50  ;;  %v2218_v47 = vsel %vm1834_vm12, %v1487_v36, %v2026_v34  ;;  %v3599_v30 = vpack.c.bf16 %v2254_v56, %v2254_v56  ;;  %v7868_v15 = vunpack.c.l.b16 %v3600_v53 }
 0x359   : > { %v3563_v20 = vpack.c.bf16 %v2218_v47, %v2218_v47  ;;  %v7874_v47 = vpop.f32.mrf.mxu1  ;;  %v2064_v56 = vmul.f32 0.2, %v1582_v13  ;;  %vm1872_vm1 = vcmp.ge.f32.partialorder %v1582_v13, 0.0 }
 0x35a   : > { %v7866_v31 = vunpack.c.l.b16 %v3599_v30  ;;  %9565 = vst [vmem:[#allocation85_spill] sm:$0xff] %v7868_v15  ;;  %v2257_v30 = vsel %vm1873_vm3, %v1584_v25, %v2065_v35 }
 0x35b   : > { %v1488_v29 = vpop.f32.mrf.mxu0  ;;  %v7856_v46 = vunpack.c.l.b16 %v3563_v20  ;;  %9566 = vst [vmem:[#allocation86_spill] sm:$0xff] %v7874_v47  ;;  %v2256_v12 = vsel %vm1872_vm1, %v1582_v13, %v2064_v56  ;;  %v6876_v47 = vld [vmem:[%s7054_s11 + $0x1b0] sm:$0xff]  ;;  %v3602_v24 = vpack.c.bf16 %v2257_v30, %v2257_v30 }
 0x35c   : > { %v1489_v59 = vadd.f32 %v7800_v45, %v1488_v29  ;;  %9564 = vst [vmem:[#allocation84_spill] sm:$0xff] %v7866_v31  ;;  %v3601_v41 = vpack.c.bf16 %v2256_v12, %v2256_v12 }
 0x35d   : > { %9562 = vst [vmem:[#allocation82_spill] sm:$0xff] %v7856_v46  ;;  %v7890_v25 = vunpack.c.l.b16 %v3602_v24 }
 0x35e   : > { %vm1835_vm15 = vcmp.ge.f32.partialorder %v1489_v59, 0.0  ;;  %v2027_v49 = vmul.f32 0.2, %v1489_v59  ;;  %v7888_v13 = vunpack.c.l.b16 %v3601_v41 }
 0x35f   : > { %9570 = vst [vmem:[#allocation90_spill] sm:$0xff] %v7890_v25 }
 0x360   : > { %v2219_v18 = vsel %vm1835_vm15, %v1489_v59, %v2027_v49  ;;  %9569 = vst [vmem:[#allocation89_spill] sm:$0xff] %v7888_v13  ;;  %v6878_v13 = vld [vmem:[%s7054_s11 + $0x1c0] sm:$0xff] }
 0x361   : > { %v3564_v21 = vpack.c.bf16 %v2219_v18, %v2219_v18  ;;  %v7879_v29 = vpop.f32.mrf.mxu1 }
 0x362   : > { %9567 = vst [vmem:[#allocation87_spill] sm:$0xff] %v7879_v29 }
 0x363   : > { %v7858_v54 = vunpack.c.l.b16 %v3564_v21  ;;  %v1491_v36 = vpop.f32.mrf.mxu0 }
 0x364   : > { %v1492_v34 = vadd.f32 %v7800_v45, %v1491_v36 }
 0x365   : > { %9563 = vst [vmem:[#allocation83_spill] sm:$0xff] %v7858_v54 }
 0x366   : > { %6492 = vmatmul.msk.bf16.gmra.mxu0 %vm961_vm2, %v6875_v22  ;;  %6748 = vmatmul.msk.bf16.gmra.mxu1 %vm3913_vm8, %v7376_v32  ;;  %v2028_v59 = vmul.f32 0.2, %v1492_v34  ;;  %vm1836_vm0 = vcmp.ge.f32.partialorder %v1492_v34, 0.0 }
 0x368   : > { %v2220_v18 = vsel %vm1836_vm0, %v1492_v34, %v2028_v59 }
 0x369   : > { %v3565_v22 = vpack.c.bf16 %v2220_v18, %v2220_v18 }
 0x36b   : > { %v1493_v49 = vpop.f32.mrf.mxu0  ;;  %v3856_v20 = vunpack.c.l.b16 %v3565_v22 }
 0x36c   : > { %v1494_v21 = vadd.f32 %v7800_v45, %v1493_v49 }
 0x36e   : > { %vm1837_vm4 = vcmp.ge.f32.partialorder %v1494_v21, 0.0  ;;  %v2029_v5 = vmul.f32 0.2, %v1494_v21 }
 0x370   : > { %v2221_v53 = vsel %vm1837_vm4, %v1494_v21, %v2029_v5  ;;  %v6877_v21 = vld [vmem:[%s7054_s11 + $0x1b8] sm:$0xff] }
 0x371   : > { %v3566_v36 = vpack.c.bf16 %v2221_v53, %v2221_v53 }
 0x373   : > { %v1496_v14 = vpop.f32.mrf.mxu0  ;;  %v3857_v31 = vunpack.c.l.b16 %v3566_v36 }
 0x374   : > { %v1497_v34 = vadd.f32 %v7800_v45, %v1496_v14 }
 0x375   : > { %v7883_v59 = vpack.c.b16 %v3857_v31, %v3856_v20  ;;  %v7896_v31 = vpop.f32.mrf.mxu1 }
 0x376   : > { %6493 = vmatmul.msk.bf16.gmra.mxu0 %vm961_vm2, %v6876_v47  ;;  %6749 = vmatmul.msk.bf16.gmra.mxu1 %vm3913_vm8, %v7420_v43  ;;  %v2030_v49 = vmul.f32 0.2, %v1497_v34  ;;  %vm1838_vm5 = vcmp.ge.f32.partialorder %v1497_v34, 0.0  ;;  %9571 = vst [vmem:[#allocation91_spill] sm:$0xff] %v7896_v31 }
 0x377   : > { %9568 = vst [vmem:[#allocation88_spill] sm:$0xff] %v7883_v59  ;;  %6557 = vmatmul.msk.bf16.gmra.mxu2 %vm3913_vm8, %v7883_v59 }
 0x378   : > { %v2222_v47 = vsel %vm1838_vm5, %v1497_v34, %v2030_v49  ;;  %v1592_v34 = vadd.f32 %v7800_v45, %v7158_v0 }
 0x379   : > { %v3567_v41 = vpack.c.bf16 %v2222_v47, %v2222_v47 }
 0x37a   : > { %v2068_v47 = vmul.f32 0.2, %v1592_v34  ;;  %vm1876_vm9 = vcmp.ge.f32.partialorder %v1592_v34, 0.0 }
 0x37b   : > { %v1498_v56 = vpop.f32.mrf.mxu0  ;;  %v7900_v5 = vunpack.c.l.b16 %v3567_v41 }
 0x37c   : > { %v1499_v20 = vadd.f32 %v7800_v45, %v1498_v56 }
 0x37d   : > { %9572 = vst [vmem:[#allocation92_spill] sm:$0xff] %v7900_v5  ;;  %v7907_v36 = vpop.f32.mrf.mxu1 }
 0x37e   : > { %vm1839_vm6 = vcmp.ge.f32.partialorder %v1499_v20, 0.0  ;;  %v2031_v35 = vmul.f32 0.2, %v1499_v20  ;;  %9574 = vst [vmem:[#allocation94_spill] sm:$0xff] %v7907_v36 }
 0x380   : > { %v2223_v18 = vsel %vm1839_vm6, %v1499_v20, %v2031_v35  ;;  %v1594_v20 = vadd.f32 %v7800_v45, %v7167_v10 }
 0x381   : > { %v3568_v24 = vpack.c.bf16 %v2223_v18, %v2223_v18 }
 0x382   : > { %vm1877_vm11 = vcmp.ge.f32.partialorder %v1594_v20, 0.0 }
 0x383   : > { %v7902_v22 = vunpack.c.l.b16 %v3568_v24  ;;  %v1501_v12 = vpop.f32.mrf.mxu0 }
 0x384   : > { %v1502_v30 = vadd.f32 %v7800_v45, %v1501_v12  ;;  %v2069_v12 = vmul.f32 0.2, %v1594_v20 }
 0x385   : > { %9573 = vst [vmem:[#allocation93_spill] sm:$0xff] %v7902_v22  ;;  %v7917_v14 = vpop.f32.mrf.mxu1 }
 0x386   : > { %6494 = vmatmul.msk.bf16.gmra.mxu0 %vm961_vm2, %v6877_v21  ;;  %6750 = vmatmul.msk.bf16.gmra.mxu1 %vm3913_vm8, %v7451_v16  ;;  %v2032_v49 = vmul.f32 0.2, %v1502_v30  ;;  %vm1840_vm7 = vcmp.ge.f32.partialorder %v1502_v30, 0.0  ;;  %v2260_v21 = vsel %vm1876_vm9, %v1592_v34, %v2068_v47  ;;  %9575 = vst [vmem:[#allocation95_spill] sm:$0xff] %v7917_v14  ;;  %v7966_v14 = vpop.f32.mrf.mxu2 }
 0x387   : > { %v3605_v25 = vpack.c.bf16 %v2260_v21, %v2260_v21 }
 0x388   : > { %v2224_v35 = vsel %vm1840_vm7, %v1502_v30, %v2032_v49  ;;  %v2261_v30 = vsel %vm1877_vm11, %v1594_v20, %v2069_v12 }
 0x389   : > { %v3569_v24 = vpack.c.bf16 %v2224_v35, %v2224_v35  ;;  %v4239_v34 = vunpack.c.l.b16 %v3605_v25  ;;  %v3606_v47 = vpack.c.bf16 %v2261_v30, %v2261_v30  ;;  %v6922_v25 = vld [vmem:[%s9389_s3 + $0x18] sm:$0xff] }
 0x38a   : > { %4124 = vmatpush.bf16.msrb.mxu2 %v6922_v25 }
 0x38b   : > { %v1503_v56 = vpop.f32.mrf.mxu0  ;;  %v3858_v36 = vunpack.c.l.b16 %v3569_v24  ;;  %v4240_v20 = vunpack.c.l.b16 %v3606_v47  ;;  %v6913_v47 = vld [vmem:[%s7054_s11 + $0x2d8] sm:$0xff] }
 0x38c   : > { %v1504_v41 = vadd.f32 %v7800_v45, %v1503_v56  ;;  %v6912_v56 = vld [vmem:[%s7054_s11 + $0x2d0] sm:$0xff] }
 0x38d   : > { %6529 = vmatmul.msk.bf16.vlgmr.msra.gmra.mxu3 %vm961_vm2, %v6912_v56  ;;  %v7935_v35 = vpop.f32.mrf.mxu1 }
 0x38e   : > { %vm1841_vm10 = vcmp.ge.f32.partialorder %v1504_v41, 0.0  ;;  %v2033_v18 = vmul.f32 0.2, %v1504_v41  ;;  %9578 = vst [vmem:[#allocation98_spill] sm:$0xff] %v7935_v35 }
 0x390   : > { %v2225_v0 = vsel %vm1841_vm10, %v1504_v41, %v2033_v18  ;;  %v7942_v41 = vpack.c.b16 %v4240_v20, %v4239_v34 }
 0x391   : > { %v3570_v53 = vpack.c.bf16 %v2225_v0, %v2225_v0 }
 0x392   : > { %9580 = vst [vmem:[#allocation100_spill] sm:$0xff] %v7942_v41 }
 0x393   : > { %v7920_v31 = vpop.f32.mrf.mxu0  ;;  %v3859_v10 = vunpack.c.l.b16 %v3570_v53  ;;  %v1597_v53 = vadd.f32 %v7800_v45, %v7177_v28 }
 0x394   : > { %9576 = vst [vmem:[#allocation96_spill] sm:$0xff] %v7920_v31 }
 0x395   : > { %v7922_v49 = vpack.c.b16 %v3859_v10, %v3858_v36  ;;  %v1599_v36 = vadd.f32 %v7800_v45, %v7184_v38  ;;  %v2070_v18 = vmul.f32 0.2, %v1597_v53  ;;  %vm1878_vm12 = vcmp.ge.f32.partialorder %v1597_v53, 0.0  ;;  %v6879_v38 = vld [vmem:[%s7054_s11 + $0x1c8] sm:$0xff]  ;;  %v7945_v30 = vpop.f32.mrf.mxu1 }
 0x396   : > { %6495 = vmatmul.msk.bf16.gmra.mxu0 %vm961_vm2, %v6878_v13  ;;  %6751 = vmatmul.msk.bf16.gmra.mxu1 %vm3913_vm8, %v7485_v42  ;;  %9581 = vst [vmem:[#allocation101_spill] sm:$0xff] %v7945_v30 }
 0x397   : > { %9577 = vst [vmem:[#allocation97_spill] sm:$0xff] %v7922_v49  ;;  %6558 = vmatmul.msk.bf16.gmra.mxu2 %vm3913_vm8, %v7922_v49  ;;  %v2071_v24 = vmul.f32 0.2, %v1599_v36  ;;  %vm1879_vm13 = vcmp.ge.f32.partialorder %v1599_v36, 0.0  ;;  %v2262_v28 = vsel %vm1878_vm12, %v1597_v53, %v2070_v18  ;;  %v1602_v53 = vadd.f32 %v7800_v45, %v7190_v57 }
 0x398   : > { %v3607_v12 = vpack.c.bf16 %v2262_v28, %v2262_v28 }
 0x399   : > { %v2263_v21 = vsel %vm1879_vm13, %v1599_v36, %v2071_v24  ;;  %v1604_v36 = vadd.f32 %v7800_v45, %v7197_v3  ;;  %v2072_v28 = vmul.f32 0.2, %v1602_v53  ;;  %vm1880_vm15 = vcmp.ge.f32.partialorder %v1602_v53, 0.0  ;;  %v6880_v24 = vld [vmem:[%s7054_s11 + $0x1d0] sm:$0xff] }
 0x39a   : > { %v3608_v0 = vpack.c.bf16 %v2263_v21, %v2263_v21  ;;  %v7952_v34 = vunpack.c.l.b16 %v3607_v12 }
 0x39b   : > { %v7937_v13 = vpop.f32.mrf.mxu0  ;;  %v2073_v21 = vmul.f32 0.2, %v1604_v36  ;;  %vm1881_vm0 = vcmp.ge.f32.partialorder %v1604_v36, 0.0 }
 0x39c   : > { %9579 = vst [vmem:[#allocation99_spill] sm:$0xff] %v7937_v13  ;;  %v7954_v20 = vunpack.c.l.b16 %v3608_v0 }
 0x39d   : > { %9582 = vst [vmem:[#allocation102_spill] sm:$0xff] %v7952_v34  ;;  %6530 = vmatmul.msk.bf16.gmra.mxu3 %vm961_vm2, %v6913_v47  ;;  %v7964_v0 = vpop.f32.mrf.mxu1  ;;  %v2265_v47 = vsel %vm1881_vm0, %v1604_v36, %v2073_v21  ;;  %v1609_v36 = vadd.f32 %v7800_v45, %v7214_v40 }
 0x39e   : > { %9583 = vst [vmem:[#allocation103_spill] sm:$0xff] %v7954_v20  ;;  %v3610_v29 = vpack.c.bf16 %v2265_v47, %v2265_v47 }
 0x39f   : > { %9584 = vst [vmem:[#allocation104_spill] sm:$0xff] %v7964_v0  ;;  %v6914_v0 = vld [vmem:[%s7054_s11 + $0x2e0] sm:$0xff]  ;;  %vm1883_vm5 = vcmp.ge.f32.partialorder %v1609_v36, 0.0 }
 0x3a3   : > { %v1511_v10 = vpop.f32.mrf.mxu0 }
 0x3a4   : > { %v1512_v56 = vadd.f32 %v7800_v45, %v1511_v10  ;;  %v2264_v10 = vsel %vm1880_vm15, %v1602_v53, %v2072_v28 }
 0x3a5   : > { %v3609_v49 = vpack.c.bf16 %v2264_v10, %v2264_v10  ;;  %v7983_v28 = vpop.f32.mrf.mxu1 }
 0x3a6   : > { %6496 = vmatmul.msk.bf16.gmra.mxu0 %vm961_vm2, %v6879_v38  ;;  %6752 = vmatmul.msk.bf16.gmra.mxu1 %vm3913_vm8, %v7519_v52  ;;  %v2036_v25 = vmul.f32 0.2, %v1512_v56  ;;  %vm1844_vm14 = vcmp.ge.f32.partialorder %v1512_v56, 0.0  ;;  %9586 = vst [vmem:[#allocation106_spill] sm:$0xff] %v7983_v28 }
 0x3a7   : > { %v4241_v53 = vunpack.c.l.b16 %v3609_v49  ;;  %v2075_v49 = vmul.f32 0.2, %v1609_v36 }
 0x3a8   : > { %v2228_v38 = vsel %vm1844_vm14, %v1512_v56, %v2036_v25 }
 0x3a9   : > { %v3573_v3 = vpack.c.bf16 %v2228_v38, %v2228_v38  ;;  %v2267_v10 = vsel %vm1883_vm5, %v1609_v36, %v2075_v49  ;;  %v9593_v49 = vld [vmem:[#allocation5_spill] sm:$0xff] }
 0x3ab   : > { %v1513_v18 = vpop.f32.mrf.mxu0  ;;  %v3860_v56 = vunpack.c.l.b16 %v3573_v3 }
 0x3ac   : > { %v1514_v12 = vadd.f32 %v7800_v45, %v1513_v18 }
 0x3ad   : > { %6531 = vmatmul.msk.bf16.gmra.mxu3 %vm961_vm2, %v6914_v0 }
 0x3ae   : > { %vm1845_vm1 = vcmp.ge.f32.partialorder %v1514_v12, 0.0  ;;  %v2037_v57 = vmul.f32 0.2, %v1514_v12 }
 0x3b0   : > { %v2229_v30 = vsel %vm1845_vm1, %v1514_v12, %v2037_v57  ;;  %v7987_v12 = vpop.f32.mrf.mxu2 }
 0x3b1   : > { %v3574_v35 = vpack.c.bf16 %v2229_v30, %v2229_v30  ;;  %v4242_v30 = vunpack.c.l.b16 %v3610_v29 }
 0x3b3   : > { %v3861_v25 = vunpack.c.l.b16 %v3574_v35  ;;  %v1516_v18 = vpop.f32.mrf.mxu0  ;;  %v1607_v35 = vadd.f32 %v7800_v45, %v7207_v27  ;;  %v7985_v38 = vpack.c.b16 %v4242_v30, %v4241_v53  ;;  %v3612_v30 = vpack.c.bf16 %v2267_v10, %v2267_v10 }
 0x3b4   : > { %v1517_v59 = vadd.f32 %v7800_v45, %v1516_v18  ;;  %v6881_v18 = vld [vmem:[%s7054_s11 + $0x1d8] sm:$0xff] }
 0x3b5   : > { %v7970_v15 = vpack.c.b16 %v3861_v25, %v3860_v56  ;;  %9587 = vst [vmem:[#allocation107_spill] sm:$0xff] %v7985_v38  ;;  %v2074_v29 = vmul.f32 0.2, %v1607_v35  ;;  %vm1882_vm4 = vcmp.ge.f32.partialorder %v1607_v35, 0.0  ;;  %v7990_v25 = vpop.f32.mrf.mxu1 }
 0x3b6   : > { %6497 = vmatmul.msk.bf16.gmra.mxu0 %vm961_vm2, %v6880_v24  ;;  %6753 = vmatmul.msk.bf16.gmra.mxu1 %vm3913_vm8, %v7553_v23  ;;  %v2038_v21 = vmul.f32 0.2, %v1517_v59  ;;  %vm1846_vm3 = vcmp.ge.f32.partialorder %v1517_v59, 0.0  ;;  %9588 = vst [vmem:[#allocation108_spill] sm:$0xff] %v7990_v25 }
 0x3b7   : > { %9585 = vst [vmem:[#allocation105_spill] sm:$0xff] %v7970_v15  ;;  %6559 = vmatmul.msk.bf16.gmra.mxu2 %vm3913_vm8, %v7970_v15  ;;  %v2266_v3 = vsel %vm1882_vm4, %v1607_v35, %v2074_v29  ;;  %v6915_v15 = vld [vmem:[%s7054_s11 + $0x2e8] sm:$0xff]  ;;  %v8008_v29 = vunpack.c.l.b16 %v3612_v30 }
 0x3b8   : > { %v2230_v57 = vsel %vm1846_vm3, %v1517_v59, %v2038_v21  ;;  %v3611_v53 = vpack.c.bf16 %v2266_v3, %v2266_v3  ;;  %v8001_v35 = vpop.f32.mrf.mxu2 }
 0x3b9   : > { %v3575_v40 = vpack.c.bf16 %v2230_v57, %v2230_v57  ;;  %9592 = vst [vmem:[#allocation112_spill] sm:$0xff] %v8008_v29 }
 0x3ba   : > { %v8006_v36 = vunpack.c.l.b16 %v3611_v53 }
 0x3bb   : > { %v1518_v24 = vpop.f32.mrf.mxu0  ;;  %v7993_v28 = vunpack.c.l.b16 %v3575_v40 }
 0x3bc   : > { %v1519_v0 = vadd.f32 %v7800_v45, %v1518_v24  ;;  %9591 = vst [vmem:[#allocation111_spill] sm:$0xff] %v8006_v36 }
 0x3bd   : > { %9589 = vst [vmem:[#allocation109_spill] sm:$0xff] %v7993_v28  ;;  %6532 = vmatmul.msk.bf16.gmra.mxu3 %vm961_vm2, %v6915_v15  ;;  %v8020_v30 = vpop.f32.mrf.mxu1 }
 0x3be   : > { %vm1847_vm6 = vcmp.ge.f32.partialorder %v1519_v0, 0.0  ;;  %v2039_v27 = vmul.f32 0.2, %v1519_v0  ;;  %9595 = vst [vmem:[#allocation5_spill] sm:$0xff] %v8020_v30 }
 0x3c0   : > { %v2231_v47 = vsel %vm1847_vm6, %v1519_v0, %v2039_v27  ;;  %v1612_v0 = vadd.f32 %v7800_v45, %v9593_v49  ;;  %v9594_v27 = vld [vmem:[#allocation6_spill] sm:$0xff]  ;;  %v8023_v28 = vpop.f32.mrf.mxu2 }
 0x3c1   : > { %v3576_v56 = vpack.c.bf16 %v2231_v47, %v2231_v47  ;;  %v1614_v40 = vadd.f32 %v7800_v45, %v9594_v27  ;;  %v6921_v47 = vld [vmem:[%s9389_s3 + $0x10] sm:$0xff] }
 0x3c2   : > { %vm1884_vm9 = vcmp.ge.f32.partialorder %v1612_v0, 0.0  ;;  %4125 = vmatpush.bf16.msrb.mxu2 %v6921_v47  ;;  %v6916_v47 = vld [vmem:[%s7054_s11 + $0x2f0] sm:$0xff] }
 0x3c3   : > { %v7995_v59 = vunpack.c.l.b16 %v3576_v56  ;;  %v1521_v21 = vpop.f32.mrf.mxu0  ;;  %v2077_v53 = vmul.f32 0.2, %v1614_v40  ;;  %vm1885_vm10 = vcmp.ge.f32.partialorder %v1614_v40, 0.0 }
 0x3c4   : > { %v1522_v24 = vadd.f32 %v7800_v45, %v1521_v21 }
 0x3c5   : > { %9590 = vst [vmem:[#allocation110_spill] sm:$0xff] %v7995_v59  ;;  %v2269_v25 = vsel %vm1885_vm10, %v1614_v40, %v2077_v53  ;;  %v8029_v20 = vpop.f32.mrf.mxu1 }
 0x3c6   : > { %6498 = vmatmul.msk.bf16.gmra.mxu0 %vm961_vm2, %v6881_v18  ;;  %6754 = vmatmul.msk.bf16.gmra.mxu1 %vm3913_vm8, %v7587_v19  ;;  %v2040_v3 = vmul.f32 0.2, %v1522_v24  ;;  %vm1848_vm7 = vcmp.ge.f32.partialorder %v1522_v24, 0.0  ;;  %v2076_v18 = vmul.f32 0.2, %v1612_v0  ;;  %v3614_v29 = vpack.c.bf16 %v2269_v25, %v2269_v25  ;;  %9597 = vst [vmem:[#allocation113_spill] sm:$0xff] %v8029_v20 }
 0x3c7   : > { %v9599_v25 = vld [vmem:[#allocation7_spill] sm:$0xff] }
 0x3c8   : > { %v2232_v15 = vsel %vm1848_vm7, %v1522_v24, %v2040_v3  ;;  %v2268_v57 = vsel %vm1884_vm9, %v1612_v0, %v2076_v18  ;;  %v9598_v0 = vpack.c.b16 %v7633_v26, %v7631_v9  ;;  %v4244_v18 = vunpack.c.l.b16 %v3614_v29 }
 0x3c9   : > { %v3577_v27 = vpack.c.bf16 %v2232_v15, %v2232_v15  ;;  %v3613_v36 = vpack.c.bf16 %v2268_v57, %v2268_v57 }
 0x3cb   : > { %v1523_v10 = vpop.f32.mrf.mxu0  ;;  %v3862_v34 = vunpack.c.l.b16 %v3577_v27  ;;  %v4243_v40 = vunpack.c.l.b16 %v3613_v36 }
 0x3cc   : > { %v1524_v21 = vadd.f32 %v7800_v45, %v1523_v10 }
 0x3cd   : > { %6533 = vmatmul.msk.bf16.gmra.mxu3 %vm961_vm2, %v6916_v47  ;;  %v8044_v9 = vpack.c.b16 %v4244_v18, %v4243_v40 }
 0x3ce   : > { %vm1849_vm11 = vcmp.ge.f32.partialorder %v1524_v21, 0.0  ;;  %v2041_v49 = vmul.f32 0.2, %v1524_v21 }
 0x3cf   : > { %9601 = vst [vmem:[#allocation7_spill] sm:$0xff] %v8044_v9 }
 0x3d0   : > { %v2233_v59 = vsel %vm1849_vm11, %v1524_v21, %v2041_v49  ;;  %v6920_v49 = vld [vmem:[%s9389_s3 + $0x8] sm:$0xff] }
 0x3d1   : > { %v3578_v56 = vpack.c.bf16 %v2233_v59, %v2233_v59  ;;  %v1617_v59 = vadd.f32 %v7800_v45, %v9599_v25  ;;  %4126 = vmatpush.bf16.msrb.mxu2 %v6920_v49  ;;  %v9607_v49 = vld [vmem:[#allocation10_spill] sm:$0xff] }
 0x3d3   : > { %v3863_v30 = vunpack.c.l.b16 %v3578_v56  ;;  %v1526_v24 = vpop.f32.mrf.mxu0  ;;  %v8042_v56 = vpop.f32.mrf.mxu2  ;;  %v2078_v36 = vmul.f32 0.2, %v1617_v59  ;;  %vm1886_vm13 = vcmp.ge.f32.partialorder %v1617_v59, 0.0 }
 0x3d4   : > { %v1527_v3 = vadd.f32 %v7800_v45, %v1526_v24 }
 0x3d5   : > { %v8026_v10 = vpack.c.b16 %v3863_v30, %v3862_v34  ;;  %v9600_v34 = vld [vmem:[#allocation8_spill] sm:$0xff]  ;;  %v2270_v24 = vsel %vm1886_vm13, %v1617_v59, %v2078_v36  ;;  %v6917_v59 = vld [vmem:[%s7054_s11 + $0x2f8] sm:$0xff] }
 0x3d6   : > { %6755 = vmatmul.msk.bf16.gmra.mxu1 %vm3913_vm8, %v9598_v0  ;;  %v1619_v57 = vadd.f32 %v7800_v45, %v9600_v34  ;;  %v2042_v53 = vmul.f32 0.2, %v1527_v3  ;;  %vm1850_vm12 = vcmp.ge.f32.partialorder %v1527_v3, 0.0  ;;  %v3615_v25 = vpack.c.bf16 %v2270_v24, %v2270_v24 }
 0x3d7   : > { %9596 = vst [vmem:[#allocation6_spill] sm:$0xff] %v8026_v10  ;;  %6560 = vmatmul.msk.bf16.gmra.mxu2 %vm3913_vm8, %v8026_v10 }
 0x3d8   : > { %v2079_v29 = vmul.f32 0.2, %v1619_v57  ;;  %v2234_v30 = vsel %vm1850_vm12, %v1527_v3, %v2042_v53  ;;  %vm1887_vm14 = vcmp.ge.f32.partialorder %v1619_v57, 0.0  ;;  %v6919_v3 = vld [vmem:[%s9389_s3] sm:$0xff]  ;;  %v8063_v36 = vunpack.c.l.b16 %v3615_v25 }
 0x3d9   : > { %v3579_v27 = vpack.c.bf16 %v2234_v30, %v2234_v30  ;;  %4127 = vmatpush.bf16.msrb.mxu2 %v6919_v3 }
 0x3da   : > { %v2271_v47 = vsel %vm1887_vm14, %v1619_v57, %v2079_v29  ;;  %9604 = vst [vmem:[#allocation115_spill] sm:$0xff] %v8063_v36 }
 0x3db   : > { %v1528_v26 = vpop.f32.mrf.mxu0  ;;  %v8050_v18 = vpop.f32.mrf.mxu2  ;;  %v3616_v34 = vpack.c.bf16 %v2271_v47, %v2271_v47  ;;  %v8055_v53 = vunpack.c.l.b16 %v3579_v27  ;;  %v1624_v27 = vadd.f32 %v7800_v45, %v9607_v49 }
 0x3dc   : > { %v1529_v15 = vadd.f32 %v7800_v45, %v1528_v26 }
 0x3dd   : > { %9602 = vst [vmem:[#allocation8_spill] sm:$0xff] %v8055_v53  ;;  %v8065_v29 = vunpack.c.l.b16 %v3616_v34  ;;  %6534 = vmatmul.msk.bf16.gmra.mxu3 %vm961_vm2, %v6917_v59  ;;  %v2081_v3 = vmul.f32 0.2, %v1624_v27  ;;  %vm1889_vm3 = vcmp.ge.f32.partialorder %v1624_v27, 0.0 }
 0x3de   : > { %vm1851_vm15 = vcmp.ge.f32.partialorder %v1529_v15, 0.0  ;;  %v2043_v21 = vmul.f32 0.2, %v1529_v15 }
 0x3df   : > { %9605 = vst [vmem:[#allocation116_spill] sm:$0xff] %v8065_v29  ;;  %v2273_v49 = vsel %vm1889_vm3, %v1624_v27, %v2081_v3 }
 0x3e0   : > { %v2235_v0 = vsel %vm1851_vm15, %v1529_v15, %v2043_v21  ;;  %v9606_v15 = vld [vmem:[#allocation9_spill] sm:$0xff]  ;;  %v3618_v5 = vpack.c.bf16 %v2273_v49, %v2273_v49 }
 0x3e1   : > { %v3580_v40 = vpack.c.bf16 %v2235_v0, %v2235_v0  ;;  %v1622_v21 = vadd.f32 %v7800_v45, %v9606_v15 }
 0x3e2   : > { %v4246_v36 = vunpack.c.l.b16 %v3618_v5 }
 0x3e3   : > { %v8057_v26 = vunpack.c.l.b16 %v3580_v40  ;;  %v1531_v20 = vpop.f32.mrf.mxu0  ;;  %v2080_v40 = vmul.f32 0.2, %v1622_v21  ;;  %vm1888_vm1 = vcmp.ge.f32.partialorder %v1622_v21, 0.0 }
 0x3e4   : > { %v1532_v30 = vadd.f32 %v7800_v45, %v1531_v20  ;;  %v8072_v20 = vpop.f32.mrf.mxu2 }
 0x3e5   : > { %9603 = vst [vmem:[#allocation114_spill] sm:$0xff] %v8057_v26  ;;  %v2272_v57 = vsel %vm1888_vm1, %v1622_v21, %v2080_v40  ;;  %v9609_v21 = vld [vmem:[#allocation11_spill] sm:$0xff] }
 0x3e6   : > { %v2044_v24 = vmul.f32 0.2, %v1532_v30  ;;  %vm1852_vm0 = vcmp.ge.f32.partialorder %v1532_v30, 0.0  ;;  %v3617_v26 = vpack.c.bf16 %v2272_v57, %v2272_v57  ;;  %v1627_v27 = vadd.f32 %v7800_v45, %v9609_v21 }
 0x3e8   : > { %v2236_v25 = vsel %vm1852_vm0, %v1532_v30, %v2044_v24  ;;  %vm1890_vm6 = vcmp.ge.f32.partialorder %v1627_v27, 0.0 }
 0x3e9   : > { %v3581_v15 = vpack.c.bf16 %v2236_v25, %v2236_v25  ;;  %v2082_v25 = vmul.f32 0.2, %v1627_v27 }
 0x3eb   : > { %v1533_v47 = vpop.f32.mrf.mxu0  ;;  %v3864_v22 = vunpack.c.l.b16 %v3581_v15 }
 0x3ec   : > { %v1534_v34 = vadd.f32 %v7800_v45, %v1533_v47  ;;  %v8077_v0 = vpop.f32.mrf.mxu2  ;;  %v4245_v47 = vunpack.c.l.b16 %v3617_v26 }
 0x3ee   : > { %vm1853_vm4 = vcmp.ge.f32.partialorder %v1534_v34, 0.0  ;;  %v2045_v59 = vmul.f32 0.2, %v1534_v34  ;;  %v8088_v3 = vpack.c.b16 %v4246_v36, %v4245_v47 }
 0x3f0   : > { %v2237_v10 = vsel %vm1853_vm4, %v1534_v34, %v2045_v59  ;;  %9611 = vst [vmem:[#allocation10_spill] sm:$0xff] %v8088_v3  ;;  %v2274_v59 = vsel %vm1890_vm6, %v1627_v27, %v2082_v25  ;;  %v9619_v25 = vld [vmem:[#allocation13_spill] sm:$0xff] }
 0x3f1   : > { %v3582_v53 = vpack.c.bf16 %v2237_v10, %v2237_v10  ;;  %v9610_v10 = vld [vmem:[#allocation12_spill] sm:$0xff] }
 0x3f2   : > { %v1629_v57 = vadd.f32 %v7800_v45, %v9610_v10  ;;  %v3619_v10 = vpack.c.bf16 %v2274_v59, %v2274_v59 }
 0x3f3   : > { %v3865_v31 = vunpack.c.l.b16 %v3582_v53  ;;  %v1536_v13 = vpop.f32.mrf.mxu0 }
 0x3f4   : > { %v1537_v30 = vadd.f32 %v7800_v45, %v1536_v13  ;;  %v2083_v13 = vmul.f32 0.2, %v1629_v57  ;;  %vm1891_vm7 = vcmp.ge.f32.partialorder %v1629_v57, 0.0  ;;  %v8102_v46 = vunpack.c.l.b16 %v3619_v10 }
 0x3f5   : > { %v8080_v24 = vpack.c.b16 %v3865_v31, %v3864_v22  ;;  %v8090_v31 = vpop.f32.mrf.mxu2 }
 0x3f6   : > { %v2046_v40 = vmul.f32 0.2, %v1537_v30  ;;  %vm1854_vm5 = vcmp.ge.f32.partialorder %v1537_v30, 0.0  ;;  %9612 = vst [vmem:[#allocation11_spill] sm:$0xff] %v8090_v31  ;;  %v2275_v15 = vsel %vm1891_vm7, %v1629_v57, %v2083_v13  ;;  %v9618_v57 = vmov 0  }
 0x3f7   : > { %9608 = vst [vmem:[#allocation9_spill] sm:$0xff] %v8080_v24  ;;  %6561 = vmatmul.msk.bf16.gmra.mxu2 %vm3913_vm8, %v8080_v24  ;;  %v3620_v24 = vpack.c.bf16 %v2275_v15, %v2275_v15  ;;  %v1632_v13 = vadd.f32 %v7800_v45, %v9619_v25 }
 0x3f8   : > { %v2238_v22 = vsel %vm1854_vm5, %v1537_v30, %v2046_v40  ;;  %9616 = vst [vmem:[#allocation119_spill] sm:$0xff] %v8102_v46 }
 0x3f9   : > { %v3583_v34 = vpack.c.bf16 %v2238_v22, %v2238_v22  ;;  %v8104_v27 = vunpack.c.l.b16 %v3620_v24  ;;  %v9620_v22 = vld [vmem:[#allocation14_spill] sm:$0xff]  ;;  %v2084_v59 = vmul.f32 0.2, %v1632_v13  ;;  %vm1892_vm11 = vcmp.ge.f32.partialorder %v1632_v13, 0.0 }
 0x3fb   : > { %v1538_v53 = vpop.f32.mrf.mxu0  ;;  %v8093_v36 = vunpack.c.l.b16 %v3583_v34  ;;  %9617 = vst [vmem:[#allocation120_spill] sm:$0xff] %v8104_v27  ;;  %v2276_v40 = vsel %vm1892_vm11, %v1632_v13, %v2084_v59  ;;  %v9622_v13 = vld [vmem:[#allocation15_spill] sm:$0xff] }
 0x3fc   : > { %v1539_v5 = vadd.f32 %v7800_v45, %v1538_v53  ;;  %v3621_v54 = vpack.c.bf16 %v2276_v40, %v2276_v40  ;;  %v9623_v40 = vld [vmem:[#allocation16_spill] sm:$0xff] }
 0x3fd   : > { %9613 = vst [vmem:[#allocation12_spill] sm:$0xff] %v8093_v36  ;;  %v8100_v53 = vpop.f32.mrf.mxu2 }
 0x3fe   : > { %vm1855_vm9 = vcmp.ge.f32.partialorder %v1539_v5, 0.0  ;;  %v2047_v26 = vmul.f32 0.2, %v1539_v5  ;;  %9615 = vst [vmem:[#allocation118_spill] sm:$0xff] %v8100_v53 }
 0x400   : > { %v2239_v49 = vsel %vm1855_vm9, %v1539_v5, %v2047_v26  ;;  %v1634_v5 = vadd.f32 %v7800_v45, %v9620_v22 }
 0x401   : > { %v3584_v21 = vpack.c.bf16 %v2239_v49, %v2239_v49 }
 0x402   : > { %v2085_v15 = vmul.f32 0.2, %v1634_v5  ;;  %vm1893_vm12 = vcmp.ge.f32.partialorder %v1634_v5, 0.0 }
 0x403   : > { %v8095_v47 = vunpack.c.l.b16 %v3584_v21  ;;  %v1541_v29 = vpop.f32.mrf.mxu0 }
 0x404   : > { %v1542_v30 = vadd.f32 %v7800_v45, %v1541_v29  ;;  %v2277_v22 = vsel %vm1893_vm12, %v1634_v5, %v2085_v15  ;;  %v1639_v5 = vadd.f32 %v7800_v45, %v9623_v40 }
 0x405   : > { %9614 = vst [vmem:[#allocation117_spill] sm:$0xff] %v8095_v47  ;;  %v8114_v21 = vpop.f32.mrf.mxu2  ;;  %v3622_v53 = vpack.c.bf16 %v2277_v22, %v2277_v22 }
 0x406   : > { %v2048_v26 = vmul.f32 0.2, %v1542_v30  ;;  %vm1856_vm10 = vcmp.ge.f32.partialorder %v1542_v30, 0.0  ;;  %vm1895_vm0 = vcmp.ge.f32.partialorder %v1639_v5, 0.0 }
 0x407   : > { %4128 = vmatmul.bf16.vlgmr.msrb.gmra.mxu2 %v9618_v57  ;;  %v4248_v27 = vunpack.c.l.b16 %v3622_v53 }
 0x408   : > { %v2240_v49 = vsel %vm1856_vm10, %v1542_v30, %v2048_v26 }
 0x409   : > { %v3585_v25 = vpack.c.bf16 %v2240_v49, %v2240_v49 }
 0x40b   : > { %v1543_v29 = vpop.f32.mrf.mxu0  ;;  %v3866_v31 = vunpack.c.l.b16 %v3585_v25 }
 0x40c   : > { %v1544_v24 = vadd.f32 %v7800_v45, %v1543_v29  ;;  %v4247_v29 = vunpack.c.l.b16 %v3621_v54  ;;  %v6930_v54 = vld [vmem:[%s9389_s3 + $0x58] sm:$0xff] }
 0x40d   : > { %4357 = vmatpush.bf16.msra.mxu3 %v6930_v54 }
 0x40e   : > { %vm1857_vm13 = vcmp.ge.f32.partialorder %v1544_v24, 0.0  ;;  %v2049_v10 = vmul.f32 0.2, %v1544_v24 }
 0x410   : > { %v2241_v36 = vsel %vm1857_vm13, %v1544_v24, %v2049_v10 }
 0x411   : > { %v3586_v47 = vpack.c.bf16 %v2241_v36, %v2241_v36  ;;  %v1637_v36 = vadd.f32 %v7800_v45, %v9622_v13 }
 0x413   : > { %v3867_v34 = vunpack.c.l.b16 %v3586_v47  ;;  %v1546_v46 = vpop.f32.mrf.mxu0  ;;  %v8127_v47 = vpop.f32.mrf.mxu2  ;;  %v2086_v53 = vmul.f32 0.2, %v1637_v36  ;;  %vm1894_vm15 = vcmp.ge.f32.partialorder %v1637_v36, 0.0 }
 0x414   : > { %v1547_v30 = vadd.f32 %v7800_v45, %v1546_v46  ;;  %9624 = vst [vmem:[#allocation14_spill] sm:$0xff] %v8127_v47 }
 0x415   : > { %v8117_v26 = vpack.c.b16 %v3867_v34, %v3866_v31  ;;  %v8132_v31 = vpack.c.b16 %v4248_v27, %v4247_v29  ;;  %v2087_v34 = vmul.f32 0.2, %v1639_v5  ;;  %v2278_v10 = vsel %vm1894_vm15, %v1637_v36, %v2086_v53 }
 0x416   : > { %v2050_v59 = vmul.f32 0.2, %v1547_v30  ;;  %vm1858_vm14 = vcmp.ge.f32.partialorder %v1547_v30, 0.0 }
 0x417   : > { %9621 = vst [vmem:[#allocation13_spill] sm:$0xff] %v8117_v26  ;;  %6562 = vmatmul.msk.bf16.vlgmr.msrb.gmra.mxu3 %vm3913_vm8, %v8117_v26  ;;  %6582 = vmatmul.msk.bf16.gmra.mxu2 %vm3913_vm8, %v7129_v7  ;;  %v2279_v25 = vsel %vm1895_vm0, %v1639_v5, %v2087_v34  ;;  %v3623_v26 = vpack.c.bf16 %v2278_v10, %v2278_v10  ;;  %v9631_v5 = vld [vmem:[#allocation17_spill] sm:$0xff]  ;;  %v9632_v34 = vld [vmem:[#allocation18_spill] sm:$0xff] }
 0x418   : > { %9625 = vst [vmem:[#allocation15_spill] sm:$0xff] %v8132_v31  ;;  %v2242_v7 = vsel %vm1858_vm14, %v1547_v30, %v2050_v59  ;;  %v3624_v27 = vpack.c.bf16 %v2279_v25, %v2279_v25  ;;  %v1642_v53 = vadd.f32 %v7800_v45, %v9631_v5 }
 0x419   : > { %v3587_v24 = vpack.c.bf16 %v2242_v7, %v2242_v7  ;;  %v8144_v54 = vunpack.c.l.b16 %v3623_v26  ;;  %v1644_v7 = vadd.f32 %v7800_v45, %v9632_v34  ;;  %v6929_v26 = vld [vmem:[%s9389_s3 + $0x50] sm:$0xff] }
 0x41a   : > { %v8146_v36 = vunpack.c.l.b16 %v3624_v27  ;;  %v2088_v25 = vmul.f32 0.2, %v1642_v53  ;;  %vm1896_vm4 = vcmp.ge.f32.partialorder %v1642_v53, 0.0  ;;  %4358 = vmatpush.bf16.msra.mxu3 %v6929_v26  ;;  %v9636_v26 = vld [vmem:[#allocation20_spill] sm:$0xff] }
 0x41b   : > { %v1548_v46 = vpop.f32.mrf.mxu0  ;;  %v8135_v22 = vpop.f32.mrf.mxu2  ;;  %v8137_v29 = vunpack.c.l.b16 %v3587_v24  ;;  %9629 = vst [vmem:[#allocation123_spill] sm:$0xff] %v8144_v54  ;;  %vm1897_vm5 = vcmp.ge.f32.partialorder %v1644_v7, 0.0 }
 0x41c   : > { %v1549_v15 = vadd.f32 %v7800_v45, %v1548_v46  ;;  %9626 = vst [vmem:[#allocation16_spill] sm:$0xff] %v8135_v22  ;;  %v2280_v5 = vsel %vm1896_vm4, %v1642_v53, %v2088_v25 }
 0x41d   : > { %9627 = vst [vmem:[#allocation121_spill] sm:$0xff] %v8137_v29 }
 0x41e   : > { %vm1859_vm1 = vcmp.ge.f32.partialorder %v1549_v15, 0.0  ;;  %v2051_v49 = vmul.f32 0.2, %v1549_v15  ;;  %9630 = vst [vmem:[#allocation124_spill] sm:$0xff] %v8146_v36 }
 0x420   : > { %v2243_v13 = vsel %vm1859_vm1, %v1549_v15, %v2051_v49 }
 0x421   : > { %v3588_v40 = vpack.c.bf16 %v2243_v13, %v2243_v13 }
 0x423   : > { %v8139_v47 = vunpack.c.l.b16 %v3588_v40  ;;  %v1551_v30 = vpop.f32.mrf.mxu0  ;;  %v8154_v49 = vpop.f32.mrf.mxu2 }
 0x424   : > { %v1552_v59 = vadd.f32 %v7800_v45, %v1551_v30  ;;  %9633 = vst [vmem:[#allocation17_spill] sm:$0xff] %v8154_v49  ;;  %v3625_v49 = vpack.c.bf16 %v2280_v5, %v2280_v5 }
 0x425   : > { %9628 = vst [vmem:[#allocation122_spill] sm:$0xff] %v8139_v47 }
 0x426   : > { %v2052_v15 = vmul.f32 0.2, %v1552_v59  ;;  %vm1860_vm3 = vcmp.ge.f32.partialorder %v1552_v59, 0.0  ;;  %v4249_v53 = vunpack.c.l.b16 %v3625_v49 }
 0x427   : > { %6583 = vmatmul.msk.bf16.gmra.mxu2 %vm3913_vm8, %v7163_v4  ;;  %v2089_v4 = vmul.f32 0.2, %v1644_v7 }
 0x428   : > { %v2244_v13 = vsel %vm1860_vm3, %v1552_v59, %v2052_v15 }
 0x429   : > { %v3589_v30 = vpack.c.bf16 %v2244_v13, %v2244_v13  ;;  %v2281_v34 = vsel %vm1897_vm5, %v1644_v7, %v2089_v4 }
 0x42a   : > { %v3626_v22 = vpack.c.bf16 %v2281_v34, %v2281_v34 }
 0x42b   : > { %v1553_v24 = vpop.f32.mrf.mxu0  ;;  %v8162_v47 = vpop.f32.mrf.mxu2  ;;  %v3868_v10 = vunpack.c.l.b16 %v3589_v30 }
 0x42c   : > { %v1554_v40 = vadd.f32 %v7800_v45, %v1553_v24  ;;  %v8167_v45 = vld [vmem:[%s9388_s2] ss:$0 sm:$0xff]  ;;  %v4250_v7 = vunpack.c.l.b16 %v3626_v22 }
 0x42e   : > { %vm1861_vm6 = vcmp.ge.f32.partialorder %v1554_v40, 0.0  ;;  %v2053_v27 = vmul.f32 0.2, %v1554_v40  ;;  %v8183_v49 = vpack.c.b16 %v4250_v7, %v4249_v53 }
 0x430   : > { %v2245_v46 = vsel %vm1861_vm6, %v1554_v40, %v2053_v27  ;;  %v8188_v40 = vpop.f32.mrf.mxu3 }
 0x431   : > { %v3590_v29 = vpack.c.bf16 %v2245_v46, %v2245_v46  ;;  %v9635_v46 = vld [vmem:[#allocation19_spill] sm:$0xff]  ;;  %9639 = vst [vmem:[#allocation125_spill] sm:$0xff] %v8188_v40 }
 0x432   : > { %v1647_v24 = vadd.f32 %v8167_v45, %v9635_v46  ;;  %9637 = vst [vmem:[#allocation19_spill] sm:$0xff] %v8183_v49 }
 0x433   : > { %v3869_v54 = vunpack.c.l.b16 %v3590_v29  ;;  %v1556_v36 = vpop.f32.mrf.mxu0  ;;  %v6928_v29 = vld [vmem:[%s9389_s3 + $0x48] sm:$0xff]  ;;  %v8185_v4 = vpop.f32.mrf.mxu2 }
 0x434   : > { %v1557_v59 = vadd.f32 %v8167_v45, %v1556_v36  ;;  %v1649_v36 = vadd.f32 %v8167_v45, %v9636_v26  ;;  %4359 = vmatpush.bf16.msra.mxu3 %v6928_v29  ;;  %9638 = vst [vmem:[#allocation20_spill] sm:$0xff] %v8185_v4  ;;  %vm1898_vm9 = vcmp.ge.f32.partialorder %v1647_v24, 0.0 }
 0x435   : > { %v8170_v15 = vpack.c.b16 %v3869_v54, %v3868_v10  ;;  %v2090_v10 = vmul.f32 0.2, %v1647_v24 }
 0x436   : > { %v2054_v54 = vmul.f32 0.2, %v1557_v59  ;;  %vm1862_vm7 = vcmp.ge.f32.partialorder %v1557_v59, 0.0  ;;  %v2091_v25 = vmul.f32 0.2, %v1649_v36  ;;  %vm1899_vm10 = vcmp.ge.f32.partialorder %v1649_v36, 0.0 }
 0x437   : > { %9634 = vst [vmem:[#allocation18_spill] sm:$0xff] %v8170_v15  ;;  %6563 = vmatmul.msk.bf16.gmra.mxu3 %vm3913_vm8, %v8170_v15  ;;  %6584 = vmatmul.msk.bf16.gmra.mxu2 %vm3913_vm8, %v7193_v60  ;;  %v2282_v5 = vsel %vm1898_vm9, %v1647_v24, %v2090_v10  ;;  %v6938_v10 = vld [vmem:[%s9389_s3 + $0x98] sm:$0xff] }
 0x438   : > { %v2246_v60 = vsel %vm1862_vm7, %v1557_v59, %v2054_v54  ;;  %v2283_v34 = vsel %vm1899_vm10, %v1649_v36, %v2091_v25  ;;  %v3627_v53 = vpack.c.bf16 %v2282_v5, %v2282_v5  ;;  %v6927_v36 = vld [vmem:[%s9389_s3 + $0x40] sm:$0xff]  ;;  %v9645_v25 = vld [vmem:[#allocation21_spill] sm:$0xff]  ;;  %4903 = vmatpush.bf16.msra.mxu2 %v6938_v10 }
 0x439   : > { %v3591_v30 = vpack.c.bf16 %v2246_v60, %v2246_v60  ;;  %v3628_v7 = vpack.c.bf16 %v2283_v34, %v2283_v34  ;;  %v1652_v60 = vadd.f32 %v8167_v45, %v9645_v25  ;;  %4360 = vmatpush.bf16.msra.mxu3 %v6927_v36 }
 0x43a   : > { %v8199_v4 = vunpack.c.l.b16 %v3627_v53 }
 0x43b   : > { %v1558_v22 = vpop.f32.mrf.mxu0  ;;  %v8190_v26 = vunpack.c.l.b16 %v3591_v30  ;;  %v8194_v54 = vpop.f32.mrf.mxu2  ;;  %v8201_v24 = vunpack.c.l.b16 %v3628_v7  ;;  %vm1900_vm13 = vcmp.ge.f32.partialorder %v1652_v60, 0.0 }
 0x43c   : > { %v1559_v13 = vadd.f32 %v8167_v45, %v1558_v22  ;;  %9642 = vst [vmem:[#allocation128_spill] sm:$0xff] %v8194_v54  ;;  %v8215_v30 = vpop.f32.mrf.mxu3 }
 0x43d   : > { %9640 = vst [vmem:[#allocation126_spill] sm:$0xff] %v8190_v26 }
 0x43e   : > { %vm1863_vm11 = vcmp.ge.f32.partialorder %v1559_v13, 0.0  ;;  %v2055_v27 = vmul.f32 0.2, %v1559_v13  ;;  %9643 = vst [vmem:[#allocation129_spill] sm:$0xff] %v8199_v4 }
 0x43f   : > { %9644 = vst [vmem:[#allocation130_spill] sm:$0xff] %v8201_v24 }
 0x440   : > { %v2247_v29 = vsel %vm1863_vm11, %v1559_v13, %v2055_v27  ;;  %v9646_v13 = vld [vmem:[#allocation22_spill] sm:$0xff]  ;;  %9647 = vst [vmem:[#allocation21_spill] sm:$0xff] %v8215_v30 }
 0x441   : > { %v3592_v46 = vpack.c.bf16 %v2247_v29, %v2247_v29  ;;  %v1654_v27 = vadd.f32 %v8167_v45, %v9646_v13  ;;  %v2092_v29 = vmul.f32 0.2, %v1652_v60 }
 0x443   : > { %v8192_v15 = vunpack.c.l.b16 %v3592_v46  ;;  %v1561_v59 = vpop.f32.mrf.mxu0  ;;  %v2093_v46 = vmul.f32 0.2, %v1654_v27  ;;  %vm1901_vm14 = vcmp.ge.f32.partialorder %v1654_v27, 0.0  ;;  %v2284_v40 = vsel %vm1900_vm13, %v1652_v60, %v2092_v29  ;;  %v6942_v60 = vld [vmem:[%s9389_s3 + $0xb8] sm:$0xff] }
 0x444   : > { %v1562_v22 = vadd.f32 %v8167_v45, %v1561_v59  ;;  %v8220_v59 = vpop.f32.mrf.mxu2  ;;  %v8222_v26 = vpop.f32.mrf.mxu3  ;;  %5176 = vmatpush.bf16.msrb.mxu3 %v6942_v60  ;;  %v9656_v60 = vld [vmem:[#allocation26_spill] sm:$0xff] }
 0x445   : > { %9641 = vst [vmem:[#allocation127_spill] sm:$0xff] %v8192_v15  ;;  %v2285_v30 = vsel %vm1901_vm14, %v1654_v27, %v2093_v46  ;;  %v3629_v15 = vpack.c.bf16 %v2284_v40, %v2284_v40  ;;  %v9649_v40 = vld [vmem:[#allocation23_spill] sm:$0xff] }
 0x446   : > { %v2056_v5 = vmul.f32 0.2, %v1562_v22  ;;  %vm1864_vm12 = vcmp.ge.f32.partialorder %v1562_v22, 0.0  ;;  %v3630_v34 = vpack.c.bf16 %v2285_v30, %v2285_v30  ;;  %v1657_v27 = vadd.f32 %v8167_v45, %v9649_v40  ;;  %v9650_v30 = vld [vmem:[#allocation24_spill] sm:$0xff] }
 0x447   : > { %6585 = vmatmul.msk.bf16.gmra.mxu2 %vm3913_vm8, %v7223_v6  ;;  %v1664_v40 = vadd.f32 %v8167_v45, %v9656_v60  ;;  %v9658_v60 = vld [vmem:[#allocation27_spill] sm:$0xff] }
 0x448   : > { %v2248_v53 = vsel %vm1864_vm12, %v1562_v22, %v2056_v5  ;;  %v4252_v54 = vunpack.c.l.b16 %v3630_v34  ;;  %vm1902_vm0 = vcmp.ge.f32.partialorder %v1657_v27, 0.0 }
 0x449   : > { %v3593_v13 = vpack.c.bf16 %v2248_v53, %v2248_v53  ;;  %vm1905_vm4 = vcmp.ge.f32.partialorder %v1664_v40, 0.0 }
 0x44b   : > { %v1563_v6 = vpop.f32.mrf.mxu0  ;;  %v3870_v4 = vunpack.c.l.b16 %v3593_v13 }
 0x44c   : > { %v1564_v7 = vadd.f32 %v8167_v45, %v1563_v6  ;;  %v8226_v5 = vpop.f32.mrf.mxu2  ;;  %v4251_v6 = vunpack.c.l.b16 %v3629_v15  ;;  %v2094_v15 = vmul.f32 0.2, %v1657_v27  ;;  %v8241_v29 = vpop.f32.mrf.mxu3 }
 0x44e   : > { %vm1865_vm15 = vcmp.ge.f32.partialorder %v1564_v7, 0.0  ;;  %v2057_v25 = vmul.f32 0.2, %v1564_v7 }
 0x450   : > { %v2249_v36 = vsel %vm1865_vm15, %v1564_v7, %v2057_v25 }
 0x451   : > { %v3594_v10 = vpack.c.bf16 %v2249_v36, %v2249_v36 }
 0x453   : > { %v3871_v24 = vunpack.c.l.b16 %v3594_v10 }
 0x454   : > { %v8243_v53 = vpop.f32.mrf.mxu2  ;;  %v8245_v13 = vpop.f32.mrf.mxu3 }
 0x455   : > { %v8224_v22 = vpack.c.b16 %v3871_v24, %v3870_v4  ;;  %v1659_v4 = vadd.f32 %v8167_v45, %v9650_v30  ;;  %v8239_v24 = vpack.c.b16 %v4252_v54, %v4251_v6  ;;  %9652 = vst [vmem:[#allocation24_spill] sm:$0xff] %v8245_v13  ;;  %v9655_v54 = vld [vmem:[#allocation25_spill] sm:$0xff]  ;;  %v1667_v30 = vadd.f32 %v8167_v45, %v9658_v60 }
 0x456   : > { %v1662_v6 = vadd.f32 %v8167_v45, %v9655_v54 }
 0x457   : > { %9648 = vst [vmem:[#allocation22_spill] sm:$0xff] %v8224_v22  ;;  %6564 = vmatmul.msk.bf16.gmra.mxu3 %vm3913_vm8, %v8224_v22  ;;  %6586 = vmatmul.msk.bf16.gmra.mxu2 %vm3913_vm8, %v7253_v37  ;;  %v2095_v34 = vmul.f32 0.2, %v1659_v4  ;;  %vm1903_vm1 = vcmp.ge.f32.partialorder %v1659_v4, 0.0  ;;  %v2286_v37 = vsel %vm1902_vm0, %v1657_v27, %v2094_v15  ;;  %v2097_v15 = vmul.f32 0.2, %v1664_v40 }
 0x458   : > { %9651 = vst [vmem:[#allocation23_spill] sm:$0xff] %v8239_v24  ;;  %v3631_v7 = vpack.c.bf16 %v2286_v37, %v2286_v37  ;;  %vm1904_vm3 = vcmp.ge.f32.partialorder %v1662_v6, 0.0  ;;  %v9659_v22 = vld [vmem:[#allocation28_spill] sm:$0xff]  ;;  %vm1906_vm5 = vcmp.ge.f32.partialorder %v1667_v30, 0.0 }
 0x459   : > { %v2287_v46 = vsel %vm1903_vm1, %v1659_v4, %v2095_v34  ;;  %v2096_v4 = vmul.f32 0.2, %v1662_v6  ;;  %v2289_v37 = vsel %vm1905_vm4, %v1664_v40, %v2097_v15 }
 0x45a   : > { %v3632_v25 = vpack.c.bf16 %v2287_v46, %v2287_v46  ;;  %v8247_v36 = vunpack.c.l.b16 %v3631_v7 }
 0x45b   : > { %v2288_v34 = vsel %vm1904_vm3, %v1662_v6, %v2096_v4  ;;  %v1669_v6 = vadd.f32 %v8167_v45, %v9659_v22 }
 0x45c   : > { %9653 = vst [vmem:[#allocation131_spill] sm:$0xff] %v8247_v36  ;;  %v8249_v10 = vunpack.c.l.b16 %v3632_v25  ;;  %v8259_v27 = vpop.f32.mrf.mxu2  ;;  %v8263_v46 = vpop.f32.mrf.mxu3  ;;  %v3633_v7 = vpack.c.bf16 %v2288_v34, %v2288_v34  ;;  %v3634_v25 = vpack.c.bf16 %v2289_v37, %v2289_v37  ;;  %v2098_v34 = vmul.f32 0.2, %v1667_v30 }
 0x45d   : > { %9657 = vst [vmem:[#allocation25_spill] sm:$0xff] %v8263_v46  ;;  %v2099_v37 = vmul.f32 0.2, %v1669_v6  ;;  %vm1907_vm6 = vcmp.ge.f32.partialorder %v1669_v6, 0.0 }
 0x45e   : > { %9654 = vst [vmem:[#allocation132_spill] sm:$0xff] %v8249_v10  ;;  %v4253_v54 = vunpack.c.l.b16 %v3633_v7  ;;  %v2290_v7 = vsel %vm1906_vm5, %v1667_v30, %v2098_v34 }
 0x464   : > { %v8274_v40 = vpop.f32.mrf.mxu3 }
 0x467   : > { %6565 = vmatmul.msk.bf16.gmra.mxu3 %vm3913_vm8, %v7850_v50  ;;  %6587 = vmatmul.msk.bf16.gmra.mxu2 %vm3913_vm8, %v7283_v44  ;;  %v8265_v44 = vpop.f32.mrf.mxu2  ;;  %v4254_v50 = vunpack.c.l.b16 %v3634_v25 }
 0x469   : > { %v8278_v15 = vpack.c.b16 %v4254_v50, %v4253_v54  ;;  %v9664_v50 = vld [vmem:[#allocation29_spill] sm:$0xff]  ;;  %v9665_v54 = vld [vmem:[#allocation30_spill] sm:$0xff] }
 0x46a   : > { %v1672_v30 = vadd.f32 %v8167_v45, %v9664_v50 }
 0x46b   : > { %9660 = vst [vmem:[#allocation26_spill] sm:$0xff] %v8278_v15 }
 0x46c   : > { %v8282_v60 = vpop.f32.mrf.mxu3  ;;  %vm1908_vm7 = vcmp.ge.f32.partialorder %v1672_v30, 0.0 }
 0x477   : > { %6588 = vmatmul.msk.bf16.gmra.mxu2 %vm3913_vm8, %v7313_v1  ;;  %4361 = vmatmul.bf16.vlgmr.msra.gmra.mxu3 %v9618_v57  ;;  %v2291_v1 = vsel %vm1907_vm6, %v1669_v6, %v2099_v37  ;;  %v3635_v57 = vpack.c.bf16 %v2290_v7, %v2290_v7  ;;  %v1674_v6 = vadd.f32 %v8167_v45, %v9665_v54  ;;  %v2100_v7 = vmul.f32 0.2, %v1672_v30  ;;  %v6937_v54 = vld [vmem:[%s9389_s3 + $0x90] sm:$0xff] }
 0x478   : > { %v3636_v46 = vpack.c.bf16 %v2291_v1, %v2291_v1  ;;  %v8300_v1 = vpop.f32.mrf.mxu3  ;;  %4904 = vmatpush.bf16.msra.mxu2 %v6937_v54 }
 0x479   : > { %v8284_v13 = vunpack.c.l.b16 %v3635_v57  ;;  %vm1909_vm9 = vcmp.ge.f32.partialorder %v1674_v6, 0.0  ;;  %9666 = vst [vmem:[#allocation29_spill] sm:$0xff] %v8300_v1 }
 0x47a   : > { %v8276_v4 = vpop.f32.mrf.mxu2  ;;  %v8286_v22 = vunpack.c.l.b16 %v3636_v46  ;;  %v2101_v46 = vmul.f32 0.2, %v1674_v6 }
 0x47b   : > { %9662 = vst [vmem:[#allocation28_spill] sm:$0xff] %v8284_v13 }
 0x47c   : > { %9663 = vst [vmem:[#allocation133_spill] sm:$0xff] %v8286_v22  ;;  %v2293_v57 = vsel %vm1909_vm9, %v1674_v6, %v2101_v46  ;;  %v9667_v6 = vld [vmem:[#allocation31_spill] sm:$0xff]  ;;  %v1679_v46 = vadd.f32 %v8167_v45, %v7443_v33 }
 0x47d   : > { %v3638_v50 = vpack.c.bf16 %v2293_v57, %v2293_v57 }
 0x47e   : > { %vm1911_vm11 = vcmp.ge.f32.partialorder %v1679_v46, 0.0 }
 0x482   : > { %v8280_v25 = vpop.f32.mrf.mxu2 }
 0x483   : > { %9661 = vst [vmem:[#allocation27_spill] sm:$0xff] %v8280_v25  ;;  %v4256_v25 = vunpack.c.l.b16 %v3638_v50  ;;  %v2103_v50 = vmul.f32 0.2, %v1679_v46 }
 0x485   : > { %v2295_v37 = vsel %vm1911_vm11, %v1679_v46, %v2103_v50 }
 0x486   : > { %v3640_v13 = vpack.c.bf16 %v2295_v37, %v2295_v37  ;;  %v9676_v37 = vld [vmem:[#allocation34_spill] sm:$0xff] }
 0x487   : > { %6589 = vmatmul.msk.bf16.gmra.mxu2 %vm3913_vm8, %v7343_v11  ;;  %6613 = vmatmul.msk.bf16.gmra.mxu3 %vm3913_vm8, %v7942_v41  ;;  %v2292_v11 = vsel %vm1908_vm7, %v1672_v30, %v2100_v7  ;;  %v6941_v30 = vld [vmem:[%s9389_s3 + $0xb0] sm:$0xff]  ;;  %v1677_v7 = vadd.f32 %v8167_v45, %v9667_v6 }
 0x488   : > { %v3637_v36 = vpack.c.bf16 %v2292_v11, %v2292_v11  ;;  %v8318_v11 = vpop.f32.mrf.mxu3  ;;  %5177 = vmatpush.bf16.msrb.mxu3 %v6941_v30  ;;  %v9673_v30 = vld [vmem:[#allocation33_spill] sm:$0xff] }
 0x489   : > { %9668 = vst [vmem:[#allocation30_spill] sm:$0xff] %v8318_v11  ;;  %vm1910_vm10 = vcmp.ge.f32.partialorder %v1677_v7, 0.0  ;;  %v8330_v11 = vunpack.c.l.b16 %v3640_v13 }
 0x48a   : > { %v8296_v34 = vpop.f32.mrf.mxu2  ;;  %v4255_v10 = vunpack.c.l.b16 %v3637_v36 }
 0x48b   : > { %9671 = vst [vmem:[#allocation135_spill] sm:$0xff] %v8330_v11 }
 0x48c   : > { %v8322_v57 = vpack.c.b16 %v4256_v25, %v4255_v10  ;;  %v9672_v10 = vld [vmem:[#allocation32_spill] sm:$0xff] }
 0x48d   : > { %v1682_v25 = vadd.f32 %v8167_v45, %v9672_v10 }
 0x48f   : > { %vm1912_vm12 = vcmp.ge.f32.partialorder %v1682_v25, 0.0 }
 0x492   : > { %v8302_v41 = vpop.f32.mrf.mxu2 }
 0x497   : > { %6590 = vmatmul.msk.bf16.gmra.mxu2 %vm3913_vm8, %v7376_v32  ;;  %6614 = vmatmul.msk.bf16.gmra.mxu3 %vm3913_vm8, %v7985_v38  ;;  %v2102_v32 = vmul.f32 0.2, %v1677_v7  ;;  %v8324_v38 = vpop.f32.mrf.mxu3 }
 0x498   : > { %9669 = vst [vmem:[#allocation31_spill] sm:$0xff] %v8324_v38 }
 0x499   : > { %v2294_v54 = vsel %vm1910_vm10, %v1677_v7, %v2102_v32  ;;  %v1684_v7 = vadd.f32 %v8167_v45, %v9673_v30  ;;  %v2104_v32 = vmul.f32 0.2, %v1682_v25 }
 0x49a   : > { %v8320_v36 = vpop.f32.mrf.mxu2  ;;  %v3639_v6 = vpack.c.bf16 %v2294_v54, %v2294_v54 }
 0x49b   : > { %v2105_v13 = vmul.f32 0.2, %v1684_v7  ;;  %vm1913_vm13 = vcmp.ge.f32.partialorder %v1684_v7, 0.0 }
 0x49c   : > { %v8328_v33 = vunpack.c.l.b16 %v3639_v6 }
 0x49d   : > { %v2297_v54 = vsel %vm1913_vm13, %v1684_v7, %v2105_v13 }
 0x49e   : > { %9670 = vst [vmem:[#allocation134_spill] sm:$0xff] %v8328_v33  ;;  %v3642_v10 = vpack.c.bf16 %v2297_v54, %v2297_v54 }
 0x49f   : > { %v8344_v50 = vpop.f32.mrf.mxu3 }
 0x4a0   : > { %9674 = vst [vmem:[#allocation32_spill] sm:$0xff] %v8344_v50  ;;  %v4258_v22 = vunpack.c.l.b16 %v3642_v10  ;;  %v1687_v50 = vadd.f32 %v8167_v45, %v9676_v37 }
 0x4a2   : > { %v8326_v1 = vpop.f32.mrf.mxu2  ;;  %v2106_v13 = vmul.f32 0.2, %v1687_v50  ;;  %vm1914_vm14 = vcmp.ge.f32.partialorder %v1687_v50, 0.0 }
 0x4a7   : > { %6591 = vmatmul.msk.bf16.gmra.mxu2 %vm3913_vm8, %v7420_v43  ;;  %6615 = vmatmul.msk.bf16.gmra.mxu3 %vm3913_vm8, %v8044_v9  ;;  %v2296_v43 = vsel %vm1912_vm12, %v1682_v25, %v2104_v32  ;;  %v8348_v9 = vpop.f32.mrf.mxu3  ;;  %v1689_v25 = vadd.f32 %v8167_v45, %v7477_v61  ;;  %v9680_v61 = vld [vmem:[#allocation35_spill] sm:$0xff] }
 0x4a8   : > { %v3641_v38 = vpack.c.bf16 %v2296_v43, %v2296_v43  ;;  %9675 = vst [vmem:[#allocation33_spill] sm:$0xff] %v8348_v9 }
 0x4a9   : > { %v2107_v43 = vmul.f32 0.2, %v1689_v25  ;;  %vm1915_vm15 = vcmp.ge.f32.partialorder %v1689_v25, 0.0 }
 0x4aa   : > { %v8340_v46 = vpop.f32.mrf.mxu2  ;;  %v4257_v30 = vunpack.c.l.b16 %v3641_v38  ;;  %v2298_v38 = vsel %vm1914_vm14, %v1687_v50, %v2106_v13  ;;  %v9681_v50 = vld [vmem:[#allocation36_spill] sm:$0xff] }
 0x4ab   : > { %v2299_v54 = vsel %vm1915_vm15, %v1689_v25, %v2107_v43 }
 0x4ac   : > { %v8360_v32 = vpack.c.b16 %v4258_v22, %v4257_v30  ;;  %v3644_v33 = vpack.c.bf16 %v2299_v54, %v2299_v54  ;;  %v1692_v22 = vadd.f32 %v8167_v45, %v9680_v61  ;;  %v1694_v30 = vadd.f32 %v8167_v45, %v9681_v50  ;;  %v6936_v50 = vld [vmem:[%s9389_s3 + $0x88] sm:$0xff] }
 0x4ad   : > { %4905 = vmatpush.bf16.msra.mxu2 %v6936_v50 }
 0x4ae   : > { %v8368_v11 = vunpack.c.l.b16 %v3644_v33  ;;  %v2108_v33 = vmul.f32 0.2, %v1692_v22  ;;  %v2109_v43 = vmul.f32 0.2, %v1694_v30  ;;  %vm1916_vm0 = vcmp.ge.f32.partialorder %v1692_v22, 0.0 }
 0x4af   : > { %vm1917_vm1 = vcmp.ge.f32.partialorder %v1694_v30, 0.0 }
 0x4b0   : > { %9679 = vst [vmem:[#allocation137_spill] sm:$0xff] %v8368_v11 }
 0x4b2   : > { %v8346_v6 = vpop.f32.mrf.mxu2 }
 0x4b7   : > { %6592 = vmatmul.msk.bf16.gmra.mxu2 %vm3913_vm8, %v7451_v16  ;;  %6616 = vmatmul.msk.bf16.gmra.mxu3 %vm3913_vm8, %v8088_v3  ;;  %v8362_v16 = vpop.f32.mrf.mxu3  ;;  %v3643_v3 = vpack.c.bf16 %v2298_v38, %v2298_v38  ;;  %v2301_v38 = vsel %vm1917_vm1, %v1694_v30, %v2109_v43  ;;  %v9684_v30 = vld [vmem:[#allocation37_spill] sm:$0xff]  ;;  %v1699_v43 = vadd.f32 %v8167_v45, %v7511_v51  ;;  %v6935_v51 = vld [vmem:[%s9389_s3 + $0x80] sm:$0xff] }
 0x4b8   : > { %9677 = vst [vmem:[#allocation34_spill] sm:$0xff] %v8362_v16  ;;  %v3646_v16 = vpack.c.bf16 %v2301_v38, %v2301_v38  ;;  %4906 = vmatpush.bf16.msra.mxu2 %v6935_v51 }
 0x4b9   : > { %v8366_v37 = vunpack.c.l.b16 %v3643_v3  ;;  %vm1919_vm4 = vcmp.ge.f32.partialorder %v1699_v43, 0.0 }
 0x4ba   : > { %v8358_v7 = vpop.f32.mrf.mxu2  ;;  %v4260_v9 = vunpack.c.l.b16 %v3646_v16 }
 0x4bb   : > { %9678 = vst [vmem:[#allocation136_spill] sm:$0xff] %v8366_v37 }
 0x4bf   : > { %v8378_v25 = vpop.f32.mrf.mxu3 }
 0x4c0   : > { %9682 = vst [vmem:[#allocation35_spill] sm:$0xff] %v8378_v25 }
 0x4c2   : > { %v8364_v10 = vpop.f32.mrf.mxu2 }
 0x4c7   : > { %6593 = vmatmul.msk.bf16.gmra.mxu2 %vm3913_vm8, %v7485_v42  ;;  %6617 = vmatmul.msk.bf16.gmra.mxu3 %vm3913_vm8, %v8132_v31  ;;  %v2300_v42 = vsel %vm1916_vm0, %v1692_v22, %v2108_v33  ;;  %v8384_v54 = vpop.f32.mrf.mxu3  ;;  %v6940_v22 = vld [vmem:[%s9389_s3 + $0xa8] sm:$0xff]  ;;  %v1697_v33 = vadd.f32 %v8167_v45, %v9684_v30 }
 0x4c8   : > { %9683 = vst [vmem:[#allocation36_spill] sm:$0xff] %v8384_v54  ;;  %v3645_v61 = vpack.c.bf16 %v2300_v42, %v2300_v42  ;;  %5178 = vmatpush.bf16.msrb.mxu3 %v6940_v22 }
 0x4c9   : > { %vm1918_vm3 = vcmp.ge.f32.partialorder %v1697_v33, 0.0 }
 0x4ca   : > { %v8380_v13 = vpop.f32.mrf.mxu2  ;;  %v4259_v25 = vunpack.c.l.b16 %v3645_v61  ;;  %v2111_v61 = vmul.f32 0.2, %v1699_v43 }
 0x4cc   : > { %v8406_v38 = vpack.c.b16 %v4260_v9, %v4259_v25  ;;  %v2303_v3 = vsel %vm1919_vm4, %v1699_v43, %v2111_v61  ;;  %v9689_v25 = vld [vmem:[#allocation38_spill] sm:$0xff]  ;;  %v9690_v43 = vld [vmem:[#allocation39_spill] sm:$0xff] }
 0x4cd   : > { %v3648_v30 = vpack.c.bf16 %v2303_v3, %v2303_v3 }
 0x4cf   : > { %v8417_v9 = vunpack.c.l.b16 %v3648_v30 }
 0x4d1   : > { %9688 = vst [vmem:[#allocation140_spill] sm:$0xff] %v8417_v9 }
 0x4d2   : > { %v8386_v31 = vpop.f32.mrf.mxu2 }
 0x4d7   : > { %6594 = vmatmul.msk.bf16.gmra.mxu2 %vm3913_vm8, %v7519_v52  ;;  %6618 = vmatmul.msk.bf16.gmra.mxu3 %vm3913_vm8, %v8183_v49  ;;  %v2110_v52 = vmul.f32 0.2, %v1697_v33 }
 0x4d9   : > { %v2302_v50 = vsel %vm1918_vm3, %v1697_v33, %v2110_v52  ;;  %v1702_v33 = vadd.f32 %v8167_v45, %v9689_v25  ;;  %v1704_v52 = vadd.f32 %v8167_v45, %v9690_v43 }
 0x4da   : > { %v8402_v42 = vpop.f32.mrf.mxu3  ;;  %v8404_v16 = vpop.f32.mrf.mxu2  ;;  %v3647_v22 = vpack.c.bf16 %v2302_v50, %v2302_v50  ;;  %v9692_v50 = vld [vmem:[#allocation40_spill] sm:$0xff] }
 0x4db   : > { %9685 = vst [vmem:[#allocation37_spill] sm:$0xff] %v8402_v42  ;;  %v2112_v51 = vmul.f32 0.2, %v1702_v33  ;;  %vm1920_vm5 = vcmp.ge.f32.partialorder %v1702_v33, 0.0  ;;  %vm1921_vm6 = vcmp.ge.f32.partialorder %v1704_v52, 0.0 }
 0x4dc   : > { %v8415_v11 = vunpack.c.l.b16 %v3647_v22  ;;  %v2113_v22 = vmul.f32 0.2, %v1704_v52 }
 0x4de   : > { %9687 = vst [vmem:[#allocation139_spill] sm:$0xff] %v8415_v11  ;;  %v2305_v30 = vsel %vm1921_vm6, %v1704_v52, %v2113_v22  ;;  %v1707_v11 = vadd.f32 %v8167_v45, %v9692_v50  ;;  %v4130_v52 = vadd.f32 %v8296_v34, %v7966_v14  ;;  %v4132_v50 = vadd.f32 %v8302_v41, %v7987_v12  ;;  %v9694_v41 = vld [vmem:[#allocation41_spill] sm:$0xff] }
 0x4df   : > { %v3650_v42 = vpack.c.bf16 %v2305_v30, %v2305_v30  ;;  %v1712_v12 = vadd.f32 %v8167_v45, %v9694_v41 }
 0x4e0   : > { %vm1922_vm7 = vcmp.ge.f32.partialorder %v1707_v11, 0.0 }
 0x4e1   : > { %v4262_v54 = vunpack.c.l.b16 %v3650_v42  ;;  %vm1924_vm10 = vcmp.ge.f32.partialorder %v1712_v12, 0.0 }
 0x4e2   : > { %v8408_v49 = vpop.f32.mrf.mxu3  ;;  %v8410_v37 = vpop.f32.mrf.mxu2 }
 0x4e3   : > { %9686 = vst [vmem:[#allocation138_spill] sm:$0xff] %v8408_v49 }
 0x4e7   : > { %6595 = vmatmul.msk.bf16.gmra.mxu2 %vm3913_vm8, %v7553_v23  ;;  %6619 = vmatmul.msk.bf16.gmra.mxu3 %vm3913_vm8, %v8239_v24  ;;  %v2304_v23 = vsel %vm1920_vm5, %v1702_v33, %v2112_v51  ;;  %v1709_v33 = vadd.f32 %v8167_v45, %v7545_v58 }
 0x4e8   : > { %v3649_v25 = vpack.c.bf16 %v2304_v23, %v2304_v23 }
 0x4e9   : > { %v2115_v30 = vmul.f32 0.2, %v1709_v33  ;;  %vm1923_vm9 = vcmp.ge.f32.partialorder %v1709_v33, 0.0 }
 0x4ea   : > { %v8427_v61 = vpop.f32.mrf.mxu3  ;;  %v8429_v3 = vpop.f32.mrf.mxu2  ;;  %v4261_v43 = vunpack.c.l.b16 %v3649_v25 }
 0x4ec   : > { %v8451_v42 = vpack.c.b16 %v4262_v54, %v4261_v43  ;;  %v9695_v43 = vld [vmem:[#allocation42_spill] sm:$0xff] }
 0x4f2   : > { %v8433_v24 = vpop.f32.mrf.mxu3  ;;  %v8435_v49 = vpop.f32.mrf.mxu2 }
 0x4f3   : > { %9691 = vst [vmem:[#allocation38_spill] sm:$0xff] %v8433_v24 }
 0x4f7   : > { %6596 = vmatmul.msk.bf16.gmra.mxu2 %vm3913_vm8, %v7587_v19  ;;  %6620 = vmatmul.msk.bf16.gmra.mxu3 %vm3913_vm8, %v8278_v15  ;;  %v2114_v19 = vmul.f32 0.2, %v1707_v11  ;;  %v2307_v15 = vsel %vm1923_vm9, %v1709_v33, %v2115_v30 }
 0x4f8   : > { %v3652_v34 = vpack.c.bf16 %v2307_v15, %v2307_v15  ;;  %v1714_v15 = vadd.f32 %v8167_v45, %v9695_v43 }
 0x4f9   : > { %v2306_v25 = vsel %vm1922_vm7, %v1707_v11, %v2114_v19  ;;  %v9693_v11 = vpack.c.b16 %v7651_v63, %v7649_v48  ;;  %v2116_v63 = vmul.f32 0.2, %v1712_v12 }
 0x4fa   : > { %v8447_v51 = vpop.f32.mrf.mxu2  ;;  %v4362_v22 = vpop.f32.mrf.mxu3  ;;  %v3651_v14 = vpack.c.bf16 %v2306_v25, %v2306_v25  ;;  %v8461_v54 = vunpack.c.l.b16 %v3652_v34  ;;  %v2117_v48 = vmul.f32 0.2, %v1714_v15  ;;  %vm1925_vm11 = vcmp.ge.f32.partialorder %v1714_v15, 0.0 }
 0x4fb   : > { %v8449_v23 = vadd.f32 %v4362_v22, %v4130_v52  ;;  %v2308_v25 = vsel %vm1924_vm10, %v1712_v12, %v2116_v63 }
 0x4fc   : > { %v8459_v52 = vunpack.c.l.b16 %v3651_v14  ;;  %v4137_v14 = vadd.f32 %v8326_v1, %v8023_v28  ;;  %v6939_v28 = vld [vmem:[%s9389_s3 + $0xa0] sm:$0xff]  ;;  %v4140_v1 = vadd.f32 %v8340_v46, %v8042_v56  ;;  %v9697_v56 = vpack.c.b16 %v7729_v8, %v7727_v39 }
 0x4fd   : > { %5179 = vmatpush.bf16.msrb.mxu3 %v6939_v28  ;;  %v4145_v46 = vadd.f32 %v8358_v7, %v8072_v20  ;;  %v9698_v39 = vpack.c.b16 %v7757_v17, %v7755_v62  ;;  %v9699_v8 = vld [vmem:[#allocation11_spill] sm:$0xff] }
 0x4fe   : > { %v4150_v20 = vadd.f32 %v8380_v13, %v9699_v8 }
 0x502   : > { %v8455_v58 = vpop.f32.mrf.mxu2  ;;  %v4364_v9 = vpop.f32.mrf.mxu3 }
 0x503   : > { %v8457_v24 = vadd.f32 %v4364_v9, %v4132_v50  ;;  %v4135_v9 = vadd.f32 %v8320_v36, %v8001_v35  ;;  %v2309_v50 = vsel %vm1925_vm11, %v1714_v15, %v2117_v48  ;;  %v3653_v36 = vpack.c.bf16 %v2308_v25, %v2308_v25 }
 0x505   : > { %v4263_v43 = vunpack.c.l.b16 %v3653_v36 }
 0x507   : > { %6621 = vmatmul.msk.bf16.gmra.mxu3 %vm3913_vm8, %v8322_v57  ;;  %6676 = vmatmul.msk.bf16.vlgmr.msra.gmra.mxu2 %vm3913_vm8, %v9693_v11  ;;  %v3654_v11 = vpack.c.bf16 %v2309_v50, %v2309_v50 }
 0x50a   : > { %v8475_v33 = vpop.f32.mrf.mxu2  ;;  %v4367_v22 = vpop.f32.mrf.mxu3 }
 0x50b   : > { %v8477_v19 = vadd.f32 %v4367_v22, %v4135_v9  ;;  %v4264_v9 = vunpack.c.l.b16 %v3654_v11  ;;  %v9696_v22 = vpack.c.b16 %v7697_v2, %v7695_v55  ;;  %v4142_v55 = vadd.f32 %v8346_v6, %v8050_v18 }
 0x50c   : > { %v4147_v6 = vadd.f32 %v8364_v10, %v8077_v0 }
 0x50d   : > { %v8502_v48 = vpack.c.b16 %v4264_v9, %v4263_v43  ;;  %v6882_v9 = vld [vmem:[%s7054_s11 + $0x1e0] sm:$0xff] }
 0x50e   : > { %6499 = vmatmul.msk.bf16.gmra.mxu0 %vm961_vm2, %v6882_v9 }
 0x512   : > { %v8483_v34 = vpop.f32.mrf.mxu2  ;;  %v4369_v35 = vpop.f32.mrf.mxu3 }
 0x513   : > { %v8485_v41 = vadd.f32 %v4369_v35, %v4137_v14 }
 0x517   : > { %6622 = vmatmul.msk.bf16.gmra.mxu3 %vm3913_vm8, %v8360_v32  ;;  %6677 = vmatmul.msk.bf16.gmra.mxu2 %vm3913_vm8, %v9696_v22  ;;  %v9700_v22 = vld [vmem:[#allocation118_spill] sm:$0xff] }
 0x518   : > { %v4152_v28 = vadd.f32 %v8386_v31, %v9700_v22  ;;  %v9702_v31 = vld [vmem:[#allocation69_spill] sm:$0xff]  ;;  %v9704_v22 = vld [vmem:[#allocation14_spill] sm:$0xff] }
 0x51a   : > { %v8498_v12 = vpop.f32.mrf.mxu2  ;;  %v4372_v15 = vpop.f32.mrf.mxu3 }
 0x51b   : > { %v8500_v63 = vadd.f32 %v4372_v15, %v4140_v1  ;;  %v1722_v1 = vadd.f32 %v8167_v45, %v8222_v26  ;;  %v1724_v15 = vadd.f32 %v8167_v45, %v8241_v29  ;;  %v4155_v26 = vadd.f32 %v8404_v16, %v8114_v21 }
 0x51c   : > { %v1734_v21 = vadd.f32 %v8167_v45, %v8282_v60  ;;  %v9707_v60 = vld [vmem:[#allocation75_spill] sm:$0xff] }
 0x51d   : > { %v2120_v13 = vmul.f32 0.2, %v1722_v1  ;;  %vm1928_vm2 = vcmp.ge.f32.partialorder %v1722_v1, 0.0  ;;  %vm1929_vm12 = vcmp.ge.f32.partialorder %v1724_v15, 0.0 }
 0x51e   : > { %vm1933_vm14 = vcmp.ge.f32.partialorder %v1734_v21, 0.0 }
 0x51f   : > { %v2312_v29 = vsel %vm1928_vm2, %v1722_v1, %v2120_v13  ;;  %v6950_v13 = vld [vmem:[%s9389_s3 + $0xf8] sm:$0xff] }
 0x520   : > { %5482 = vmatpush.bf16.msrb.mxu2 %v6950_v13  ;;  %v9710_v13 = vld [vmem:[#allocation17_spill] sm:$0xff] }
 0x522   : > { %v8506_v2 = vpop.f32.mrf.mxu2  ;;  %v4374_v25 = vpop.f32.mrf.mxu3 }
 0x523   : > { %v8508_v50 = vadd.f32 %v4374_v25, %v4142_v55  ;;  %v2121_v25 = vmul.f32 0.2, %v1724_v15 }
 0x527   : > { %6623 = vmatmul.msk.bf16.gmra.mxu3 %vm3913_vm8, %v8406_v38  ;;  %6678 = vmatmul.msk.bf16.gmra.mxu2 %vm3913_vm8, %v9697_v56  ;;  %v9701_v56 = vld [vmem:[#allocation70_spill] sm:$0xff] }
 0x52a   : > { %v8518_v14 = vpop.f32.mrf.mxu2  ;;  %v4377_v35 = vpop.f32.mrf.mxu3 }
 0x52b   : > { %v8520_v18 = vadd.f32 %v4377_v35, %v4145_v46  ;;  %v9703_v46 = vpack.c.b16 %v9701_v56, %v9702_v31  ;;  %v2313_v35 = vsel %vm1929_vm12, %v1724_v15, %v2121_v25 }
 0x52c   : > { %v3658_v8 = vpack.c.bf16 %v2313_v35, %v2313_v35 }
 0x532   : > { %v8524_v36 = vpop.f32.mrf.mxu2  ;;  %v4379_v11 = vpop.f32.mrf.mxu3 }
 0x533   : > { %v8526_v43 = vadd.f32 %v4379_v11, %v4147_v6 }
 0x537   : > { %6624 = vmatmul.msk.bf16.gmra.mxu3 %vm3913_vm8, %v8451_v42  ;;  %6679 = vmatmul.msk.bf16.gmra.mxu2 %vm3913_vm8, %v9698_v39  ;;  %v3657_v39 = vpack.c.bf16 %v2312_v29, %v2312_v29 }
 0x53a   : > { %v8538_v0 = vpop.f32.mrf.mxu2  ;;  %v4382_v7 = vpop.f32.mrf.mxu3 }
 0x53b   : > { %v8540_v10 = vadd.f32 %v4382_v7, %v4150_v20  ;;  %v4265_v20 = vunpack.c.l.b16 %v3657_v39  ;;  %v4266_v7 = vunpack.c.l.b16 %v3658_v8 }
 0x53d   : > { %v8577_v25 = vpack.c.b16 %v4266_v7, %v4265_v20 }
 0x53f   : > { %9705 = vst [vmem:[#allocation39_spill] sm:$0xff] %v8577_v25 }
 0x542   : > { %v8548_v62 = vpop.f32.mrf.mxu2  ;;  %v4384_v17 = vpop.f32.mrf.mxu3 }
 0x543   : > { %v8550_v55 = vadd.f32 %v4384_v17, %v4152_v28  ;;  %v4157_v28 = vadd.f32 %v8410_v37, %v9704_v22  ;;  %v1732_v17 = vadd.f32 %v8167_v45, %v8274_v40  ;;  %v2125_v37 = vmul.f32 0.2, %v1734_v21  ;;  %v9706_v40 = vld [vmem:[#allocation76_spill] sm:$0xff] }
 0x544   : > { %v9708_v31 = vpack.c.b16 %v9706_v40, %v9707_v60  ;;  %v4162_v40 = vadd.f32 %v8435_v49, %v9710_v13 }
 0x545   : > { %v2124_v56 = vmul.f32 0.2, %v1732_v17  ;;  %vm1932_vm13 = vcmp.ge.f32.partialorder %v1732_v17, 0.0 }
 0x547   : > { %6625 = vmatmul.msk.bf16.gmra.mxu3 %vm3913_vm8, %v8502_v48  ;;  %6680 = vmatmul.msk.bf16.gmra.mxu2 %vm3913_vm8, %v9703_v46  ;;  %v6954_v46 = vld [vmem:[%s9389_s3 + $0x118] sm:$0xff]  ;;  %v2316_v35 = vsel %vm1932_vm13, %v1732_v17, %v2124_v56  ;;  %v9712_v17 = vld [vmem:[#allocation83_spill] sm:$0xff] }
 0x548   : > { %5635 = vmatpush.bf16.msra.mxu3 %v6954_v46  ;;  %v3661_v7 = vpack.c.bf16 %v2316_v35, %v2316_v35 }
 0x54a   : > { %v8560_v6 = vpop.f32.mrf.mxu2  ;;  %v4387_v11 = vpop.f32.mrf.mxu3 }
 0x54b   : > { %v8562_v9 = vadd.f32 %v4387_v11, %v4155_v26  ;;  %v9709_v26 = vld [vmem:[#allocation16_spill] sm:$0xff]  ;;  %v2317_v11 = vsel %vm1933_vm14, %v1734_v21, %v2125_v37  ;;  %v9713_v21 = vld [vmem:[#allocation82_spill] sm:$0xff]  ;;  %v4165_v37 = vadd.f32 %v8447_v51, %v8162_v47  ;;  %v9718_v51 = vld [vmem:[#allocation93_spill] sm:$0xff] }
 0x54c   : > { %v4160_v29 = vadd.f32 %v8429_v3, %v9709_v26  ;;  %v3662_v22 = vpack.c.bf16 %v2317_v11, %v2317_v11  ;;  %v9714_v56 = vpack.c.b16 %v9712_v17, %v9713_v21  ;;  %v9716_v11 = vld [vmem:[#allocation99_spill] sm:$0xff]  ;;  %v9721_v17 = vld [vmem:[#allocation4_spill] sm:$0xff] }
 0x552   : > { %v8570_v16 = vpop.f32.mrf.mxu2  ;;  %v4389_v1 = vpop.f32.mrf.mxu3 }
 0x553   : > { %v8572_v15 = vadd.f32 %v4389_v1, %v4157_v28  ;;  %v4267_v28 = vunpack.c.l.b16 %v3661_v7  ;;  %v4268_v1 = vunpack.c.l.b16 %v3662_v22 }
 0x555   : > { %v8600_v3 = vpack.c.b16 %v4268_v1, %v4267_v28  ;;  %v9717_v1 = vld [vmem:[#allocation96_spill] sm:$0xff] }
 0x556   : > { %v1507_v13 = vadd.f32 %v8167_v45, %v9717_v1 }
 0x557   : > { %6626 = vmatmul.msk.bf16.gmra.mxu3 %vm3913_vm8, %v8577_v25  ;;  %6681 = vmatmul.msk.bf16.gmra.mxu2 %vm3913_vm8, %v9708_v31  ;;  %9711 = vst [vmem:[#allocation40_spill] sm:$0xff] %v8600_v3 }
 0x558   : > { %vm1842_vm0 = vcmp.ge.f32.partialorder %v1507_v13, 0.0 }
 0x55a   : > { %v8590_v39 = vpop.f32.mrf.mxu2  ;;  %v4392_v8 = vpop.f32.mrf.mxu3 }
 0x55b   : > { %v8592_v20 = vadd.f32 %v4392_v8, %v4160_v29  ;;  %v9715_v29 = vld [vmem:[#allocation20_spill] sm:$0xff]  ;;  %v1509_v8 = vadd.f32 %v8167_v45, %v9716_v11 }
 0x55c   : > { %v4167_v35 = vadd.f32 %v8455_v58, %v9715_v29  ;;  %v9722_v58 = vld [vmem:[#allocation3_spill] sm:$0xff] }
 0x55d   : > { %v2035_v47 = vmul.f32 0.2, %v1509_v8  ;;  %vm1843_vm15 = vcmp.ge.f32.partialorder %v1509_v8, 0.0  ;;  %v9723_v21 = vpack.c.b16 %v9721_v17, %v9722_v58  ;;  %v4172_v17 = vadd.f32 %v8483_v34, %v8220_v59 }
 0x55f   : > { %v2227_v29 = vsel %vm1843_vm15, %v1509_v8, %v2035_v47  ;;  %v9725_v8 = vld [vmem:[#allocation103_spill] sm:$0xff]  ;;  %v9726_v47 = vld [vmem:[#allocation102_spill] sm:$0xff] }
 0x562   : > { %v8596_v60 = vpop.f32.mrf.mxu2  ;;  %v4394_v31 = vpop.f32.mrf.mxu3 }
 0x563   : > { %v8598_v30 = vadd.f32 %v4394_v31, %v4162_v40  ;;  %v9719_v40 = vld [vmem:[#allocation92_spill] sm:$0xff] }
 0x564   : > { %v9720_v31 = vpack.c.b16 %v9718_v51, %v9719_v40  ;;  %v3572_v51 = vpack.c.bf16 %v2227_v29, %v2227_v29 }
 0x567   : > { %6627 = vmatmul.msk.bf16.gmra.mxu3 %vm3913_vm8, %v8600_v3  ;;  %6682 = vmatmul.msk.bf16.gmra.mxu2 %vm3913_vm8, %v9714_v56  ;;  %v2034_v56 = vmul.f32 0.2, %v1507_v13 }
 0x569   : > { %v2226_v1 = vsel %vm1842_vm0, %v1507_v13, %v2034_v56  ;;  %v4175_v13 = vadd.f32 %v8498_v12, %v8226_v5  ;;  %v9728_v56 = vld [vmem:[#allocation43_spill] sm:$0xff]  ;;  %v9730_v12 = vld [vmem:[#allocation110_spill] sm:$0xff] }
 0x56a   : > { %v8610_v46 = vpop.f32.mrf.mxu2  ;;  %v4397_v49 = vpop.f32.mrf.mxu3  ;;  %v3571_v40 = vpack.c.bf16 %v2226_v1, %v2226_v1  ;;  %v4715_v59 = vadd.f32 %v9728_v56, %v8449_v23  ;;  %v9729_v1 = vld [vmem:[#allocation44_spill] sm:$0xff] }
 0x56b   : > { %v8612_v26 = vadd.f32 %v4397_v49, %v4165_v37  ;;  %v9724_v37 = vld [vmem:[#allocation128_spill] sm:$0xff] }
 0x56c   : > { %v4170_v49 = vadd.f32 %v8475_v33, %v9724_v37  ;;  %v4795_v3 = vunpack.c.l.b16 %v3571_v40  ;;  %v9727_v37 = vpack.c.b16 %v9725_v8, %v9726_v47  ;;  %v6949_v23 = vld [vmem:[%s9389_s3 + $0xf0] sm:$0xff]  ;;  %v4180_v47 = vadd.f32 %v8518_v14, %v8259_v27 }
 0x56d   : > { %5483 = vmatpush.bf16.msrb.mxu2 %v6949_v23  ;;  %v9739_v14 = vld [vmem:[#allocation8_spill] sm:$0xff] }
 0x572   : > { %v8618_v7 = vpop.f32.mrf.mxu2  ;;  %v4399_v22 = vpop.f32.mrf.mxu3 }
 0x573   : > { %v8620_v28 = vadd.f32 %v4399_v22, %v4167_v35 }
 0x577   : > { %6683 = vmatmul.msk.bf16.gmra.mxu2 %vm3913_vm8, %v9720_v31  ;;  %6708 = vmatmul.msk.bf16.vlgmr.msrb.gmra.mxu3 %vm3913_vm8, %v9723_v21  ;;  %v4796_v31 = vunpack.c.l.b16 %v3572_v51  ;;  %v4716_v51 = vadd.f32 %v9729_v1, %v8457_v24  ;;  %v6953_v24 = vld [vmem:[%s9389_s3 + $0x110] sm:$0xff]  ;;  %v9737_v1 = vld [vmem:[#allocation46_spill] sm:$0xff] }
 0x578   : > { %5636 = vmatpush.bf16.msra.mxu3 %v6953_v24 }
 0x579   : > { %v4819_v33 = vpack.c.b16 %v4796_v31, %v4795_v3  ;;  %v4177_v3 = vadd.f32 %v8506_v2, %v8243_v53  ;;  %v9733_v53 = vld [vmem:[#allocation112_spill] sm:$0xff]  ;;  %v9734_v2 = vld [vmem:[#allocation111_spill] sm:$0xff] }
 0x57a   : > { %v8634_v35 = vpop.f32.mrf.mxu2  ;;  %v4402_v11 = vpop.f32.mrf.mxu3  ;;  %v9735_v8 = vpack.c.b16 %v9733_v53, %v9734_v2 }
 0x57b   : > { %v8636_v22 = vadd.f32 %v4402_v11, %v4170_v49 }
 0x582   : > { %v8640_v58 = vpop.f32.mrf.mxu2  ;;  %v4404_v21 = vpop.f32.mrf.mxu3 }
 0x583   : > { %v8642_v25 = vadd.f32 %v4404_v21, %v4172_v17  ;;  %v9731_v21 = vld [vmem:[#allocation109_spill] sm:$0xff] }
 0x587   : > { %6684 = vmatmul.msk.bf16.gmra.mxu2 %vm3913_vm8, %v4819_v33  ;;  %6709 = vmatmul.msk.bf16.gmra.mxu3 %vm3913_vm8, %v9727_v37  ;;  %v9732_v33 = vpack.c.b16 %v9730_v12, %v9731_v21  ;;  %v9736_v37 = vld [vmem:[#allocation45_spill] sm:$0xff]  ;;  %v9741_v21 = vld [vmem:[#allocation116_spill] sm:$0xff] }
 0x58a   : > { %v4407_v34 = vpop.f32.mrf.mxu3  ;;  %v4908_v49 = vpop.f32.mrf.mxu2 }
 0x58b   : > { %v8653_v29 = vadd.f32 %v4407_v34, %v4175_v13  ;;  %v8655_v11 = vadd.f32 %v4908_v49, %v4715_v59  ;;  %v4717_v13 = vadd.f32 %v9736_v37, %v8477_v19  ;;  %v9738_v19 = vld [vmem:[#allocation114_spill] sm:$0xff]  ;;  %v9745_v37 = vld [vmem:[#allocation27_spill] sm:$0xff] }
 0x58c   : > { %v9740_v12 = vpack.c.b16 %v9738_v19, %v9739_v14  ;;  %v9751_v19 = vld [vmem:[#allocation119_spill] sm:$0xff] }
 0x592   : > { %v4409_v40 = vpop.f32.mrf.mxu3  ;;  %v4910_v31 = vpop.f32.mrf.mxu2 }
 0x593   : > { %v8661_v17 = vadd.f32 %v4409_v40, %v4177_v3  ;;  %v8663_v5 = vadd.f32 %v4910_v31, %v4716_v51  ;;  %v4182_v3 = vadd.f32 %v8524_v36, %v8265_v44  ;;  %v4718_v51 = vadd.f32 %v9737_v1, %v8485_v41  ;;  %v9744_v41 = vld [vmem:[#allocation47_spill] sm:$0xff] }
 0x594   : > { %v4185_v44 = vadd.f32 %v8538_v0, %v8276_v4  ;;  %v4719_v36 = vadd.f32 %v9744_v41, %v8500_v63  ;;  %v9747_v0 = vld [vmem:[#allocation117_spill] sm:$0xff]  ;;  %v9748_v63 = vld [vmem:[#allocation12_spill] sm:$0xff] }
 0x597   : > { %6685 = vmatmul.msk.bf16.gmra.mxu2 %vm3913_vm8, %v9732_v33  ;;  %6710 = vmatmul.msk.bf16.gmra.mxu3 %vm3913_vm8, %v9735_v8  ;;  %v9742_v33 = vld [vmem:[#allocation115_spill] sm:$0xff] }
 0x598   : > { %v9743_v53 = vpack.c.b16 %v9741_v21, %v9742_v33 }
 0x59a   : > { %v4412_v56 = vpop.f32.mrf.mxu3  ;;  %v4913_v59 = vpop.f32.mrf.mxu2 }
 0x59b   : > { %v8683_v34 = vadd.f32 %v4412_v56, %v4180_v47  ;;  %v8685_v49 = vadd.f32 %v4913_v59, %v4717_v13  ;;  %v4187_v13 = vadd.f32 %v8548_v62, %v9745_v37  ;;  %v9746_v56 = vld [vmem:[#allocation48_spill] sm:$0xff]  ;;  %v9753_v62 = vld [vmem:[#allocation33_spill] sm:$0xff] }
 0x59c   : > { %v4720_v59 = vadd.f32 %v9746_v56, %v8508_v50  ;;  %v9754_v50 = vld [vmem:[#allocation49_spill] sm:$0xff] }
 0x59d   : > { %v4721_v21 = vadd.f32 %v9754_v50, %v8520_v18  ;;  %v9757_v18 = vld [vmem:[#allocation122_spill] sm:$0xff] }
 0x5a2   : > { %v4414_v40 = vpop.f32.mrf.mxu3  ;;  %v4915_v31 = vpop.f32.mrf.mxu2 }
 0x5a3   : > { %v8691_v23 = vadd.f32 %v4414_v40, %v4182_v3  ;;  %v8693_v27 = vadd.f32 %v4915_v31, %v4718_v51  ;;  %v9749_v40 = vpack.c.b16 %v9747_v0, %v9748_v63  ;;  %v9750_v31 = vld [vmem:[#allocation120_spill] sm:$0xff] }
 0x5a4   : > { %v9752_v14 = vpack.c.b16 %v9750_v31, %v9751_v19  ;;  %v9760_v63 = vld [vmem:[#allocation124_spill] sm:$0xff]  ;;  %v9764_v19 = vld [vmem:[#allocation51_spill] sm:$0xff] }
 0x5a7   : > { %6686 = vmatmul.msk.bf16.gmra.mxu2 %vm3913_vm8, %v9740_v12  ;;  %6711 = vmatmul.msk.bf16.gmra.mxu3 %vm3913_vm8, %v9743_v53  ;;  %v4190_v12 = vadd.f32 %v8560_v6, %v9753_v62 }
 0x5aa   : > { %v4417_v2 = vpop.f32.mrf.mxu3  ;;  %v4918_v8 = vpop.f32.mrf.mxu2 }
 0x5ab   : > { %v8707_v24 = vadd.f32 %v4417_v2, %v4185_v44  ;;  %v8709_v47 = vadd.f32 %v4918_v8, %v4719_v36  ;;  %v9755_v36 = vld [vmem:[#allocation34_spill] sm:$0xff] }
 0x5ac   : > { %v4192_v2 = vadd.f32 %v8570_v16, %v9755_v36  ;;  %v9756_v8 = vld [vmem:[#allocation50_spill] sm:$0xff]  ;;  %v9763_v16 = vld [vmem:[#allocation35_spill] sm:$0xff] }
 0x5ad   : > { %v4722_v37 = vadd.f32 %v9756_v8, %v8526_v43  ;;  %v4195_v43 = vadd.f32 %v8590_v39, %v9763_v16  ;;  %v6952_v16 = vld [vmem:[%s9389_s3 + $0x108] sm:$0xff] }
 0x5ae   : > { %5637 = vmatpush.bf16.msra.mxu3 %v6952_v16  ;;  %v9778_v16 = vld [vmem:[#allocation131_spill] sm:$0xff] }
 0x5b2   : > { %v4419_v3 = vpop.f32.mrf.mxu3  ;;  %v4920_v1 = vpop.f32.mrf.mxu2 }
 0x5b3   : > { %v8715_v51 = vadd.f32 %v4419_v3, %v4187_v13  ;;  %v8717_v4 = vadd.f32 %v4920_v1, %v4720_v59  ;;  %v1566_v3 = vpop.f32.mrf.mxu0  ;;  %v9758_v1 = vld [vmem:[#allocation121_spill] sm:$0xff] }
 0x5b4   : > { %v9759_v0 = vpack.c.b16 %v9757_v18, %v9758_v1  ;;  %v6948_v1 = vld [vmem:[%s9389_s3 + $0xe8] sm:$0xff] }
 0x5b5   : > { %5484 = vmatpush.bf16.msrb.mxu2 %v6948_v1 }
 0x5b7   : > { %6687 = vmatmul.msk.bf16.gmra.mxu2 %vm3913_vm8, %v9749_v40  ;;  %6712 = vmatmul.msk.bf16.gmra.mxu3 %vm3913_vm8, %v9752_v14  ;;  %v9761_v40 = vld [vmem:[#allocation123_spill] sm:$0xff]  ;;  %v4723_v14 = vadd.f32 %v9764_v19, %v8540_v10 }
 0x5b8   : > { %v9762_v31 = vpack.c.b16 %v9760_v63, %v9761_v40  ;;  %v9771_v40 = vld [vmem:[#allocation129_spill] sm:$0xff] }
 0x5ba   : > { %v4422_v33 = vpop.f32.mrf.mxu3  ;;  %v4923_v53 = vpop.f32.mrf.mxu2 }
 0x5bb   : > { %v8731_v44 = vadd.f32 %v4422_v33, %v4190_v12  ;;  %v8733_v41 = vadd.f32 %v4923_v53, %v4721_v21  ;;  %v1568_v33 = vpop.f32.mrf.mxu0  ;;  %v1567_v53 = vadd.f32 %v8167_v45, %v1566_v3 }
 0x5bc   : > { %v1569_v36 = vadd.f32 %v8167_v45, %v1568_v33  ;;  %v9767_v45 = vld [vmem:[#allocation127_spill] sm:$0xff] }
 0x5bd   : > { %vm1866_vm1 = vcmp.ge.f32.partialorder %v1567_v53, 0.0 }
 0x5be   : > { %v2059_v3 = vmul.f32 0.2, %v1569_v36  ;;  %vm1867_vm3 = vcmp.ge.f32.partialorder %v1569_v36, 0.0 }
 0x5c0   : > { %v2251_v19 = vsel %vm1867_vm3, %v1569_v36, %v2059_v3  ;;  %v9776_v36 = vld [vmem:[#allocation55_spill] sm:$0xff] }
 0x5c2   : > { %v4424_v13 = vpop.f32.mrf.mxu3  ;;  %v4925_v56 = vpop.f32.mrf.mxu2 }
 0x5c3   : > { %v8739_v59 = vadd.f32 %v4424_v13, %v4192_v2  ;;  %v8741_v6 = vadd.f32 %v4925_v56, %v4722_v37  ;;  %v9765_v2 = vld [vmem:[#allocation36_spill] sm:$0xff] }
 0x5c4   : > { %v4197_v8 = vadd.f32 %v8596_v60, %v9765_v2  ;;  %v9766_v37 = vld [vmem:[#allocation52_spill] sm:$0xff]  ;;  %v9768_v60 = vld [vmem:[#allocation126_spill] sm:$0xff] }
 0x5c5   : > { %v4724_v39 = vadd.f32 %v9766_v37, %v8550_v55  ;;  %v9769_v63 = vpack.c.b16 %v9767_v45, %v9768_v60  ;;  %v9770_v55 = vld [vmem:[#allocation130_spill] sm:$0xff] }
 0x5c6   : > { %v9775_v60 = vld [vmem:[#allocation138_spill] sm:$0xff] }
 0x5c7   : > { %6688 = vmatmul.msk.bf16.gmra.mxu2 %vm3913_vm8, %v9759_v0  ;;  %6713 = vmatmul.msk.bf16.gmra.mxu3 %vm3913_vm8, %v9762_v31  ;;  %v2058_v0 = vmul.f32 0.2, %v1567_v53  ;;  %v9772_v31 = vpack.c.b16 %v9770_v55, %v9771_v40 }
 0x5ca   : > { %v4427_v62 = vpop.f32.mrf.mxu3  ;;  %v4928_v12 = vpop.f32.mrf.mxu2 }
 0x5cb   : > { %v8755_v50 = vadd.f32 %v4427_v62, %v4195_v43  ;;  %v8757_v21 = vadd.f32 %v4928_v12, %v4723_v14  ;;  %v2250_v43 = vsel %vm1866_vm1, %v1567_v53, %v2058_v0  ;;  %v9773_v14 = vld [vmem:[#allocation37_spill] sm:$0xff]  ;;  %v4202_v53 = vadd.f32 %v8618_v7, %v9775_v60 }
 0x5cc   : > { %v4200_v62 = vadd.f32 %v8610_v46, %v9773_v14  ;;  %v9774_v12 = vld [vmem:[#allocation53_spill] sm:$0xff]  ;;  %v3595_v37 = vpack.c.bf16 %v2250_v43, %v2250_v43  ;;  %v4726_v46 = vadd.f32 %v9776_v36, %v8572_v15  ;;  %v4205_v15 = vadd.f32 %v8634_v35, %v8427_v61  ;;  %v9780_v43 = vld [vmem:[#allocation56_spill] sm:$0xff] }
 0x5cd   : > { %v4725_v33 = vadd.f32 %v9774_v12, %v8562_v9  ;;  %v6947_v9 = vld [vmem:[%s9389_s3 + $0xe0] sm:$0xff]  ;;  %v9783_v35 = vld [vmem:[#allocation85_spill] sm:$0xff] }
 0x5ce   : > { %v4807_v1 = vunpack.c.l.b16 %v3595_v37  ;;  %5485 = vmatpush.bf16.msrb.mxu2 %v6947_v9  ;;  %v9782_v37 = vld [vmem:[#allocation57_spill] sm:$0xff] }
 0x5cf   : > { %v9786_v36 = vld [vmem:[#allocation133_spill] sm:$0xff] }
 0x5d2   : > { %v4429_v13 = vpop.f32.mrf.mxu3  ;;  %v4930_v56 = vpop.f32.mrf.mxu2 }
 0x5d3   : > { %v8765_v10 = vadd.f32 %v4429_v13, %v4197_v8  ;;  %v8767_v18 = vadd.f32 %v4930_v56, %v4724_v39  ;;  %v3596_v56 = vpack.c.bf16 %v2251_v19, %v2251_v19  ;;  %v4727_v19 = vadd.f32 %v9780_v43, %v8592_v20  ;;  %v9784_v20 = vld [vmem:[#allocation84_spill] sm:$0xff] }
 0x5d5   : > { %v4808_v45 = vunpack.c.l.b16 %v3596_v56  ;;  %v4728_v56 = vadd.f32 %v9782_v37, %v8598_v30 }
 0x5d7   : > { %6689 = vmatmul.msk.bf16.gmra.mxu2 %vm3913_vm8, %v9769_v63  ;;  %6714 = vmatmul.msk.bf16.gmra.mxu3 %vm3913_vm8, %v9772_v31  ;;  %v4825_v40 = vpack.c.b16 %v4808_v45, %v4807_v1  ;;  %v9777_v31 = vld [vmem:[#allocation132_spill] sm:$0xff] }
 0x5d8   : > { %v9779_v7 = vpack.c.b16 %v9777_v31, %v9778_v16  ;;  %v9790_v16 = vld [vmem:[#allocation60_spill] sm:$0xff] }
 0x5da   : > { %v4432_v2 = vpop.f32.mrf.mxu3  ;;  %v4933_v8 = vpop.f32.mrf.mxu2 }
 0x5db   : > { %v8787_v39 = vadd.f32 %v4432_v2, %v4200_v62  ;;  %v8789_v13 = vadd.f32 %v4933_v8, %v4725_v33  ;;  %v9781_v2 = vld [vmem:[#allocation38_spill] sm:$0xff] }
 0x5dc   : > { %v4207_v8 = vadd.f32 %v8640_v58, %v9781_v2  ;;  %v9789_v58 = vld [vmem:[#allocation59_spill] sm:$0xff]  ;;  %v9792_v2 = vld [vmem:[#allocation134_spill] sm:$0xff] }
 0x5e2   : > { %v4434_v0 = vpop.f32.mrf.mxu3  ;;  %v4935_v3 = vpop.f32.mrf.mxu2 }
 0x5e3   : > { %v8798_v63 = vadd.f32 %v4434_v0, %v4202_v53  ;;  %v8800_v55 = vadd.f32 %v4935_v3, %v4726_v46  ;;  %v9785_v53 = vpack.c.b16 %v9783_v35, %v9784_v20  ;;  %v9787_v46 = vld [vmem:[#allocation28_spill] sm:$0xff]  ;;  %v4729_v3 = vadd.f32 %v9789_v58, %v8612_v26 }
 0x5e4   : > { %v9788_v0 = vpack.c.b16 %v9786_v36, %v9787_v46  ;;  %v9798_v58 = vld [vmem:[#allocation136_spill] sm:$0xff] }
 0x5e7   : > { %6690 = vmatmul.msk.bf16.gmra.mxu2 %vm3913_vm8, %v4825_v40  ;;  %6715 = vmatmul.msk.bf16.gmra.mxu3 %vm3913_vm8, %v9779_v7  ;;  %v4730_v7 = vadd.f32 %v9790_v16, %v8620_v28 }
 0x5ea   : > { %v4437_v14 = vpop.f32.mrf.mxu3  ;;  %v4938_v62 = vpop.f32.mrf.mxu2 }
 0x5eb   : > { %v8811_v12 = vadd.f32 %v4437_v14, %v4205_v15  ;;  %v8813_v33 = vadd.f32 %v4938_v62, %v4727_v19  ;;  %v9791_v62 = vld [vmem:[#allocation135_spill] sm:$0xff] }
 0x5ec   : > { %v9793_v26 = vpack.c.b16 %v9791_v62, %v9792_v2 }
 0x5f2   : > { %v4439_v1 = vpop.f32.mrf.mxu3  ;;  %v4940_v45 = vpop.f32.mrf.mxu2 }
 0x5f3   : > { %v8819_v60 = vadd.f32 %v4439_v1, %v4207_v8  ;;  %v8821_v61 = vadd.f32 %v4940_v45, %v4728_v56  ;;  %v9794_v8 = vld [vmem:[#allocation54_spill] sm:$0xff] }
 0x5f7   : > { %6691 = vmatmul.msk.bf16.gmra.mxu2 %vm3913_vm8, %v9785_v53  ;;  %6716 = vmatmul.msk.bf16.gmra.mxu3 %vm3913_vm8, %v9788_v0  ;;  %v9797_v0 = vld [vmem:[#allocation137_spill] sm:$0xff] }
 0x5fa   : > { %v4943_v30 = vpop.f32.mrf.mxu2  ;;  %v5181_v9 = vpop.f32.mrf.mxu3 }
 0x5fb   : > { %v8833_v40 = vadd.f32 %v4943_v30, %v4729_v3  ;;  %v8836_v31 = vadd.f32 %v5181_v9, %v8655_v11  ;;  %v9795_v11 = vld [vmem:[#allocation61_spill] sm:$0xff]  ;;  %v9800_v3 = vld [vmem:[#allocation58_spill] sm:$0xff] }
 0x5fc   : > { %v4731_v37 = vadd.f32 %v9795_v11, %v8636_v22  ;;  %v9799_v22 = vpack.c.b16 %v9797_v0, %v9798_v58  ;;  %v9808_v0 = vld [vmem:[#allocation68_spill] sm:$0xff] }
 0x5fd   : > { %v4736_v58 = vadd.f32 %v9808_v0, %v8691_v23 }
 0x602   : > { %v4945_v15 = vpop.f32.mrf.mxu2  ;;  %v5183_v43 = vpop.f32.mrf.mxu3 }
 0x603   : > { %v8840_v19 = vadd.f32 %v4945_v15, %v4730_v7  ;;  %v8843_v14 = vadd.f32 %v5183_v43, %v8663_v5  ;;  %v9796_v5 = vld [vmem:[#allocation63_spill] sm:$0xff]  ;;  %v9802_v15 = vld [vmem:[#allocation65_spill] sm:$0xff] }
 0x604   : > { %v4732_v35 = vadd.f32 %v9796_v5, %v8642_v25  ;;  %v9801_v25 = vld [vmem:[#allocation64_spill] sm:$0xff]  ;;  %v4734_v43 = vadd.f32 %v9802_v15, %v8661_v17 }
 0x605   : > { %v4733_v30 = vadd.f32 %v9801_v25, %v8653_v29  ;;  %v9803_v29 = vld [vmem:[#allocation140_spill] sm:$0xff] }
 0x607   : > { %6717 = vmatmul.msk.bf16.gmra.mxu3 %vm3913_vm8, %v9793_v26  ;;  %6772 = vmatmul.msk.bf16.vlgmr.msrb.gmra.mxu2 %vm3913_vm8, %v9794_v8  ;;  %v8883_v26 = vpop.f32.mrf.mxu1 }
 0x60a   : > { %v4948_v56 = vpop.f32.mrf.mxu2  ;;  %v5186_v28 = vpop.f32.mrf.mxu3 }
 0x60b   : > { %v8853_v1 = vadd.f32 %v4948_v56, %v4731_v37  ;;  %v8856_v45 = vadd.f32 %v5186_v28, %v8685_v49  ;;  %v6951_v49 = vld [vmem:[%s9389_s3 + $0x100] sm:$0xff] }
 0x60c   : > { %5638 = vmatpush.bf16.msra.mxu3 %v6951_v49  ;;  %v9804_v37 = vld [vmem:[#allocation139_spill] sm:$0xff]  ;;  %v9806_v28 = vld [vmem:[#allocation62_spill] sm:$0xff]  ;;  %v9810_v49 = vld [vmem:[#allocation21_spill] sm:$0xff] }
 0x60d   : > { %v9805_v56 = vpack.c.b16 %v9803_v29, %v9804_v37  ;;  %v9813_v29 = vld [vmem:[#allocation71_spill] sm:$0xff] }
 0x60e   : > { %v4737_v37 = vadd.f32 %v9813_v29, %v8707_v24 }
 0x612   : > { %v4950_v20 = vpop.f32.mrf.mxu2  ;;  %v5188_v53 = vpop.f32.mrf.mxu3 }
 0x613   : > { %v8860_v36 = vadd.f32 %v4950_v20, %v4732_v35  ;;  %v8863_v46 = vadd.f32 %v5188_v53, %v8693_v27 }
 0x617   : > { %6718 = vmatmul.msk.bf16.gmra.mxu3 %vm3913_vm8, %v9799_v22  ;;  %6773 = vmatmul.msk.bf16.gmra.mxu2 %vm3913_vm8, %v9800_v3  ;;  %v8910_v22 = vld [vmem:[%s9388_s2] ss:$0 sm:$0xff]  ;;  %v9809_v3 = vld [vmem:[#allocation125_spill] sm:$0xff] }
 0x618   : > { %v1719_v25 = vadd.f32 %v8910_v22, %v9810_v49 }
 0x61a   : > { %v4953_v9 = vpop.f32.mrf.mxu2  ;;  %v5191_v16 = vpop.f32.mrf.mxu3  ;;  %v2119_v23 = vmul.f32 0.2, %v1719_v25  ;;  %vm1927_vm5 = vcmp.ge.f32.partialorder %v1719_v25, 0.0 }
 0x61b   : > { %v8876_v27 = vadd.f32 %v4953_v9, %v4733_v30  ;;  %v8879_v7 = vadd.f32 %v5191_v16, %v8709_v47  ;;  %v9807_v47 = vld [vmem:[#allocation67_spill] sm:$0xff] }
 0x61c   : > { %v4735_v17 = vadd.f32 %v9807_v47, %v8683_v34  ;;  %v1717_v34 = vadd.f32 %v8910_v22, %v9809_v3  ;;  %v9814_v3 = vld [vmem:[#allocation73_spill] sm:$0xff] }
 0x61d   : > { %v4738_v49 = vadd.f32 %v9814_v3, %v8715_v51  ;;  %v9817_v51 = vld [vmem:[#allocation72_spill] sm:$0xff] }
 0x61e   : > { %v2118_v15 = vmul.f32 0.2, %v1717_v34  ;;  %vm1926_vm4 = vcmp.ge.f32.partialorder %v1717_v34, 0.0 }
 0x622   : > { %v4955_v62 = vpop.f32.mrf.mxu2  ;;  %v5193_v2 = vpop.f32.mrf.mxu3 }
 0x623   : > { %v8885_v8 = vadd.f32 %v4955_v62, %v4734_v43  ;;  %v8888_v11 = vadd.f32 %v5193_v2, %v8717_v4  ;;  %v8903_v4 = vpop.f32.mrf.mxu1  ;;  %v9811_v62 = vpack.c.b16 %v8461_v54, %v8459_v52  ;;  %v9812_v2 = vld [vmem:[#allocation66_spill] sm:$0xff] }
 0x627   : > { %6719 = vmatmul.msk.bf16.gmra.mxu3 %vm3913_vm8, %v9805_v56  ;;  %6774 = vmatmul.msk.bf16.gmra.mxu2 %vm3913_vm8, %v9806_v28  ;;  %v2310_v56 = vsel %vm1926_vm4, %v1717_v34, %v2118_v15  ;;  %v9816_v34 = vld [vmem:[#allocation25_spill] sm:$0xff] }
 0x62a   : > { %v4958_v5 = vpop.f32.mrf.mxu2  ;;  %v5196_v35 = vpop.f32.mrf.mxu3 }
 0x62b   : > { %v8898_v20 = vadd.f32 %v4958_v5, %v4735_v17  ;;  %v8901_v53 = vadd.f32 %v5196_v35, %v8733_v41  ;;  %v8921_v43 = vpop.f32.mrf.mxu1  ;;  %v3655_v35 = vpack.c.bf16 %v2310_v56, %v2310_v56 }
 0x62d   : > { %v5078_v54 = vunpack.c.l.b16 %v3655_v35 }
 0x632   : > { %v4960_v30 = vpop.f32.mrf.mxu2  ;;  %v5198_v9 = vpop.f32.mrf.mxu3 }
 0x633   : > { %v8916_v41 = vadd.f32 %v4960_v30, %v4736_v58  ;;  %v8919_v16 = vadd.f32 %v5198_v9, %v8741_v6  ;;  %v2311_v6 = vsel %vm1927_vm5, %v1719_v25, %v2119_v23  ;;  %v8936_v52 = vpop.f32.mrf.mxu1  ;;  %v9815_v30 = vld [vmem:[#allocation24_spill] sm:$0xff]  ;;  %v1729_v25 = vadd.f32 %v8910_v22, %v9816_v34  ;;  %v9819_v34 = vld [vmem:[#allocation77_spill] sm:$0xff] }
 0x634   : > { %v3656_v0 = vpack.c.bf16 %v2311_v6, %v2311_v6  ;;  %v1727_v24 = vadd.f32 %v8910_v22, %v9815_v30 }
 0x635   : > { %v2123_v29 = vmul.f32 0.2, %v1729_v25  ;;  %vm1931_vm7 = vcmp.ge.f32.partialorder %v1729_v25, 0.0 }
 0x636   : > { %v5079_v58 = vunpack.c.l.b16 %v3656_v0  ;;  %vm1930_vm6 = vcmp.ge.f32.partialorder %v1727_v24, 0.0 }
 0x637   : > { %6720 = vmatmul.msk.bf16.gmra.mxu3 %vm3913_vm8, %v9811_v62  ;;  %6775 = vmatmul.msk.bf16.gmra.mxu2 %vm3913_vm8, %v9812_v2  ;;  %v2122_v2 = vmul.f32 0.2, %v1727_v24 }
 0x638   : > { %v5097_v62 = vpack.c.b16 %v5079_v58, %v5078_v54 }
 0x639   : > { %v2314_v6 = vsel %vm1930_vm6, %v1727_v24, %v2122_v2  ;;  %v9821_v24 = vld [vmem:[#allocation30_spill] sm:$0xff] }
 0x63a   : > { %v4963_v28 = vpop.f32.mrf.mxu2  ;;  %v5201_v47 = vpop.f32.mrf.mxu3  ;;  %v3659_v58 = vpack.c.bf16 %v2314_v6, %v2314_v6 }
 0x63b   : > { %v8931_v17 = vadd.f32 %v4963_v28, %v4737_v37  ;;  %v8934_v5 = vadd.f32 %v5201_v47, %v8757_v21  ;;  %v9818_v37 = vld [vmem:[#allocation74_spill] sm:$0xff]  ;;  %v2315_v28 = vsel %vm1931_vm7, %v1729_v25, %v2123_v29  ;;  %v8954_v0 = vpop.f32.mrf.mxu1  ;;  %v1739_v25 = vadd.f32 %v8910_v22, %v9821_v24 }
 0x63c   : > { %v4739_v56 = vadd.f32 %v9818_v37, %v8731_v44  ;;  %v3660_v3 = vpack.c.bf16 %v2315_v28, %v2315_v28  ;;  %v9823_v28 = vld [vmem:[#allocation78_spill] sm:$0xff] }
 0x63d   : > { %v2127_v6 = vmul.f32 0.2, %v1739_v25  ;;  %vm1935_vm10 = vcmp.ge.f32.partialorder %v1739_v25, 0.0 }
 0x63e   : > { %v5081_v30 = vunpack.c.l.b16 %v3660_v3 }
 0x642   : > { %v4965_v9 = vpop.f32.mrf.mxu2  ;;  %v5203_v15 = vpop.f32.mrf.mxu3 }
 0x643   : > { %v8944_v23 = vadd.f32 %v4965_v9, %v4738_v49  ;;  %v8947_v21 = vadd.f32 %v5203_v15, %v8767_v18  ;;  %v5080_v49 = vunpack.c.l.b16 %v3659_v58  ;;  %v4740_v9 = vadd.f32 %v9819_v34, %v8739_v59  ;;  %v9820_v15 = vld [vmem:[#allocation29_spill] sm:$0xff]  ;;  %v9822_v59 = vld [vmem:[#allocation79_spill] sm:$0xff] }
 0x644   : > { %v1737_v44 = vadd.f32 %v8910_v22, %v9820_v15  ;;  %v2319_v58 = vsel %vm1935_vm10, %v1739_v25, %v2127_v6 }
 0x645   : > { %v5098_v37 = vpack.c.b16 %v5081_v30, %v5080_v49 }
 0x646   : > { %vm1934_vm9 = vcmp.ge.f32.partialorder %v1737_v44, 0.0 }
 0x647   : > { %6721 = vmatmul.msk.bf16.gmra.mxu3 %vm3913_vm8, %v5097_v62  ;;  %6776 = vmatmul.msk.bf16.gmra.mxu2 %vm3913_vm8, %v9817_v51  ;;  %v8972_v51 = vpop.f32.mrf.mxu1 }
 0x64a   : > { %v4968_v47 = vpop.f32.mrf.mxu2  ;;  %v5206_v35 = vpop.f32.mrf.mxu3 }
 0x64b   : > { %v8956_v18 = vadd.f32 %v4968_v47, %v4739_v56  ;;  %v8959_v54 = vadd.f32 %v5206_v35, %v8789_v13  ;;  %v2126_v56 = vmul.f32 0.2, %v1737_v44  ;;  %v4741_v47 = vadd.f32 %v9823_v28, %v8755_v50  ;;  %v9826_v28 = vld [vmem:[#allocation86_spill] sm:$0xff] }
 0x64d   : > { %v2318_v35 = vsel %vm1934_vm9, %v1737_v44, %v2126_v56 }
 0x64e   : > { %v3663_v30 = vpack.c.bf16 %v2318_v35, %v2318_v35 }
 0x64f   : > { %v8984_v15 = vpop.f32.mrf.mxu1 }
 0x650   : > { %v5082_v24 = vunpack.c.l.b16 %v3663_v30 }
 0x652   : > { %v4970_v62 = vpop.f32.mrf.mxu2  ;;  %v5208_v2 = vpop.f32.mrf.mxu3 }
 0x653   : > { %v8967_v29 = vadd.f32 %v4970_v62, %v4740_v9  ;;  %v8970_v13 = vadd.f32 %v5208_v2, %v8800_v55  ;;  %v3664_v9 = vpack.c.bf16 %v2319_v58, %v2319_v58  ;;  %v9824_v2 = vld [vmem:[#allocation81_spill] sm:$0xff] }
 0x655   : > { %v5083_v62 = vunpack.c.l.b16 %v3664_v9 }
 0x657   : > { %6722 = vmatmul.msk.bf16.gmra.mxu3 %vm3913_vm8, %v5098_v37  ;;  %6777 = vmatmul.msk.bf16.gmra.mxu2 %vm3913_vm8, %v9822_v59  ;;  %v4742_v37 = vadd.f32 %v9824_v2, %v8765_v10  ;;  %v5099_v56 = vpack.c.b16 %v5083_v62, %v5082_v24  ;;  %v8996_v6 = vpop.f32.mrf.mxu1 }
 0x65a   : > { %v4973_v3 = vpop.f32.mrf.mxu2  ;;  %v5211_v55 = vpop.f32.mrf.mxu3 }
 0x65b   : > { %v8979_v34 = vadd.f32 %v4973_v3, %v4741_v47  ;;  %v8982_v49 = vadd.f32 %v5211_v55, %v8813_v33  ;;  %v9825_v33 = vld [vmem:[#allocation88_spill] sm:$0xff]  ;;  %v4743_v47 = vadd.f32 %v9826_v28, %v8787_v39  ;;  %v9828_v39 = vld [vmem:[#allocation97_spill] sm:$0xff] }
 0x65f   : > { %v9007_v24 = vpop.f32.mrf.mxu1 }
 0x662   : > { %v4975_v59 = vpop.f32.mrf.mxu2  ;;  %v5213_v50 = vpop.f32.mrf.mxu3 }
 0x663   : > { %v8988_v44 = vadd.f32 %v4975_v59, %v4742_v37  ;;  %v8991_v25 = vadd.f32 %v5213_v50, %v8821_v61  ;;  %v9827_v61 = vld [vmem:[#allocation87_spill] sm:$0xff]  ;;  %v9829_v37 = vld [vmem:[#allocation100_spill] sm:$0xff] }
 0x664   : > { %v4744_v55 = vadd.f32 %v9827_v61, %v8798_v63 }
 0x667   : > { %6723 = vmatmul.msk.bf16.gmra.mxu3 %vm3913_vm8, %v5099_v56  ;;  %6778 = vmatmul.msk.bf16.gmra.mxu2 %vm3913_vm8, %v9825_v33  ;;  %v9025_v28 = vpop.f32.mrf.mxu1 }
 0x66a   : > { %v4978_v35 = vpop.f32.mrf.mxu2  ;;  %v5216_v10 = vpop.f32.mrf.mxu3 }
 0x66b   : > { %v9000_v58 = vadd.f32 %v4978_v35, %v4743_v47  ;;  %v9003_v3 = vadd.f32 %v5216_v10, %v8833_v40  ;;  %v9830_v40 = vld [vmem:[#allocation91_spill] sm:$0xff] }
 0x66c   : > { %v4745_v59 = vadd.f32 %v9830_v40, %v8811_v12 }
 0x66f   : > { %v9034_v12 = vpop.f32.mrf.mxu1 }
 0x672   : > { %v4980_v30 = vpop.f32.mrf.mxu2  ;;  %v5218_v9 = vpop.f32.mrf.mxu3 }
 0x673   : > { %v9009_v62 = vadd.f32 %v4980_v30, %v4744_v55  ;;  %v9012_v2 = vadd.f32 %v5218_v9, %v8840_v19  ;;  %v9831_v19 = vld [vmem:[#allocation94_spill] sm:$0xff]  ;;  %v9832_v30 = vld [vmem:[#allocation105_spill] sm:$0xff]  ;;  %v9833_v9 = vld [vmem:[#allocation107_spill] sm:$0xff] }
 0x674   : > { %v4746_v47 = vadd.f32 %v9831_v19, %v8819_v60 }
 0x677   : > { %6779 = vmatmul.msk.bf16.gmra.mxu2 %vm3913_vm8, %v9828_v39  ;;  %6804 = vmatmul.msk.bf16.vlgmr.msra.gmra.mxu3 %vm3913_vm8, %v9829_v37 }
 0x67a   : > { %v4983_v50 = vpop.f32.mrf.mxu2  ;;  %v5221_v63 = vpop.f32.mrf.mxu3 }
 0x67b   : > { %v9020_v56 = vadd.f32 %v4983_v50, %v4745_v59  ;;  %v9023_v33 = vadd.f32 %v5221_v63, %v8853_v1  ;;  %v9834_v1 = vld [vmem:[#allocation95_spill] sm:$0xff]  ;;  %v9835_v50 = vld [vmem:[#allocation98_spill] sm:$0xff] }
 0x67c   : > { %v5414_v39 = vadd.f32 %v9834_v1, %v8836_v31  ;;  %v5415_v63 = vadd.f32 %v9835_v50, %v8843_v14  ;;  %v9836_v31 = vld [vmem:[#allocation6_spill] sm:$0xff]  ;;  %v9839_v50 = vld [vmem:[#allocation104_spill] sm:$0xff] }
 0x682   : > { %v4985_v35 = vpop.f32.mrf.mxu2  ;;  %v5223_v10 = vpop.f32.mrf.mxu3 }
 0x683   : > { %v9029_v61 = vadd.f32 %v4985_v35, %v4746_v47  ;;  %v9032_v55 = vadd.f32 %v5223_v10, %v8860_v36  ;;  %v9047_v36 = vpop.f32.mrf.mxu1 }
 0x687   : > { %6780 = vmatmul.msk.bf16.gmra.mxu2 %vm3913_vm8, %v9832_v30  ;;  %6805 = vmatmul.msk.bf16.gmra.mxu3 %vm3913_vm8, %v9833_v9  ;;  %v9837_v30 = vld [vmem:[#allocation7_spill] sm:$0xff] }
 0x68a   : > { %v5226_v37 = vpop.f32.mrf.mxu3  ;;  %v5487_v60 = vpop.f32.mrf.mxu2 }
 0x68b   : > { %v9043_v40 = vadd.f32 %v5226_v37, %v8876_v27  ;;  %v9045_v59 = vadd.f32 %v5487_v60, %v5414_v39  ;;  %v9838_v27 = vld [vmem:[#allocation101_spill] sm:$0xff]  ;;  %v5384_v60 = vpop.f32.mrf.mxu1 }
 0x68c   : > { %v5416_v9 = vadd.f32 %v9838_v27, %v8856_v45  ;;  %v9840_v45 = vld [vmem:[#allocation9_spill] sm:$0xff]  ;;  %v9841_v27 = vld [vmem:[#allocation10_spill] sm:$0xff] }
 0x692   : > { %v5228_v19 = vpop.f32.mrf.mxu3  ;;  %v5489_v47 = vpop.f32.mrf.mxu2 }
 0x693   : > { %v9052_v35 = vadd.f32 %v5228_v19, %v8885_v8  ;;  %v9054_v10 = vadd.f32 %v5489_v47, %v5415_v63  ;;  %v5417_v63 = vadd.f32 %v9839_v50, %v8863_v46 }
 0x697   : > { %6781 = vmatmul.msk.bf16.gmra.mxu2 %vm3913_vm8, %v9836_v31  ;;  %6806 = vmatmul.msk.bf16.gmra.mxu3 %vm3913_vm8, %v9837_v30 }
 0x69a   : > { %v5231_v1 = vpop.f32.mrf.mxu3  ;;  %v5492_v39 = vpop.f32.mrf.mxu2 }
 0x69b   : > { %v5281_v14 = vadd.f32 %v5231_v1, %v8898_v20  ;;  %v9063_v37 = vadd.f32 %v5492_v39, %v5416_v9  ;;  %v9842_v20 = vld [vmem:[#allocation106_spill] sm:$0xff] }
 0x69c   : > { %v5418_v9 = vadd.f32 %v9842_v20, %v8879_v7  ;;  %v9845_v7 = vld [vmem:[#allocation15_spill] sm:$0xff] }
 0x69d   : > { %v9065_v8 = vadd.f32 %v5384_v60, %v5281_v14 }
 0x6a2   : > { %v5233_v19 = vpop.f32.mrf.mxu3  ;;  %v5494_v47 = vpop.f32.mrf.mxu2 }
 0x6a3   : > { %v9070_v31 = vadd.f32 %v5233_v19, %v8916_v41  ;;  %v9072_v30 = vadd.f32 %v5494_v47, %v5417_v63  ;;  %v9843_v41 = vld [vmem:[#allocation108_spill] sm:$0xff] }
 0x6a4   : > { %v5419_v60 = vadd.f32 %v9843_v41, %v8888_v11 }
 0x6a7   : > { %6782 = vmatmul.msk.bf16.gmra.mxu2 %vm3913_vm8, %v9840_v45  ;;  %6807 = vmatmul.msk.bf16.gmra.mxu3 %vm3913_vm8, %v9841_v27  ;;  %v9844_v45 = vld [vmem:[#allocation13_spill] sm:$0xff] }
 0x6aa   : > { %v5236_v1 = vpop.f32.mrf.mxu3  ;;  %v5497_v39 = vpop.f32.mrf.mxu2 }
 0x6ab   : > { %v9081_v46 = vadd.f32 %v5236_v1, %v8931_v17  ;;  %v9083_v14 = vadd.f32 %v5497_v39, %v5418_v9  ;;  %v9846_v17 = vld [vmem:[#allocation5_spill] sm:$0xff] }
 0x6ac   : > { %v5420_v27 = vadd.f32 %v9846_v17, %v8901_v53  ;;  %v9849_v53 = vld [vmem:[#allocation19_spill] sm:$0xff] }
 0x6b2   : > { %v5238_v50 = vpop.f32.mrf.mxu3  ;;  %v5499_v63 = vpop.f32.mrf.mxu2 }
 0x6b3   : > { %v9088_v19 = vadd.f32 %v5238_v50, %v8944_v23  ;;  %v9090_v47 = vadd.f32 %v5499_v63, %v5419_v60  ;;  %v9847_v23 = vld [vmem:[#allocation113_spill] sm:$0xff] }
 0x6b4   : > { %v5421_v39 = vadd.f32 %v9847_v23, %v8919_v16 }
 0x6b7   : > { %6783 = vmatmul.msk.bf16.gmra.mxu2 %vm3913_vm8, %v9844_v45  ;;  %6808 = vmatmul.msk.bf16.gmra.mxu3 %vm3913_vm8, %v9845_v7  ;;  %v9848_v45 = vld [vmem:[#allocation18_spill] sm:$0xff] }
 0x6ba   : > { %v5241_v20 = vpop.f32.mrf.mxu3  ;;  %v5502_v9 = vpop.f32.mrf.mxu2 }
 0x6bb   : > { %v9099_v11 = vadd.f32 %v5241_v20, %v8956_v18  ;;  %v9101_v1 = vadd.f32 %v5502_v9, %v5420_v27  ;;  %v5422_v18 = vadd.f32 %v8883_v26, %v8934_v5  ;;  %v9851_v26 = vld [vmem:[#allocation23_spill] sm:$0xff]  ;;  %v5424_v5 = vadd.f32 %v8921_v43, %v8959_v54  ;;  %v9853_v43 = vld [vmem:[#allocation26_spill] sm:$0xff] }
 0x6bc   : > { %v5426_v54 = vadd.f32 %v8954_v0, %v8982_v49  ;;  %v5428_v49 = vadd.f32 %v8984_v15, %v9003_v3 }
 0x6c2   : > { %v5243_v41 = vpop.f32.mrf.mxu3  ;;  %v5504_v60 = vpop.f32.mrf.mxu2 }
 0x6c3   : > { %v9106_v50 = vadd.f32 %v5243_v41, %v8967_v29  ;;  %v9108_v63 = vadd.f32 %v5504_v60, %v5421_v39  ;;  %v5423_v29 = vadd.f32 %v8903_v4, %v8947_v21  ;;  %v9850_v41 = vld [vmem:[#allocation22_spill] sm:$0xff] }
 0x6c7   : > { %6784 = vmatmul.msk.bf16.gmra.mxu2 %vm3913_vm8, %v9848_v45  ;;  %6809 = vmatmul.msk.bf16.gmra.mxu3 %vm3913_vm8, %v9849_v53 }
 0x6ca   : > { %v5246_v7 = vpop.f32.mrf.mxu3  ;;  %v5507_v17 = vpop.f32.mrf.mxu2 }
 0x6cb   : > { %v9117_v16 = vadd.f32 %v5246_v7, %v8979_v34  ;;  %v9119_v27 = vadd.f32 %v5507_v17, %v5422_v18  ;;  %v9852_v17 = vld [vmem:[#allocation80_spill] sm:$0xff] }
 0x6d2   : > { %v5248_v20 = vpop.f32.mrf.mxu3  ;;  %v5509_v9 = vpop.f32.mrf.mxu2 }
 0x6d3   : > { %v9124_v23 = vadd.f32 %v5248_v20, %v8988_v44  ;;  %v9126_v39 = vadd.f32 %v5509_v9, %v5423_v29  ;;  %v5425_v44 = vadd.f32 %v8936_v52, %v8970_v13 }
 0x6d7   : > { %6785 = vmatmul.msk.bf16.gmra.mxu2 %vm3913_vm8, %v9850_v41  ;;  %6810 = vmatmul.msk.bf16.gmra.mxu3 %vm3913_vm8, %v9851_v26 }
 0x6da   : > { %v5251_v34 = vpop.f32.mrf.mxu3  ;;  %v5512_v60 = vpop.f32.mrf.mxu2 }
 0x6db   : > { %v9135_v4 = vadd.f32 %v5251_v34, %v9000_v58  ;;  %v9137_v21 = vadd.f32 %v5512_v60, %v5424_v5  ;;  %v9854_v5 = vld [vmem:[#allocation90_spill] sm:$0xff]  ;;  %v9855_v34 = vld [vmem:[#allocation89_spill] sm:$0xff] }
 0x6dc   : > { %v9856_v0 = vpack.c.b16 %v9854_v5, %v9855_v34  ;;  %v9178_v60 = vld [vmem:[%s9390_s4] ss:$0 sm:$0xff] }
 0x6e2   : > { %v5253_v45 = vpop.f32.mrf.mxu3  ;;  %v5514_v53 = vpop.f32.mrf.mxu2 }
 0x6e3   : > { %v9142_v18 = vadd.f32 %v5253_v45, %v9009_v62  ;;  %v9144_v7 = vadd.f32 %v5514_v53, %v5425_v44  ;;  %v5427_v62 = vadd.f32 %v8972_v51, %v8991_v25  ;;  %v5429_v45 = vadd.f32 %v8996_v6, %v9012_v2  ;;  %v5885_v6 = vld [vmem:[%s9391_s5 + $0x8] sm:$0xff] }
 0x6e7   : > { %6786 = vmatmul.msk.bf16.gmra.mxu2 %vm3913_vm8, %v9852_v17  ;;  %6811 = vmatmul.msk.bf16.gmra.mxu3 %vm3913_vm8, %v9853_v43 }
 0x6ea   : > { %v5256_v58 = vpop.f32.mrf.mxu3  ;;  %v5517_v29 = vpop.f32.mrf.mxu2 }
 0x6eb   : > { %v9153_v52 = vadd.f32 %v5256_v58, %v9020_v56  ;;  %v9155_v13 = vadd.f32 %v5517_v29, %v5426_v54  ;;  %v5884_v54 = vld [vmem:[%s9391_s5] sm:$0xff] }
 0x6f2   : > { %v5258_v20 = vpop.f32.mrf.mxu3  ;;  %v5519_v9 = vpop.f32.mrf.mxu2 }
 0x6f3   : > { %v9160_v41 = vadd.f32 %v5258_v20, %v9029_v61  ;;  %v9162_v26 = vadd.f32 %v5519_v9, %v5427_v62 }
 0x6f7   : > { %6787 = vmatmul.msk.bf16.gmra.mxu2 %vm3913_vm8, %v9856_v0  ;;  %6812 = vmatmul.msk.bf16.gmra.mxu3 %vm3913_vm8, %v8322_v57 }
 0x6fa   : > { %v5522_v56 = vpop.f32.mrf.mxu2  ;;  %v5640_v51 = vpop.f32.mrf.mxu3 }
 0x6fb   : > { %v9172_v25 = vadd.f32 %v5522_v56, %v5428_v49  ;;  %v5720_v61 = vadd.f32 %v5640_v51, %v9045_v59 }
 0x6fd   : > { %v5756_v44 = vadd.f32 %v9178_v60, %v5720_v61 }
 0x6ff   : > { %v5820_v17 = vmul.f32 0.2, %v5756_v44  ;;  %vm5788_vm11 = vcmp.ge.f32.partialorder %v5756_v44, 0.0 }
 0x701   : > { %v5852_v43 = vsel %vm5788_vm11, %v5756_v44, %v5820_v17 }
 0x702   : > { %v5524_v57 = vpop.f32.mrf.mxu2  ;;  %v5642_v53 = vpop.f32.mrf.mxu3  ;;  %v5916_v29 = vmul.f32 %v5884_v54, %v5852_v43 }
 0x703   : > { %v9183_v15 = vadd.f32 %v5524_v57, %v5429_v45  ;;  %v5721_v3 = vadd.f32 %v5642_v53, %v9054_v10  ;;  %v5430_v10 = vadd.f32 %v9007_v24, %v9023_v33  ;;  %v5431_v24 = vadd.f32 %v9025_v28, %v9032_v55 }
 0x704   : > { %v5432_v55 = vadd.f32 %v9034_v12, %v9043_v40  ;;  %v5433_v12 = vadd.f32 %v9047_v36, %v9052_v35 }
 0x705   : > { %v5757_v59 = vadd.f32 %v9178_v60, %v5721_v3  ;;  %v5887_v3 = vld [vmem:[%s9391_s5 + $0x18] sm:$0xff] }
 0x707   : > { %vm5789_vm2 = vcmp.ge.f32.partialorder %v5757_v59, 0.0  ;;  %v5821_v58 = vmul.f32 0.2, %v5757_v59  ;;  %6813 = vmatmul.msk.bf16.gmra.mxu3 %vm3913_vm8, %v8360_v32  ;;  %v5886_v32 = vld [vmem:[%s9391_s5 + $0x10] sm:$0xff] }
 0x709   : > { %v5853_v2 = vsel %vm5789_vm2, %v5757_v59, %v5821_v58 }
 0x70a   : > { %v5917_v62 = vmul.f32 %v5885_v6, %v5853_v2  ;;  %v5527_v20 = vpop.f32.mrf.mxu2  ;;  %v5645_v9 = vpop.f32.mrf.mxu3 }
 0x70b   : > { %v9197_v5 = vadd.f32 %v5527_v20, %v5430_v10  ;;  %v5722_v34 = vadd.f32 %v5645_v9, %v9063_v37 }
 0x70c   : > { %v5948_v0 = vadd.f32 %v5917_v62, %v5916_v29 }
 0x70d   : > { %v5758_v49 = vadd.f32 %v9178_v60, %v5722_v34 }
 0x70f   : > { %vm5790_vm12 = vcmp.ge.f32.partialorder %v5758_v49, 0.0  ;;  %v5822_v56 = vmul.f32 0.2, %v5758_v49 }
 0x711   : > { %v5854_v51 = vsel %vm5790_vm12, %v5758_v49, %v5822_v56  ;;  %v5889_v56 = vld [vmem:[%s9391_s5 + $0x28] sm:$0xff] }
 0x712   : > { %v5918_v33 = vmul.f32 %v5886_v32, %v5854_v51  ;;  %v5529_v61 = vpop.f32.mrf.mxu2  ;;  %v5647_v44 = vpop.f32.mrf.mxu3 }
 0x713   : > { %v9206_v45 = vadd.f32 %v5529_v61, %v5431_v24  ;;  %v5723_v37 = vadd.f32 %v5647_v44, %v9072_v30 }
 0x714   : > { %v5949_v57 = vadd.f32 %v5948_v0, %v5918_v33 }
 0x715   : > { %v5759_v53 = vadd.f32 %v9178_v60, %v5723_v37  ;;  %v5890_v37 = vld [vmem:[%s9391_s5 + $0x30] sm:$0xff] }
 0x717   : > { %vm5791_vm13 = vcmp.ge.f32.partialorder %v5759_v53, 0.0  ;;  %v5823_v17 = vmul.f32 0.2, %v5759_v53  ;;  %6814 = vmatmul.msk.bf16.gmra.mxu3 %vm3913_vm8, %v8406_v38  ;;  %v5888_v38 = vld [vmem:[%s9391_s5 + $0x20] sm:$0xff] }
 0x719   : > { %v5855_v28 = vsel %vm5791_vm13, %v5759_v53, %v5823_v17 }
 0x71a   : > { %v5919_v59 = vmul.f32 %v5887_v3, %v5855_v28  ;;  %v5532_v43 = vpop.f32.mrf.mxu2  ;;  %v5650_v54 = vpop.f32.mrf.mxu3 }
 0x71b   : > { %v9217_v30 = vadd.f32 %v5532_v43, %v5432_v55  ;;  %v5724_v58 = vadd.f32 %v5650_v54, %v9083_v14 }
 0x71c   : > { %v5950_v6 = vadd.f32 %v5949_v57, %v5919_v59 }
 0x71d   : > { %v5760_v2 = vadd.f32 %v9178_v60, %v5724_v58 }
 0x71f   : > { %vm5792_vm14 = vcmp.ge.f32.partialorder %v5760_v2, 0.0  ;;  %v5824_v10 = vmul.f32 0.2, %v5760_v2 }
 0x721   : > { %v5856_v29 = vsel %vm5792_vm14, %v5760_v2, %v5824_v10  ;;  %v5892_v2 = vld [vmem:[%s9391_s5 + $0x40] sm:$0xff] }
 0x722   : > { %v5920_v40 = vmul.f32 %v5888_v38, %v5856_v29  ;;  %v5534_v62 = vpop.f32.mrf.mxu2  ;;  %v5652_v20 = vpop.f32.mrf.mxu3 }
 0x723   : > { %v9226_v9 = vadd.f32 %v5534_v62, %v5433_v12  ;;  %v5725_v14 = vadd.f32 %v5652_v20, %v9090_v47  ;;  %v9857_v20 = vld [vmem:[#allocation39_spill] sm:$0xff] }
 0x724   : > { %v5951_v34 = vadd.f32 %v5950_v6, %v5920_v40 }
 0x725   : > { %v5761_v0 = vadd.f32 %v9178_v60, %v5725_v14 }
 0x727   : > { %vm5793_vm15 = vcmp.ge.f32.partialorder %v5761_v0, 0.0  ;;  %v5825_v49 = vmul.f32 0.2, %v5761_v0  ;;  %6815 = vmatmul.msk.bf16.gmra.mxu3 %vm3913_vm8, %v8451_v42 }
 0x729   : > { %v5857_v36 = vsel %vm5793_vm15, %v5761_v0, %v5825_v49 }
 0x72a   : > { %v5921_v35 = vmul.f32 %v5889_v56, %v5857_v36  ;;  %v5537_v32 = vpop.f32.mrf.mxu2  ;;  %v5655_v51 = vpop.f32.mrf.mxu3 }
 0x72b   : > { %v9236_v24 = vadd.f32 %v5537_v32, %v9065_v8  ;;  %v5726_v47 = vadd.f32 %v5655_v51, %v9101_v1  ;;  %v5891_v1 = vld [vmem:[%s9391_s5 + $0x38] sm:$0xff]  ;;  %v9858_v51 = vld [vmem:[#allocation31_spill] sm:$0xff] }
 0x72c   : > { %v5952_v33 = vadd.f32 %v5951_v34, %v5921_v35  ;;  %v5894_v35 = vld [vmem:[%s9391_s5 + $0x50] sm:$0xff] }
 0x72d   : > { %v5762_v61 = vadd.f32 %v9178_v60, %v5726_v47  ;;  %v1742_v47 = vadd.f32 %v8910_v22, %v9858_v51 }
 0x72f   : > { %vm5794_vm0 = vcmp.ge.f32.partialorder %v5762_v61, 0.0  ;;  %v5826_v44 = vmul.f32 0.2, %v5762_v61  ;;  %vm1936_vm6 = vcmp.ge.f32.partialorder %v1742_v47, 0.0 }
 0x731   : > { %v5858_v57 = vsel %vm5794_vm0, %v5762_v61, %v5826_v44 }
 0x732   : > { %v5922_v42 = vmul.f32 %v5890_v37, %v5858_v57  ;;  %v5657_v53 = vpop.f32.mrf.mxu3 }
 0x733   : > { %v5727_v17 = vadd.f32 %v5657_v53, %v9108_v63  ;;  %v2128_v53 = vmul.f32 0.2, %v1742_v47 }
 0x734   : > { %v5953_v3 = vadd.f32 %v5952_v33, %v5922_v42  ;;  %v9859_v33 = vld [vmem:[#allocation32_spill] sm:$0xff] }
 0x735   : > { %v5763_v8 = vadd.f32 %v9178_v60, %v5727_v17  ;;  %v1744_v61 = vadd.f32 %v8910_v22, %v9859_v33 }
 0x737   : > { %vm5795_vm1 = vcmp.ge.f32.partialorder %v5763_v8, 0.0  ;;  %v5827_v28 = vmul.f32 0.2, %v5763_v8  ;;  %6816 = vmatmul.msk.bf16.gmra.mxu3 %vm3913_vm8, %v8502_v48  ;;  %v2129_v17 = vmul.f32 0.2, %v1744_v61  ;;  %vm1937_vm7 = vcmp.ge.f32.partialorder %v1744_v61, 0.0 }
 0x739   : > { %v5859_v55 = vsel %vm5795_vm1, %v5763_v8, %v5827_v28  ;;  %v5895_v8 = vld [vmem:[%s9391_s5 + $0x58] sm:$0xff]  ;;  %v9860_v28 = vld [vmem:[#allocation40_spill] sm:$0xff] }
 0x73a   : > { %v5923_v59 = vmul.f32 %v5891_v1, %v5859_v55  ;;  %v5660_v43 = vpop.f32.mrf.mxu3  ;;  %v2320_v1 = vsel %vm1936_vm6, %v1742_v47, %v2128_v53  ;;  %v2321_v55 = vsel %vm1937_vm7, %v1744_v61, %v2129_v17 }
 0x73b   : > { %v5728_v54 = vadd.f32 %v5660_v43, %v9119_v27  ;;  %v5893_v27 = vld [vmem:[%s9391_s5 + $0x48] sm:$0xff] }
 0x73c   : > { %v5954_v58 = vadd.f32 %v5953_v3, %v5923_v59 }
 0x73d   : > { %v5764_v63 = vadd.f32 %v9178_v60, %v5728_v54 }
 0x73f   : > { %vm5796_vm3 = vcmp.ge.f32.partialorder %v5764_v63, 0.0  ;;  %v5828_v6 = vmul.f32 0.2, %v5764_v63 }
 0x741   : > { %v5860_v10 = vsel %vm5796_vm3, %v5764_v63, %v5828_v6  ;;  %v3666_v63 = vpack.c.bf16 %v2321_v55, %v2321_v55 }
 0x742   : > { %v5924_v38 = vmul.f32 %v5892_v2, %v5860_v10  ;;  %v5662_v29 = vpop.f32.mrf.mxu3  ;;  %v5896_v10 = vld [vmem:[%s9391_s5 + $0x60] sm:$0xff] }
 0x743   : > { %v5729_v12 = vadd.f32 %v5662_v29, %v9126_v39  ;;  %v5602_v29 = vunpack.c.l.b16 %v3666_v63 }
 0x744   : > { %v5955_v48 = vadd.f32 %v5954_v58, %v5924_v38  ;;  %v3665_v58 = vpack.c.bf16 %v2320_v1, %v2320_v1 }
 0x745   : > { %v5765_v40 = vadd.f32 %v9178_v60, %v5729_v12 }
 0x746   : > { %v5601_v38 = vunpack.c.l.b16 %v3665_v58  ;;  %v5386_v58 = vpop.f32.mrf.mxu1 }
 0x747   : > { %vm5797_vm4 = vcmp.ge.f32.partialorder %v5765_v40, 0.0  ;;  %v5829_v62 = vmul.f32 0.2, %v5765_v40  ;;  %6817 = vmatmul.msk.bf16.gmra.mxu3 %vm3913_vm8, %v9857_v20 }
 0x748   : > { %v5603_v20 = vpack.c.b16 %v5602_v29, %v5601_v38 }
 0x749   : > { %v5861_v14 = vsel %vm5797_vm4, %v5765_v40, %v5829_v62 }
 0x74a   : > { %v5925_v34 = vmul.f32 %v5893_v27, %v5861_v14  ;;  %v5665_v0 = vpop.f32.mrf.mxu3 }
 0x74b   : > { %v5730_v49 = vadd.f32 %v5665_v0, %v9137_v21 }
 0x74c   : > { %v5956_v56 = vadd.f32 %v5955_v48, %v5925_v34  ;;  %v5897_v34 = vld [vmem:[%s9391_s5 + $0x68] sm:$0xff] }
 0x74d   : > { %v5766_v39 = vadd.f32 %v9178_v60, %v5730_v49 }
 0x74f   : > { %vm5798_vm5 = vcmp.ge.f32.partialorder %v5766_v39, 0.0  ;;  %v5830_v36 = vmul.f32 0.2, %v5766_v39 }
 0x751   : > { %v5862_v32 = vsel %vm5798_vm5, %v5766_v39, %v5830_v36 }
 0x752   : > { %v5926_v44 = vmul.f32 %v5894_v35, %v5862_v32  ;;  %v5667_v37 = vpop.f32.mrf.mxu3  ;;  %v5898_v32 = vld [vmem:[%s9391_s5 + $0x70] sm:$0xff] }
 0x753   : > { %v5731_v21 = vadd.f32 %v5667_v37, %v9144_v7 }
 0x754   : > { %v5957_v57 = vadd.f32 %v5956_v56, %v5926_v44 }
 0x755   : > { %v5767_v42 = vadd.f32 %v9178_v60, %v5731_v21 }
 0x757   : > { %vm5799_vm9 = vcmp.ge.f32.partialorder %v5767_v42, 0.0  ;;  %v5831_v3 = vmul.f32 0.2, %v5767_v42  ;;  %6818 = vmatmul.msk.bf16.gmra.mxu3 %vm3913_vm8, %v9860_v28 }
 0x759   : > { %v5863_v22 = vsel %vm5799_vm9, %v5767_v42, %v5831_v3 }
 0x75a   : > { %v5927_v7 = vmul.f32 %v5895_v8, %v5863_v22  ;;  %v5670_v59 = vpop.f32.mrf.mxu3 }
 0x75b   : > { %v5732_v43 = vadd.f32 %v5670_v59, %v9155_v13 }
 0x75c   : > { %v5958_v54 = vadd.f32 %v5957_v57, %v5927_v7 }
 0x75d   : > { %v5768_v6 = vadd.f32 %v9178_v60, %v5732_v43 }
 0x75f   : > { %vm5800_vm10 = vcmp.ge.f32.partialorder %v5768_v6, 0.0  ;;  %v5832_v2 = vmul.f32 0.2, %v5768_v6 }
 0x761   : > { %v5864_v12 = vsel %vm5800_vm10, %v5768_v6, %v5832_v2  ;;  %v5539_v6 = vpop.f32.mrf.mxu2 }
 0x762   : > { %v5928_v48 = vmul.f32 %v5896_v10, %v5864_v12  ;;  %v5672_v40 = vpop.f32.mrf.mxu3 }
 0x763   : > { %v5733_v62 = vadd.f32 %v5672_v40, %v9162_v26 }
 0x764   : > { %v5959_v27 = vadd.f32 %v5958_v54, %v5928_v48  ;;  %v5902_v48 = vld [vmem:[%s9391_s5 + $0x90] sm:$0xff] }
 0x765   : > { %v5769_v13 = vadd.f32 %v9178_v60, %v5733_v62 }
 0x767   : > { %vm5801_vm11 = vcmp.ge.f32.partialorder %v5769_v13, 0.0  ;;  %v5833_v14 = vmul.f32 0.2, %v5769_v13  ;;  %6819 = vmatmul.msk.bf16.gmra.mxu3 %vm3913_vm8, %v5603_v20 }
 0x769   : > { %v5865_v0 = vsel %vm5801_vm11, %v5769_v13, %v5833_v14  ;;  %v5389_v13 = vpop.f32.mrf.mxu1  ;;  %v5542_v14 = vpop.f32.mrf.mxu2 }
 0x76a   : > { %v5929_v49 = vmul.f32 %v5897_v34, %v5865_v0  ;;  %v5675_v56 = vpop.f32.mrf.mxu3 }
 0x76b   : > { %v5734_v39 = vadd.f32 %v5675_v56, %v9172_v25  ;;  %v5899_v25 = vld [vmem:[%s9391_s5 + $0x78] sm:$0xff] }
 0x76c   : > { %v5960_v36 = vadd.f32 %v5959_v27, %v5929_v49  ;;  %v5903_v49 = vld [vmem:[%s9391_s5 + $0x98] sm:$0xff] }
 0x76d   : > { %v5770_v26 = vadd.f32 %v9178_v60, %v5734_v39 }
 0x76f   : > { %vm5802_vm2 = vcmp.ge.f32.partialorder %v5770_v26, 0.0  ;;  %v5834_v35 = vmul.f32 0.2, %v5770_v26 }
 0x771   : > { %v5866_v51 = vsel %vm5802_vm2, %v5770_v26, %v5834_v35 }
 0x772   : > { %v5930_v47 = vmul.f32 %v5898_v32, %v5866_v51  ;;  %v5677_v33 = vpop.f32.mrf.mxu3  ;;  %v5391_v32 = vpop.f32.mrf.mxu1 }
 0x773   : > { %v5735_v61 = vadd.f32 %v5677_v33, %v9183_v15  ;;  %v5900_v15 = vld [vmem:[%s9391_s5 + $0x80] sm:$0xff] }
 0x774   : > { %v5961_v44 = vadd.f32 %v5960_v36, %v5930_v47  ;;  %v5435_v47 = vadd.f32 %v5386_v58, %v9070_v31  ;;  %v5905_v31 = vld [vmem:[%s9391_s5 + $0xa8] sm:$0xff] }
 0x775   : > { %v5771_v37 = vadd.f32 %v9178_v60, %v5735_v61  ;;  %v5904_v61 = vld [vmem:[%s9391_s5 + $0xa0] sm:$0xff] }
 0x777   : > { %vm5803_vm8 = vcmp.ge.f32.partialorder %v5771_v37, 0.0  ;;  %v5835_v21 = vmul.f32 0.2, %v5771_v37 }
 0x779   : > { %v5867_v57 = vsel %vm5803_vm8, %v5771_v37, %v5835_v21 }
 0x77a   : > { %v5931_v42 = vmul.f32 %v5899_v25, %v5867_v57  ;;  %v5680_v53 = vpop.f32.mrf.mxu3 }
 0x77b   : > { %v5736_v17 = vadd.f32 %v5680_v53, %v9197_v5  ;;  %v5901_v5 = vld [vmem:[%s9391_s5 + $0x88] sm:$0xff]  ;;  %v5394_v53 = vpop.f32.mrf.mxu1 }
 0x77c   : > { %v5962_v3 = vadd.f32 %v5961_v44, %v5931_v42  ;;  %v5588_v44 = vadd.f32 %v5539_v6, %v5435_v47 }
 0x77d   : > { %v5772_v8 = vadd.f32 %v9178_v60, %v5736_v17  ;;  %v5436_v17 = vadd.f32 %v5389_v13, %v9081_v46  ;;  %v5906_v46 = vld [vmem:[%s9391_s5 + $0xb0] sm:$0xff] }
 0x77f   : > { %vm5804_vm12 = vcmp.ge.f32.partialorder %v5772_v8, 0.0  ;;  %v5836_v28 = vmul.f32 0.2, %v5772_v8 }
 0x781   : > { %v5868_v22 = vsel %vm5804_vm12, %v5772_v8, %v5836_v28  ;;  %v5589_v28 = vadd.f32 %v5542_v14, %v5436_v17 }
 0x782   : > { %v5932_v1 = vmul.f32 %v5900_v15, %v5868_v22  ;;  %v5682_v55 = vpop.f32.mrf.mxu3 }
 0x783   : > { %v5737_v7 = vadd.f32 %v5682_v55, %v9206_v45 }
 0x784   : > { %v5963_v59 = vadd.f32 %v5962_v3, %v5932_v1 }
 0x785   : > { %v5773_v43 = vadd.f32 %v9178_v60, %v5737_v7 }
 0x787   : > { %vm5805_vm13 = vcmp.ge.f32.partialorder %v5773_v43, 0.0  ;;  %v5837_v54 = vmul.f32 0.2, %v5773_v43 }
 0x789   : > { %v5869_v63 = vsel %vm5805_vm13, %v5773_v43, %v5837_v54  ;;  %v5437_v43 = vadd.f32 %v5391_v32, %v9088_v19 }
 0x78a   : > { %v5933_v2 = vmul.f32 %v5901_v5, %v5869_v63  ;;  %v5685_v10 = vpop.f32.mrf.mxu3  ;;  %v5396_v5 = vpop.f32.mrf.mxu1 }
 0x78b   : > { %v5738_v38 = vadd.f32 %v5685_v10, %v9217_v30 }
 0x78c   : > { %v5964_v29 = vadd.f32 %v5963_v59, %v5933_v2 }
 0x78d   : > { %v5774_v12 = vadd.f32 %v9178_v60, %v5738_v38 }
 0x78f   : > { %vm5806_vm14 = vcmp.ge.f32.partialorder %v5774_v12, 0.0  ;;  %v5838_v45 = vmul.f32 0.2, %v5774_v12 }
 0x791   : > { %v5870_v40 = vsel %vm5806_vm14, %v5774_v12, %v5838_v45  ;;  %v5438_v45 = vadd.f32 %v5394_v53, %v9099_v11 }
 0x792   : > { %v5934_v62 = vmul.f32 %v5902_v48, %v5870_v40  ;;  %v5687_v27 = vpop.f32.mrf.mxu3  ;;  %v5907_v48 = vld [vmem:[%s9391_s5 + $0xb8] sm:$0xff] }
 0x793   : > { %v5739_v20 = vadd.f32 %v5687_v27, %v9226_v9  ;;  %v5544_v9 = vpop.f32.mrf.mxu2 }
 0x794   : > { %v5965_v34 = vadd.f32 %v5964_v29, %v5934_v62  ;;  %v5590_v58 = vadd.f32 %v5544_v9, %v5437_v43 }
 0x795   : > { %v5775_v0 = vadd.f32 %v9178_v60, %v5739_v20  ;;  %v5399_v20 = vpop.f32.mrf.mxu1 }
 0x797   : > { %vm5807_vm15 = vcmp.ge.f32.partialorder %v5775_v0, 0.0  ;;  %v5839_v30 = vmul.f32 0.2, %v5775_v0 }
 0x799   : > { %v5871_v56 = vsel %vm5807_vm15, %v5775_v0, %v5839_v30 }
 0x79a   : > { %v5935_v39 = vmul.f32 %v5903_v49, %v5871_v56  ;;  %v5690_v36 = vpop.f32.mrf.mxu3  ;;  %v5439_v49 = vadd.f32 %v5396_v5, %v9106_v50  ;;  %v5908_v56 = vld [vmem:[%s9391_s5 + $0xc0] sm:$0xff] }
 0x79b   : > { %v5740_v26 = vadd.f32 %v5690_v36, %v9236_v24  ;;  %v5547_v8 = vpop.f32.mrf.mxu2 }
 0x79c   : > { %v5966_v35 = vadd.f32 %v5965_v34, %v5935_v39  ;;  %v5591_v40 = vadd.f32 %v5547_v8, %v5438_v45  ;;  %v5912_v45 = vld [vmem:[%s9391_s5 + $0xe0] sm:$0xff] }
 0x79d   : > { %v5776_v51 = vadd.f32 %v9178_v60, %v5740_v26  ;;  %v5401_v9 = vpop.f32.mrf.mxu1 }
 0x79f   : > { %vm5808_vm0 = vcmp.ge.f32.partialorder %v5776_v51, 0.0  ;;  %v5840_v33 = vmul.f32 0.2, %v5776_v51 }
 0x7a1   : > { %v5872_v37 = vsel %vm5808_vm0, %v5776_v51, %v5840_v33 }
 0x7a2   : > { %v5936_v21 = vmul.f32 %v5904_v61, %v5872_v37  ;;  %v5692_v25 = vpop.f32.mrf.mxu3  ;;  %v5440_v61 = vadd.f32 %v5399_v20, %v9117_v16  ;;  %v5910_v16 = vld [vmem:[%s9391_s5 + $0xd0] sm:$0xff] }
 0x7a3   : > { %v5741_v57 = vadd.f32 %v5692_v25, %v5588_v44  ;;  %v5549_v6 = vpop.f32.mrf.mxu2  ;;  %v5909_v44 = vld [vmem:[%s9391_s5 + $0xc8] sm:$0xff] }
 0x7a4   : > { %v5967_v42 = vadd.f32 %v5966_v35, %v5936_v21  ;;  %v5592_v39 = vadd.f32 %v5549_v6, %v5439_v49 }
 0x7a5   : > { %v5777_v24 = vadd.f32 %v9178_v60, %v5741_v57  ;;  %v5404_v17 = vpop.f32.mrf.mxu1 }
 0x7a6   : > { %v5442_v43 = vadd.f32 %v5404_v17, %v9135_v4 }
 0x7a7   : > { %vm5809_vm1 = vcmp.ge.f32.partialorder %v5777_v24, 0.0  ;;  %v5841_v3 = vmul.f32 0.2, %v5777_v24 }
 0x7a9   : > { %v5873_v15 = vsel %vm5809_vm1, %v5777_v24, %v5841_v3  ;;  %v5441_v3 = vadd.f32 %v5401_v9, %v9124_v23  ;;  %v5911_v23 = vld [vmem:[%s9391_s5 + $0xd8] sm:$0xff] }
 0x7aa   : > { %v5937_v22 = vmul.f32 %v5905_v31, %v5873_v15  ;;  %v5695_v1 = vpop.f32.mrf.mxu3 }
 0x7ab   : > { %v5742_v55 = vadd.f32 %v5695_v1, %v5589_v28  ;;  %v5552_v34 = vpop.f32.mrf.mxu2 }
 0x7ac   : > { %v5968_v7 = vadd.f32 %v5967_v42, %v5937_v22  ;;  %v5593_v37 = vadd.f32 %v5552_v34, %v5440_v61 }
 0x7ad   : > { %v5778_v59 = vadd.f32 %v9178_v60, %v5742_v55 }
 0x7af   : > { %vm5810_vm3 = vcmp.ge.f32.partialorder %v5778_v59, 0.0  ;;  %v5842_v54 = vmul.f32 0.2, %v5778_v59 }
 0x7b1   : > { %v5874_v63 = vsel %vm5810_vm3, %v5778_v59, %v5842_v54 }
 0x7b2   : > { %v5938_v2 = vmul.f32 %v5906_v46, %v5874_v63  ;;  %v5697_v10 = vpop.f32.mrf.mxu3  ;;  %v5406_v46 = vpop.f32.mrf.mxu1 }
 0x7b3   : > { %v5743_v38 = vadd.f32 %v5697_v10, %v5590_v58  ;;  %v5554_v33 = vpop.f32.mrf.mxu2 }
 0x7b4   : > { %v5969_v29 = vadd.f32 %v5968_v7, %v5938_v2  ;;  %v5594_v28 = vadd.f32 %v5554_v33, %v5441_v3 }
 0x7b5   : > { %v5779_v12 = vadd.f32 %v9178_v60, %v5743_v38 }
 0x7b7   : > { %vm5811_vm4 = vcmp.ge.f32.partialorder %v5779_v12, 0.0  ;;  %v5843_v19 = vmul.f32 0.2, %v5779_v12 }
 0x7b9   : > { %v5875_v62 = vsel %vm5811_vm4, %v5779_v12, %v5843_v19  ;;  %v5443_v12 = vadd.f32 %v5406_v46, %v9142_v18 }
 0x7ba   : > { %v5939_v27 = vmul.f32 %v5907_v48, %v5875_v62  ;;  %v5700_v13 = vpop.f32.mrf.mxu3 }
 0x7bb   : > { %v5744_v14 = vadd.f32 %v5700_v13, %v5591_v40  ;;  %v5557_v8 = vpop.f32.mrf.mxu2  ;;  %v5409_v13 = vpop.f32.mrf.mxu1 }
 0x7bc   : > { %v5970_v0 = vadd.f32 %v5969_v29, %v5939_v27  ;;  %v5595_v5 = vadd.f32 %v5557_v8, %v5442_v43 }
 0x7bd   : > { %v5780_v30 = vadd.f32 %v9178_v60, %v5744_v14 }
 0x7bf   : > { %vm5812_vm5 = vcmp.ge.f32.partialorder %v5780_v30, 0.0  ;;  %v5844_v11 = vmul.f32 0.2, %v5780_v30 }
 0x7c1   : > { %v5876_v36 = vsel %vm5812_vm5, %v5780_v30, %v5844_v11  ;;  %v5913_v30 = vld [vmem:[%s9391_s5 + $0xe8] sm:$0xff] }
 0x7c2   : > { %v5940_v26 = vmul.f32 %v5908_v56, %v5876_v36  ;;  %v5702_v35 = vpop.f32.mrf.mxu3 }
 0x7c3   : > { %v5745_v32 = vadd.f32 %v5702_v35, %v5592_v39  ;;  %v5559_v63 = vpop.f32.mrf.mxu2 }
 0x7c4   : > { %v5971_v51 = vadd.f32 %v5970_v0, %v5940_v26  ;;  %v5596_v19 = vadd.f32 %v5559_v63, %v5443_v12  ;;  %v5444_v0 = vadd.f32 %v5409_v13, %v9153_v52 }
 0x7c5   : > { %v5781_v47 = vadd.f32 %v9178_v60, %v5745_v32  ;;  %v5411_v32 = vpop.f32.mrf.mxu1 }
 0x7c6   : > { %v5445_v9 = vadd.f32 %v5411_v32, %v9160_v41  ;;  %v5915_v41 = vld [vmem:[%s9391_s5 + $0xf8] sm:$0xff] }
 0x7c7   : > { %vm5813_vm6 = vcmp.ge.f32.partialorder %v5781_v47, 0.0  ;;  %v5845_v50 = vmul.f32 0.2, %v5781_v47 }
 0x7c9   : > { %v5877_v21 = vsel %vm5813_vm6, %v5781_v47, %v5845_v50  ;;  %v5914_v47 = vld [vmem:[%s9391_s5 + $0xf0] sm:$0xff] }
 0x7ca   : > { %v5941_v25 = vmul.f32 %v5909_v44, %v5877_v21  ;;  %v5705_v57 = vpop.f32.mrf.mxu3 }
 0x7cb   : > { %v5746_v42 = vadd.f32 %v5705_v57, %v5593_v37  ;;  %v5562_v20 = vpop.f32.mrf.mxu2 }
 0x7cc   : > { %v5972_v24 = vadd.f32 %v5971_v51, %v5941_v25  ;;  %v5597_v49 = vadd.f32 %v5562_v20, %v5444_v0 }
 0x7cd   : > { %v5782_v53 = vadd.f32 %v9178_v60, %v5746_v42 }
 0x7cf   : > { %vm5814_vm7 = vcmp.ge.f32.partialorder %v5782_v53, 0.0  ;;  %v5846_v31 = vmul.f32 0.2, %v5782_v53 }
 0x7d1   : > { %v5878_v15 = vsel %vm5814_vm7, %v5782_v53, %v5846_v31 }
 0x7d2   : > { %v5942_v22 = vmul.f32 %v5910_v16, %v5878_v15  ;;  %v5707_v1 = vpop.f32.mrf.mxu3 }
 0x7d3   : > { %v5747_v55 = vadd.f32 %v5707_v1, %v5594_v28  ;;  %v5564_v51 = vpop.f32.mrf.mxu2 }
 0x7d4   : > { %v5973_v7 = vadd.f32 %v5972_v24, %v5942_v22  ;;  %v5598_v33 = vadd.f32 %v5564_v51, %v5445_v9 }
 0x7d5   : > { %v5783_v59 = vadd.f32 %v9178_v60, %v5747_v55 }
 0x7d7   : > { %vm5815_vm9 = vcmp.ge.f32.partialorder %v5783_v59, 0.0  ;;  %v5847_v54 = vmul.f32 0.2, %v5783_v59 }
 0x7d9   : > { %v5879_v58 = vsel %vm5815_vm9, %v5783_v59, %v5847_v54 }
 0x7da   : > { %v5943_v6 = vmul.f32 %v5911_v23, %v5879_v58  ;;  %v5710_v2 = vpop.f32.mrf.mxu3 }
 0x7db   : > { %v5748_v10 = vadd.f32 %v5710_v2, %v5595_v5 }
 0x7dc   : > { %v5974_v38 = vadd.f32 %v5973_v7, %v5943_v6 }
 0x7dd   : > { %v5784_v29 = vadd.f32 %v9178_v60, %v5748_v10 }
 0x7df   : > { %vm5816_vm10 = vcmp.ge.f32.partialorder %v5784_v29, 0.0  ;;  %v5848_v4 = vmul.f32 0.2, %v5784_v29 }
 0x7e1   : > { %v5880_v48 = vsel %vm5816_vm10, %v5784_v29, %v5848_v4 }
 0x7e2   : > { %v5712_v40 = vpop.f32.mrf.mxu3  ;;  %v5944_v62 = vmul.f32 %v5912_v45, %v5880_v48 }
 0x7e3   : > { %v5749_v27 = vadd.f32 %v5712_v40, %v5596_v19 }
 0x7e4   : > { %v5975_v14 = vadd.f32 %v5974_v38, %v5944_v62 }
 0x7e5   : > { %v5785_v34 = vadd.f32 %v9178_v60, %v5749_v27 }
 0x7e7   : > { %vm5817_vm11 = vcmp.ge.f32.partialorder %v5785_v34, 0.0  ;;  %v5849_v18 = vmul.f32 0.2, %v5785_v34 }
 0x7e9   : > { %v5881_v11 = vsel %vm5817_vm11, %v5785_v34, %v5849_v18 }
 0x7ea   : > { %v5715_v56 = vpop.f32.mrf.mxu3  ;;  %v5945_v39 = vmul.f32 %v5913_v30, %v5881_v11 }
 0x7eb   : > { %v5750_v36 = vadd.f32 %v5715_v56, %v5597_v49 }
 0x7ec   : > { %v5976_v26 = vadd.f32 %v5975_v14, %v5945_v39 }
 0x7ed   : > { %v5786_v35 = vadd.f32 %v9178_v60, %v5750_v36 }
 0x7ef   : > { %vm5818_vm2 = vcmp.ge.f32.partialorder %v5786_v35, 0.0  ;;  %v5850_v52 = vmul.f32 0.2, %v5786_v35 }
 0x7f1   : > { %v5882_v61 = vsel %vm5818_vm2, %v5786_v35, %v5850_v52 }
 0x7f2   : > { %v5717_v50 = vpop.f32.mrf.mxu3  ;;  %v5946_v44 = vmul.f32 %v5914_v47, %v5882_v61 }
 0x7f3   : > { %v5751_v37 = vadd.f32 %v5717_v50, %v5598_v33 }
 0x7f4   : > { %v5977_v21 = vadd.f32 %v5976_v26, %v5946_v44 }
 0x7f5   : > { %v5787_v25 = vadd.f32 %v9178_v60, %v5751_v37  ;;  %v5989_v60 = vld [vmem:[#allocation2] sm:$0x1] }
 0x7f7   : > { %v5851_v57 = vmul.f32 0.2, %v5787_v25  ;;  %vm5819_vm8 = vcmp.ge.f32.partialorder %v5787_v25, 0.0 }
 0x7f9   : > { %v5883_v42 = vsel %vm5819_vm8, %v5787_v25, %v5851_v57 }
 0x7fa   : > { %v5947_v24 = vmul.f32 %v5915_v41, %v5883_v42 }
 0x7fc   : > { %v5978_v53 = vadd.f32 %v5977_v21, %v5947_v24 }
 0x7fe   : > { %5979 = vadd.xlane.f32.xlu0 %v5978_v53 }
 0x871   : > { %v5980_v17 = vpop.xlane.xlu0 %5979 }
 0x872   : > { %v5981_v3 = vrot.slane %v5980_v17, 4 }
 0x874   : > { %v5982_v31 = vadd.f32 %v5981_v3, %v5980_v17 }
 0x876   : > { %v5983_v16 = vrot.slane %v5982_v31, 2 }
 0x878   : > { %v5984_v8 = vadd.f32 %v5983_v16, %v5982_v31 }
 0x87a   : > { %v5985_v28 = vrot.slane %v5984_v8, 1 }
 0x87c   : > { %v5986_v15 = vadd.f32 %v5985_v28, %v5984_v8 }
 0x87e   : > { %6962 = vpush %v5986_v15 }
 0x8af   : > { %s6963_s8 = spop %6962 }
 0x8b0   : > { %v5988_v22 = vstv %s6963_s8 }
 0x8b1   : > { %v5990_v1 = vadd.f32 %v5989_v60, %v5988_v22 }
 0x8b3   : > { %5993 = vperm.xlu0 %6974, %v5990_v1  }
 0x925   : > { %v5994_v55 = vpop.permute.xlu0 %5993 }
 0x926   : > { %v5996_v7 = vperm.slane %v5994_v55, 0 }
 0x928   : > { %5997 = vst [vmem:[%s276_s12] sm:$0x1] %v5996_v7 }
 0x929 PF: > { %s19_s26 = sadd.s32 1, %s6987_s26  }
 0x92a   : > { %p16_p4 = scmp.ge.s32.totalorder %s19_s26, 4  }
 0x92c   :  { %18 = sbr.rel (!%p16_p4) target bundleno = 3 (0x3), region = 78 }

</bundles_post_ra>
